<compile_context>
chip_gen: v7x
topology: tpu7x:2x2x1
jax: 0.10.0
libtpu: 0.0.40
codegen_flags: <defaults>
</compile_context>

<pallas_src>
import functools
import math

import jax
import jax.numpy as jnp
from jax import lax
from jax.experimental import pallas as pl
from jax.experimental.pallas import tpu as pltpu


# ----------------------------- Pallas kernel --------------------------------

def _layernorm(x, gamma, beta, eps=1e-5):
    mu = jnp.mean(x, axis=-1, keepdims=True)
    var = jnp.mean((x - mu) ** 2, axis=-1, keepdims=True)
    return (x - mu) * lax.rsqrt(var + eps) * gamma + beta


def _fused_st_kernel(heads,
                     x_ref, emb_w_ref, emb_b_ref,
                     wq_ref, wk_ref, wv_ref, wo_ref, bo_ref,
                     g1_ref, be1_ref, wf1_ref, bf1_ref, wf2_ref, bf2_ref,
                     g2_ref, be2_ref, g3_ref, be3_ref,
                     w2_ref, b2_ref, w3_ref, b3_ref,
                     o_ref, act_ref):
    """grid = (M_blocks, num_layers).  act_ref: VMEM-resident (BM, T, E) f32."""
    l = pl.program_id(1)
    BM, T, E = act_ref.shape
    hd = E // heads
    scale = 1.0 / (E ** 0.5)                      # softmax scale = 1/sqrt(embed)

    # --- temporal embedding: once per M-block, at the first layer step -------
    @pl.when(l == 0)
    def _embed():
        xf = x_ref[...].reshape(BM * T, x_ref.shape[-1]).astype(jnp.bfloat16)
        emb = jnp.dot(xf, emb_w_ref[...], preferred_element_type=jnp.float32)
        act_ref[...] = (emb + emb_b_ref[...]).reshape(BM, T, E)

    # --- one STTransformerBlock on the resident activation -------------------
    x3 = act_ref[...]                             # (BM, T, E) f32
    xf = x3.reshape(BM * T, E)
    xb = xf.astype(jnp.bfloat16)                  # bf16 MXU operand, f32 accum

    # full-width block-diagonal QKV projections (one matmul each, K = E)
    q = jnp.dot(xb, wq_ref[0], preferred_element_type=jnp.float32).reshape(BM, T, E)
    k = jnp.dot(xb, wk_ref[0], preferred_element_type=jnp.float32).reshape(BM, T, E)
    v = jnp.dot(xb, wv_ref[0], preferred_element_type=jnp.float32).reshape(BM, T, E)

    wo = wo_ref[0]                                # (E, E) f32
    att = jnp.zeros((BM * T, E), jnp.float32)
    for h in range(heads):                        # small static head count
        sl = slice(h * hd, (h + 1) * hd)
        qh, kh, vh = q[:, :, sl], k[:, :, sl], v[:, :, sl]        # (BM, T, hd)
        # batched over BM: scores (BM, T, T)
        energy = lax.dot_general(qh, kh, (((2,), (2,)), ((0,), (0,))),
                                 preferred_element_type=jnp.float32) * scale
        energy = energy - jnp.max(energy, axis=-1, keepdims=True)
        p = jnp.exp(energy)
        attn = p * pl.reciprocal(jnp.sum(p, axis=-1, keepdims=True), approx=True)
        ho = lax.dot_general(attn, vh, (((2,), (1,)), ((0,), (0,))),
                             preferred_element_type=jnp.float32)  # (BM, T, hd)
        # fc_out fused as per-head partial matmul against wo^T's head block
        att = att + jnp.dot(ho.reshape(BM * T, hd), wo[sl, :],
                            preferred_element_type=jnp.float32)
    att = att + bo_ref[0]

    # TTransformer (dropout p=0 -> identity) + outer ST norm
    h1 = _layernorm(att + xf, g1_ref[0], be1_ref[0])
    ff = jnp.maximum(
        jnp.dot(h1.astype(jnp.bfloat16), wf1_ref[0],
                preferred_element_type=jnp.float32) + bf1_ref[0], 0.0)
    ff = jnp.dot(ff.astype(jnp.bfloat16), wf2_ref[0],
                 preferred_element_type=jnp.float32) + bf2_ref[0]
    h2 = _layernorm(ff + h1, g2_ref[0], be2_ref[0])
    blk = _layernorm(h2 + xf, g3_ref[0], be3_ref[0])
    act_ref[...] = blk.reshape(BM, T, E)

    # --- conv head: once per M-block, after the last layer -------------------
    @pl.when(l == pl.num_programs(1) - 1)
    def _head():
        z = blk.reshape(BM, T, E)
        T_out = w2_ref.shape[0]
        # conv2 (1x1, fra -> T_out) batched over BM rows
        w2b = jnp.broadcast_to(w2_ref[...], (BM, T_out, T))
        c2 = lax.dot_general(w2b, z, (((2,), (1,)), ((0,), (0,))),
                             preferred_element_type=jnp.float32)  # (BM, T_out, E)
        r = jnp.maximum(c2 + b2_ref[...], 0.0)
        # conv3 (1x1, E -> 1): multiply + lane reduction
        o_ref[0] = jnp.sum(r * w3_ref[...], axis=-1) + b3_ref[...]  # (BM, T_out)


# ------------------------------ wrapper --------------------------------------

def _pick_bm(M, max_bm=32):
    """Largest divisor of M that is <= max_bm while keeping >= 2 grid blocks
    along the parallel M axis (so both TensorCores are used on v7x)."""
    best = 1
    for bm in range(1, min(max_bm, M) + 1):
        if M % bm == 0 and M // bm >= 2:
            best = bm
    return best


def _const_spec(a):
    nd = a.ndim
    return pl.BlockSpec(a.shape, lambda m, l, _nd=nd: (0,) * _nd)


def _layer_spec(a):
    # layer-stacked weight (L, r, c) -> (1, r, c) block indexed by the layer axis
    return pl.BlockSpec((1,) + a.shape[1:], lambda m, l: (l, 0, 0))


def st_transformer_forward(x, params, heads):
    bat, fra, node, fea = x.shape
    M, T = bat * node, fra
    E = params['emb_b'].shape[-1]
    L = params['wq_bd'].shape[0]
    T_out = params['conv2_w'].shape[0]

    # x.permute(0,2,1,3).reshape(-1, fra, fea)
    xt = jnp.transpose(x, (0, 2, 1, 3)).reshape(M, T, fea)

    BM = _pick_bm(M)
    num_mb = M // BM

    const_w = [params['emb_w_t'], params['emb_b']]
    layer_w = [params[k] for k in
               ('wq_bd', 'wk_bd', 'wv_bd', 'wo_t', 'bo', 'g1', 'be1',
                'wf1_t', 'bf1', 'wf2_t', 'bf2', 'g2', 'be2', 'g3', 'be3')]
    head_w = [params[k] for k in ('conv2_w', 'conv2_b', 'conv3_w', 'conv3_b')]

    # NOTE: PyTorch's `a = self.weighted_mean(input_Transformer)` is dead code
    # (result unused) and is deliberately omitted here instead of executed.

    out3 = pl.pallas_call(
        functools.partial(_fused_st_kernel, heads),
        out_shape=jax.ShapeDtypeStruct((num_mb, BM, T_out), jnp.float32),
        grid=(num_mb, L),
        in_specs=[pl.BlockSpec((BM, T, fea), lambda m, l: (m, 0, 0))]
                 + [_const_spec(a) for a in const_w]
                 + [_layer_spec(a) for a in layer_w]
                 + [_const_spec(a) for a in head_w],
        out_specs=pl.BlockSpec((1, BM, T_out), lambda m, l: (m, 0, 0)),
        scratch_shapes=[pltpu.VMEM((BM, T, E), jnp.float32)],
        compiler_params=pltpu.CompilerParams(
            dimension_semantics=("parallel", "arbitrary")),
    )(xt, *const_w, *layer_w, *head_w)

    return out3.reshape(bat, node, T_out)


# --------------------------- parameter init ----------------------------------

def init_params(key, fea, E, heads, num_layers, forward_expansion, fra, T_out):
    hd = E // heads
    assert hd * heads == E
    FE = forward_expansion * E
    keys = iter(jax.random.split(key, 16 + 16 * num_layers))

    def nrm(shape, scale=0.1):
        return (scale * jax.random.normal(next(keys), shape)).astype(jnp.float32)

    bf16 = jnp.bfloat16
    eye = jnp.eye(heads, dtype=jnp.float32)
    p = {}
    emb_w = nrm((E, fea))                                   # nn.Linear(fea, E)
    p['emb_w_t'] = emb_w.T.astype(bf16)
    p['emb_b'] = nrm((1, E))

    acc = {k: [] for k in ('wq_bd', 'wk_bd', 'wv_bd', 'wo_t', 'bo', 'g1', 'be1',
                           'wf1_t', 'bf1', 'wf2_t', 'bf2', 'g2', 'be2', 'g3', 'be3')}
    for _ in range(num_layers):
        wq, wk, wv = nrm((hd, hd)), nrm((hd, hd)), nrm((hd, hd))
        # per-head weight is shared across heads -> block-diagonal is exact
        acc['wq_bd'].append(jnp.kron(eye, wq.T))
        acc['wk_bd'].append(jnp.kron(eye, wk.T))
        acc['wv_bd'].append(jnp.kron(eye, wv.T))
        wo = nrm((E, E))
        acc['wo_t'].append(wo.T); acc['bo'].append(nrm((1, E)))
        acc['g1'].append(jnp.ones((1, E), jnp.float32))
        acc['be1'].append(jnp.zeros((1, E), jnp.float32))
        wf1 = nrm((FE, E)); acc['wf1_t'].append(wf1.T); acc['bf1'].append(nrm((1, FE)))
        wf2 = nrm((E, FE)); acc['wf2_t'].append(wf2.T); acc['bf2'].append(nrm((1, E)))
        acc['g2'].append(jnp.ones((1, E), jnp.float32))
        acc['be2'].append(jnp.zeros((1, E), jnp.float32))
        acc['g3'].append(jnp.ones((1, E), jnp.float32))
        acc['be3'].append(jnp.zeros((1, E), jnp.float32))

    mxu_dtype = {'wq_bd': bf16, 'wk_bd': bf16, 'wv_bd': bf16,
                 'wf1_t': bf16, 'wf2_t': bf16}
    for k, v in acc.items():
        p[k] = jnp.stack(v).astype(mxu_dtype.get(k, jnp.float32))

    p['conv2_w'] = nrm((T_out, fra))                        # Conv2d(fra, T_out, 1)
    p['conv2_b'] = nrm((1, T_out, 1))
    p['conv3_w'] = nrm((1, E))                              # Conv2d(E, 1, 1)
    p['conv3_b'] = nrm((1, 1))
    return p


# --------------------------- pure-JAX reference ------------------------------

def reference_forward(x, params, heads):
    bat, fra, node, fea = x.shape
    M = bat * node
    f32 = lambda a: a.astype(jnp.float32)
    xt = jnp.transpose(x, (0, 2, 1, 3)).reshape(M, fra, fea)
    out = xt @ f32(params['emb_w_t']) + params['emb_b']
    E = out.shape[-1]
    hd = E // heads
    L = params['wq_bd'].shape[0]

    def ln(y, g, b):
        mu = y.mean(-1, keepdims=True)
        var = ((y - mu) ** 2).mean(-1, keepdims=True)
        return (y - mu) / jnp.sqrt(var + 1e-5) * g + b

    for l in range(L):
        N, T, _ = out.shape
        q = (out @ f32(params['wq_bd'][l])).reshape(N, T, heads, hd)
        k = (out @ f32(params['wk_bd'][l])).reshape(N, T, heads, hd)
        v = (out @ f32(params['wv_bd'][l])).reshape(N, T, heads, hd)
        energy = jnp.einsum('nqhd,nkhd->nqkh', q, k)
        attn = jax.nn.softmax(energy / (E ** 0.5), axis=2)
        att = jnp.einsum('nqkh,nkhd->nqhd', attn, v).reshape(N, T, E)
        att = att @ params['wo_t'][l] + params['bo'][l]
        h1 = ln(att + out, params['g1'][l], params['be1'][l])
        ff = jnp.maximum(h1 @ f32(params['wf1_t'][l]) + params['bf1'][l], 0.0)
        ff = ff @ f32(params['wf2_t'][l]) + params['bf2'][l]
        h2 = ln(ff + h1, params['g2'][l], params['be2'][l])
        out = ln(h2 + out, params['g3'][l], params['be3'][l])

    T_out = params['conv2_w'].shape[0]
    c2 = jnp.einsum('ot,mte->moe', params['conv2_w'], out) + params['conv2_b']
    r = jnp.maximum(c2, 0.0)
    o = jnp.einsum('moe,e->mo', r, params['conv3_w'][0]) + params['conv3_b'][0, 0]
    return o.reshape(bat, node, T_out)


# --------------------------------- main ---------------------------------------

if __name__ == "__main__":
    # small shapes consistent with the module: x is (bat, fra, node, fea)
    bat, fra, node, fea = 2, 8, 8, 16
    embed_size, heads, num_layers = 32, 4, 3
    forward_expansion, output_T_dim = 4, 6

    key = jax.random.PRNGKey(0)
    kx, kp = jax.random.split(key)
    x = jax.random.normal(kx, (bat, fra, node, fea), dtype=jnp.float32)
    params = init_params(kp, fea, embed_size, heads, num_layers,
                         forward_expansion, fra, output_T_dim)

    fwd = jax.jit(functools.partial(st_transformer_forward, heads=heads))
    out = jax.block_until_ready(fwd(x, params))

    ref = reference_forward(x, params, heads)
    assert out.shape == (bat, node, output_T_dim), out.shape
    # tolerance covers bf16 MXU operands + approx-reciprocal softmax vs f32 ref
    assert jnp.allclose(out, ref, atol=3e-2, rtol=3e-2), \
        float(jnp.max(jnp.abs(out - ref)))
    print("KERNEL_OK")
</pallas_src>

<mosaic_0001>
module attributes {stable_mosaic.version = 11 : i64} {
  func.func @_fused_st_kernel(%arg0: i32, %arg1: i32, %arg2: memref<8x8x16xf32, #tpu.memory_space<vmem>>, %arg3: memref<16x32xbf16, #tpu.memory_space<vmem>>, %arg4: memref<1x32xf32, #tpu.memory_space<vmem>>, %arg5: memref<1x32x32xbf16, #tpu.memory_space<vmem>>, %arg6: memref<1x32x32xbf16, #tpu.memory_space<vmem>>, %arg7: memref<1x32x32xbf16, #tpu.memory_space<vmem>>, %arg8: memref<1x32x32xf32, #tpu.memory_space<vmem>>, %arg9: memref<1x1x32xf32, #tpu.memory_space<vmem>>, %arg10: memref<1x1x32xf32, #tpu.memory_space<vmem>>, %arg11: memref<1x1x32xf32, #tpu.memory_space<vmem>>, %arg12: memref<1x32x128xbf16, #tpu.memory_space<vmem>>, %arg13: memref<1x1x128xf32, #tpu.memory_space<vmem>>, %arg14: memref<1x128x32xbf16, #tpu.memory_space<vmem>>, %arg15: memref<1x1x32xf32, #tpu.memory_space<vmem>>, %arg16: memref<1x1x32xf32, #tpu.memory_space<vmem>>, %arg17: memref<1x1x32xf32, #tpu.memory_space<vmem>>, %arg18: memref<1x1x32xf32, #tpu.memory_space<vmem>>, %arg19: memref<1x1x32xf32, #tpu.memory_space<vmem>>, %arg20: memref<6x8xf32, #tpu.memory_space<vmem>>, %arg21: memref<1x6x1xf32, #tpu.memory_space<vmem>>, %arg22: memref<1x32xf32, #tpu.memory_space<vmem>>, %arg23: memref<1x1xf32, #tpu.memory_space<vmem>>, %arg24: memref<1x8x6xf32, #tpu.memory_space<vmem>>, %arg25: memref<8x8x32xf32, #tpu.memory_space<vmem>>) attributes {dimension_semantics = [#tpu.dimension_semantics<parallel>, #tpu.dimension_semantics<arbitrary>], iteration_bounds = array<i64: 2, 3>, scalar_prefetch = 0 : i64, scratch_operands = 1 : i64, tpu.core_type = #tpu.core_type<tc>, window_params = [{transform_indices = @transform_0, window_bounds = array<i64: 8, 8, 16>}, {pipeline_mode = #tpu.pipeline_mode<synchronous>, transform_indices = @transform_1, window_bounds = array<i64: 16, 32>}, {pipeline_mode = #tpu.pipeline_mode<synchronous>, transform_indices = @transform_2, window_bounds = array<i64: 1, 32>}, {transform_indices = @transform_3, window_bounds = array<i64: 1, 32, 32>}, {transform_indices = @transform_4, window_bounds = array<i64: 1, 32, 32>}, {transform_indices = @transform_5, window_bounds = array<i64: 1, 32, 32>}, {transform_indices = @transform_6, window_bounds = array<i64: 1, 32, 32>}, {transform_indices = @transform_7, window_bounds = array<i64: 1, 1, 32>}, {transform_indices = @transform_8, window_bounds = array<i64: 1, 1, 32>}, {transform_indices = @transform_9, window_bounds = array<i64: 1, 1, 32>}, {transform_indices = @transform_10, window_bounds = array<i64: 1, 32, 128>}, {transform_indices = @transform_11, window_bounds = array<i64: 1, 1, 128>}, {transform_indices = @transform_12, window_bounds = array<i64: 1, 128, 32>}, {transform_indices = @transform_13, window_bounds = array<i64: 1, 1, 32>}, {transform_indices = @transform_14, window_bounds = array<i64: 1, 1, 32>}, {transform_indices = @transform_15, window_bounds = array<i64: 1, 1, 32>}, {transform_indices = @transform_16, window_bounds = array<i64: 1, 1, 32>}, {transform_indices = @transform_17, window_bounds = array<i64: 1, 1, 32>}, {pipeline_mode = #tpu.pipeline_mode<synchronous>, transform_indices = @transform_18, window_bounds = array<i64: 6, 8>}, {pipeline_mode = #tpu.pipeline_mode<synchronous>, transform_indices = @transform_19, window_bounds = array<i64: 1, 6, 1>}, {pipeline_mode = #tpu.pipeline_mode<synchronous>, transform_indices = @transform_20, window_bounds = array<i64: 1, 32>}, {pipeline_mode = #tpu.pipeline_mode<synchronous>, transform_indices = @transform_21, window_bounds = array<i64: 1, 1>}, {transform_indices = @transform_22, window_bounds = array<i64: 1, 8, 6>}]} {
    %c0_i32 = arith.constant 0 : i32
    %0 = arith.cmpi eq, %arg1, %c0_i32 : i32
    %1 = arith.extui %0 : i1 to i32
    %c0_i32_0 = arith.constant 0 : i32
    %2 = arith.cmpi ne, %1, %c0_i32_0 : i32
    scf.if %2 {
      %c0_97 = arith.constant 0 : index
      %c0_98 = arith.constant 0 : index
      %c0_99 = arith.constant 0 : index
      %213 = vector.load %arg2[%c0_97, %c0_98, %c0_99] : memref<8x8x16xf32, #tpu.memory_space<vmem>>, vector<8x8x16xf32>
      %214 = vector.shape_cast %213 : vector<8x8x16xf32> to vector<64x16xf32>
      %215 = arith.truncf %214 : vector<64x16xf32> to vector<64x16xbf16>
      %c0_100 = arith.constant 0 : index
      %c0_101 = arith.constant 0 : index
      %216 = vector.load %arg3[%c0_100, %c0_101] : memref<16x32xbf16, #tpu.memory_space<vmem>>, vector<16x32xbf16>
      %cst_102 = arith.constant dense<0.000000e+00> : vector<64x32xf32>
      %217 = tpu.matmul %215, %216, %cst_102 {dimension_numbers = #tpu.dot_dimension_numbers<[1], [0], [0], [1], [0, 0, 1, 1], [], []>} : vector<64x16xbf16>, vector<16x32xbf16>, vector<64x32xf32> -> vector<64x32xf32>
      %c0_103 = arith.constant 0 : index
      %c0_104 = arith.constant 0 : index
      %218 = vector.load %arg4[%c0_103, %c0_104] : memref<1x32xf32, #tpu.memory_space<vmem>>, vector<1x32xf32>
      %219 = vector.broadcast %218 : vector<1x32xf32> to vector<64x32xf32>
      %220 = arith.addf %217, %219 : vector<64x32xf32>
      %221 = vector.shape_cast %220 : vector<64x32xf32> to vector<8x8x32xf32>
      %c0_105 = arith.constant 0 : index
      %c0_106 = arith.constant 0 : index
      %c0_107 = arith.constant 0 : index
      %222 = vector.load %arg25[%c0_105, %c0_106, %c0_107] : memref<8x8x32xf32, #tpu.memory_space<vmem>>, vector<8x8x32xf32>
      tpu.vector_store %arg25[%c0_105, %c0_106, %c0_107], %221 {strides = array<i32>} : memref<8x8x32xf32, #tpu.memory_space<vmem>>, vector<8x8x32xf32>,
    } else {
    }
    %c0 = arith.constant 0 : index
    %c0_1 = arith.constant 0 : index
    %c0_2 = arith.constant 0 : index
    %3 = vector.load %arg25[%c0, %c0_1, %c0_2] : memref<8x8x32xf32, #tpu.memory_space<vmem>>, vector<8x8x32xf32>
    %4 = vector.shape_cast %3 : vector<8x8x32xf32> to vector<64x32xf32>
    %5 = arith.truncf %4 : vector<64x32xf32> to vector<64x32xbf16>
    %c0_3 = arith.constant 0 : index
    %c0_4 = arith.constant 0 : index
    %c0_5 = arith.constant 0 : index
    %6 = vector.load %arg5[%c0_3, %c0_4, %c0_5] : memref<1x32x32xbf16, #tpu.memory_space<vmem>>, vector<1x32x32xbf16>
    %7 = vector.shape_cast %6 : vector<1x32x32xbf16> to vector<32x32xbf16>
    %cst = arith.constant dense<0.000000e+00> : vector<64x32xf32>
    %8 = tpu.matmul %5, %7, %cst {dimension_numbers = #tpu.dot_dimension_numbers<[1], [0], [0], [1], [0, 0, 1, 1], [], []>} : vector<64x32xbf16>, vector<32x32xbf16>, vector<64x32xf32> -> vector<64x32xf32>
    %9 = vector.shape_cast %8 : vector<64x32xf32> to vector<8x8x32xf32>
    %c0_6 = arith.constant 0 : index
    %c0_7 = arith.constant 0 : index
    %c0_8 = arith.constant 0 : index
    %10 = vector.load %arg6[%c0_6, %c0_7, %c0_8] : memref<1x32x32xbf16, #tpu.memory_space<vmem>>, vector<1x32x32xbf16>
    %11 = vector.shape_cast %10 : vector<1x32x32xbf16> to vector<32x32xbf16>
    %cst_9 = arith.constant dense<0.000000e+00> : vector<64x32xf32>
    %12 = tpu.matmul %5, %11, %cst_9 {dimension_numbers = #tpu.dot_dimension_numbers<[1], [0], [0], [1], [0, 0, 1, 1], [], []>} : vector<64x32xbf16>, vector<32x32xbf16>, vector<64x32xf32> -> vector<64x32xf32>
    %13 = vector.shape_cast %12 : vector<64x32xf32> to vector<8x8x32xf32>
    %c0_10 = arith.constant 0 : index
    %c0_11 = arith.constant 0 : index
    %c0_12 = arith.constant 0 : index
    %14 = vector.load %arg7[%c0_10, %c0_11, %c0_12] : memref<1x32x32xbf16, #tpu.memory_space<vmem>>, vector<1x32x32xbf16>
    %15 = vector.shape_cast %14 : vector<1x32x32xbf16> to vector<32x32xbf16>
    %cst_13 = arith.constant dense<0.000000e+00> : vector<64x32xf32>
    %16 = tpu.matmul %5, %15, %cst_13 {dimension_numbers = #tpu.dot_dimension_numbers<[1], [0], [0], [1], [0, 0, 1, 1], [], []>} : vector<64x32xbf16>, vector<32x32xbf16>, vector<64x32xf32> -> vector<64x32xf32>
    %17 = vector.shape_cast %16 : vector<64x32xf32> to vector<8x8x32xf32>
    %c0_14 = arith.constant 0 : index
    %c0_15 = arith.constant 0 : index
    %c0_16 = arith.constant 0 : index
    %18 = vector.load %arg8[%c0_14, %c0_15, %c0_16] : memref<1x32x32xf32, #tpu.memory_space<vmem>>, vector<1x32x32xf32>
    %19 = vector.shape_cast %18 : vector<1x32x32xf32> to vector<32x32xf32>
    %cst_17 = arith.constant 0.000000e+00 : f32
    %20 = vector.broadcast %cst_17 : f32 to vector<64x32xf32>
    %21 = vector.extract_strided_slice %9 {offsets = [0, 0, 0], sizes = [8, 8, 8], strides = [1, 1, 1]} : vector<8x8x32xf32> to vector<8x8x8xf32>
    %22 = vector.extract_strided_slice %13 {offsets = [0, 0, 0], sizes = [8, 8, 8], strides = [1, 1, 1]} : vector<8x8x32xf32> to vector<8x8x8xf32>
    %23 = vector.extract_strided_slice %17 {offsets = [0, 0, 0], sizes = [8, 8, 8], strides = [1, 1, 1]} : vector<8x8x32xf32> to vector<8x8x8xf32>
    %cst_18 = arith.constant dense<0.000000e+00> : vector<8x8x8xf32>
    %24 = tpu.matmul %21, %22, %cst_18 {dimension_numbers = #tpu.dot_dimension_numbers<[2], [2], [1], [1], [0, 0, 0, 1, 1, 1], [0], [0]>} : vector<8x8x8xf32>, vector<8x8x8xf32>, vector<8x8x8xf32> -> vector<8x8x8xf32>
    %cst_19 = arith.constant 0.176776692 : f32
    %25 = vector.broadcast %cst_19 : f32 to vector<8x8x8xf32>
    %26 = arith.mulf %24, %25 : vector<8x8x8xf32>
    %cst_20 = arith.constant dense<0xFF800000> : vector<8x8xf32>
    %27 = vector.multi_reduction <maximumf>, %26, %cst_20 [2] : vector<8x8x8xf32> to vector<8x8xf32>
    %28 = vector.shape_cast %27 : vector<8x8xf32> to vector<8x8x1xf32>
    %29 = vector.broadcast %28 : vector<8x8x1xf32> to vector<8x8x8xf32>
    %30 = arith.subf %26, %29 : vector<8x8x8xf32>
    %31 = math.exp %30 : vector<8x8x8xf32>
    %cst_21 = arith.constant dense<0.000000e+00> : vector<8x8xf32>
    %32 = vector.multi_reduction <add>, %31, %cst_21 [2] : vector<8x8x8xf32> to vector<8x8xf32>
    %33 = vector.shape_cast %32 : vector<8x8xf32> to vector<8x8x1xf32>
    %34 = tpu.reciprocal %33 {approx = true} : vector<8x8x1xf32> -> vector<8x8x1xf32>
    %35 = vector.broadcast %34 : vector<8x8x1xf32> to vector<8x8x8xf32>
    %36 = arith.mulf %31, %35 : vector<8x8x8xf32>
    %cst_22 = arith.constant dense<0.000000e+00> : vector<8x8x8xf32>
    %37 = tpu.matmul %36, %23, %cst_22 {dimension_numbers = #tpu.dot_dimension_numbers<[2], [1], [1], [2], [0, 0, 0, 1, 1, 2], [0], [0]>} : vector<8x8x8xf32>, vector<8x8x8xf32>, vector<8x8x8xf32> -> vector<8x8x8xf32>
    %38 = vector.shape_cast %37 : vector<8x8x8xf32> to vector<64x8xf32>
    %39 = vector.extract_strided_slice %19 {offsets = [0, 0], sizes = [8, 32], strides = [1, 1]} : vector<32x32xf32> to vector<8x32xf32>
    %cst_23 = arith.constant dense<0.000000e+00> : vector<64x32xf32>
    %40 = tpu.matmul %38, %39, %cst_23 {dimension_numbers = #tpu.dot_dimension_numbers<[1], [0], [0], [1], [0, 0, 1, 1], [], []>} : vector<64x8xf32>, vector<8x32xf32>, vector<64x32xf32> -> vector<64x32xf32>
    %41 = arith.addf %20, %40 : vector<64x32xf32>
    %42 = vector.extract_strided_slice %9 {offsets = [0, 0, 8], sizes = [8, 8, 8], strides = [1, 1, 1]} : vector<8x8x32xf32> to vector<8x8x8xf32>
    %43 = vector.extract_strided_slice %13 {offsets = [0, 0, 8], sizes = [8, 8, 8], strides = [1, 1, 1]} : vector<8x8x32xf32> to vector<8x8x8xf32>
    %44 = vector.extract_strided_slice %17 {offsets = [0, 0, 8], sizes = [8, 8, 8], strides = [1, 1, 1]} : vector<8x8x32xf32> to vector<8x8x8xf32>
    %cst_24 = arith.constant dense<0.000000e+00> : vector<8x8x8xf32>
    %45 = tpu.matmul %42, %43, %cst_24 {dimension_numbers = #tpu.dot_dimension_numbers<[2], [2], [1], [1], [0, 0, 0, 1, 1, 1], [0], [0]>} : vector<8x8x8xf32>, vector<8x8x8xf32>, vector<8x8x8xf32> -> vector<8x8x8xf32>
    %cst_25 = arith.constant 0.176776692 : f32
    %46 = vector.broadcast %cst_25 : f32 to vector<8x8x8xf32>
    %47 = arith.mulf %45, %46 : vector<8x8x8xf32>
    %cst_26 = arith.constant dense<0xFF800000> : vector<8x8xf32>
    %48 = vector.multi_reduction <maximumf>, %47, %cst_26 [2] : vector<8x8x8xf32> to vector<8x8xf32>
    %49 = vector.shape_cast %48 : vector<8x8xf32> to vector<8x8x1xf32>
    %50 = vector.broadcast %49 : vector<8x8x1xf32> to vector<8x8x8xf32>
    %51 = arith.subf %47, %50 : vector<8x8x8xf32>
    %52 = math.exp %51 : vector<8x8x8xf32>
    %cst_27 = arith.constant dense<0.000000e+00> : vector<8x8xf32>
    %53 = vector.multi_reduction <add>, %52, %cst_27 [2] : vector<8x8x8xf32> to vector<8x8xf32>
    %54 = vector.shape_cast %53 : vector<8x8xf32> to vector<8x8x1xf32>
    %55 = tpu.reciprocal %54 {approx = true} : vector<8x8x1xf32> -> vector<8x8x1xf32>
    %56 = vector.broadcast %55 : vector<8x8x1xf32> to vector<8x8x8xf32>
    %57 = arith.mulf %52, %56 : vector<8x8x8xf32>
    %cst_28 = arith.constant dense<0.000000e+00> : vector<8x8x8xf32>
    %58 = tpu.matmul %57, %44, %cst_28 {dimension_numbers = #tpu.dot_dimension_numbers<[2], [1], [1], [2], [0, 0, 0, 1, 1, 2], [0], [0]>} : vector<8x8x8xf32>, vector<8x8x8xf32>, vector<8x8x8xf32> -> vector<8x8x8xf32>
    %59 = vector.shape_cast %58 : vector<8x8x8xf32> to vector<64x8xf32>
    %60 = vector.extract_strided_slice %19 {offsets = [8, 0], sizes = [8, 32], strides = [1, 1]} : vector<32x32xf32> to vector<8x32xf32>
    %cst_29 = arith.constant dense<0.000000e+00> : vector<64x32xf32>
    %61 = tpu.matmul %59, %60, %cst_29 {dimension_numbers = #tpu.dot_dimension_numbers<[1], [0], [0], [1], [0, 0, 1, 1], [], []>} : vector<64x8xf32>, vector<8x32xf32>, vector<64x32xf32> -> vector<64x32xf32>
    %62 = arith.addf %41, %61 : vector<64x32xf32>
    %63 = vector.extract_strided_slice %9 {offsets = [0, 0, 16], sizes = [8, 8, 8], strides = [1, 1, 1]} : vector<8x8x32xf32> to vector<8x8x8xf32>
    %64 = vector.extract_strided_slice %13 {offsets = [0, 0, 16], sizes = [8, 8, 8], strides = [1, 1, 1]} : vector<8x8x32xf32> to vector<8x8x8xf32>
    %65 = vector.extract_strided_slice %17 {offsets = [0, 0, 16], sizes = [8, 8, 8], strides = [1, 1, 1]} : vector<8x8x32xf32> to vector<8x8x8xf32>
    %cst_30 = arith.constant dense<0.000000e+00> : vector<8x8x8xf32>
    %66 = tpu.matmul %63, %64, %cst_30 {dimension_numbers = #tpu.dot_dimension_numbers<[2], [2], [1], [1], [0, 0, 0, 1, 1, 1], [0], [0]>} : vector<8x8x8xf32>, vector<8x8x8xf32>, vector<8x8x8xf32> -> vector<8x8x8xf32>
    %cst_31 = arith.constant 0.176776692 : f32
    %67 = vector.broadcast %cst_31 : f32 to vector<8x8x8xf32>
    %68 = arith.mulf %66, %67 : vector<8x8x8xf32>
    %cst_32 = arith.constant dense<0xFF800000> : vector<8x8xf32>
    %69 = vector.multi_reduction <maximumf>, %68, %cst_32 [2] : vector<8x8x8xf32> to vector<8x8xf32>
    %70 = vector.shape_cast %69 : vector<8x8xf32> to vector<8x8x1xf32>
    %71 = vector.broadcast %70 : vector<8x8x1xf32> to vector<8x8x8xf32>
    %72 = arith.subf %68, %71 : vector<8x8x8xf32>
    %73 = math.exp %72 : vector<8x8x8xf32>
    %cst_33 = arith.constant dense<0.000000e+00> : vector<8x8xf32>
    %74 = vector.multi_reduction <add>, %73, %cst_33 [2] : vector<8x8x8xf32> to vector<8x8xf32>
    %75 = vector.shape_cast %74 : vector<8x8xf32> to vector<8x8x1xf32>
    %76 = tpu.reciprocal %75 {approx = true} : vector<8x8x1xf32> -> vector<8x8x1xf32>
    %77 = vector.broadcast %76 : vector<8x8x1xf32> to vector<8x8x8xf32>
    %78 = arith.mulf %73, %77 : vector<8x8x8xf32>
    %cst_34 = arith.constant dense<0.000000e+00> : vector<8x8x8xf32>
    %79 = tpu.matmul %78, %65, %cst_34 {dimension_numbers = #tpu.dot_dimension_numbers<[2], [1], [1], [2], [0, 0, 0, 1, 1, 2], [0], [0]>} : vector<8x8x8xf32>, vector<8x8x8xf32>, vector<8x8x8xf32> -> vector<8x8x8xf32>
    %80 = vector.shape_cast %79 : vector<8x8x8xf32> to vector<64x8xf32>
    %81 = vector.extract_strided_slice %19 {offsets = [16, 0], sizes = [8, 32], strides = [1, 1]} : vector<32x32xf32> to vector<8x32xf32>
    %cst_35 = arith.constant dense<0.000000e+00> : vector<64x32xf32>
    %82 = tpu.matmul %80, %81, %cst_35 {dimension_numbers = #tpu.dot_dimension_numbers<[1], [0], [0], [1], [0, 0, 1, 1], [], []>} : vector<64x8xf32>, vector<8x32xf32>, vector<64x32xf32> -> vector<64x32xf32>
    %83 = arith.addf %62, %82 : vector<64x32xf32>
    %84 = vector.extract_strided_slice %9 {offsets = [0, 0, 24], sizes = [8, 8, 8], strides = [1, 1, 1]} : vector<8x8x32xf32> to vector<8x8x8xf32>
    %85 = vector.extract_strided_slice %13 {offsets = [0, 0, 24], sizes = [8, 8, 8], strides = [1, 1, 1]} : vector<8x8x32xf32> to vector<8x8x8xf32>
    %86 = vector.extract_strided_slice %17 {offsets = [0, 0, 24], sizes = [8, 8, 8], strides = [1, 1, 1]} : vector<8x8x32xf32> to vector<8x8x8xf32>
    %cst_36 = arith.constant dense<0.000000e+00> : vector<8x8x8xf32>
    %87 = tpu.matmul %84, %85, %cst_36 {dimension_numbers = #tpu.dot_dimension_numbers<[2], [2], [1], [1], [0, 0, 0, 1, 1, 1], [0], [0]>} : vector<8x8x8xf32>, vector<8x8x8xf32>, vector<8x8x8xf32> -> vector<8x8x8xf32>
    %cst_37 = arith.constant 0.176776692 : f32
    %88 = vector.broadcast %cst_37 : f32 to vector<8x8x8xf32>
    %89 = arith.mulf %87, %88 : vector<8x8x8xf32>
    %cst_38 = arith.constant dense<0xFF800000> : vector<8x8xf32>
    %90 = vector.multi_reduction <maximumf>, %89, %cst_38 [2] : vector<8x8x8xf32> to vector<8x8xf32>
    %91 = vector.shape_cast %90 : vector<8x8xf32> to vector<8x8x1xf32>
    %92 = vector.broadcast %91 : vector<8x8x1xf32> to vector<8x8x8xf32>
    %93 = arith.subf %89, %92 : vector<8x8x8xf32>
    %94 = math.exp %93 : vector<8x8x8xf32>
    %cst_39 = arith.constant dense<0.000000e+00> : vector<8x8xf32>
    %95 = vector.multi_reduction <add>, %94, %cst_39 [2] : vector<8x8x8xf32> to vector<8x8xf32>
    %96 = vector.shape_cast %95 : vector<8x8xf32> to vector<8x8x1xf32>
    %97 = tpu.reciprocal %96 {approx = true} : vector<8x8x1xf32> -> vector<8x8x1xf32>
    %98 = vector.broadcast %97 : vector<8x8x1xf32> to vector<8x8x8xf32>
    %99 = arith.mulf %94, %98 : vector<8x8x8xf32>
    %cst_40 = arith.constant dense<0.000000e+00> : vector<8x8x8xf32>
    %100 = tpu.matmul %99, %86, %cst_40 {dimension_numbers = #tpu.dot_dimension_numbers<[2], [1], [1], [2], [0, 0, 0, 1, 1, 2], [0], [0]>} : vector<8x8x8xf32>, vector<8x8x8xf32>, vector<8x8x8xf32> -> vector<8x8x8xf32>
    %101 = vector.shape_cast %100 : vector<8x8x8xf32> to vector<64x8xf32>
    %102 = vector.extract_strided_slice %19 {offsets = [24, 0], sizes = [8, 32], strides = [1, 1]} : vector<32x32xf32> to vector<8x32xf32>
    %cst_41 = arith.constant dense<0.000000e+00> : vector<64x32xf32>
    %103 = tpu.matmul %101, %102, %cst_41 {dimension_numbers = #tpu.dot_dimension_numbers<[1], [0], [0], [1], [0, 0, 1, 1], [], []>} : vector<64x8xf32>, vector<8x32xf32>, vector<64x32xf32> -> vector<64x32xf32>
    %104 = arith.addf %83, %103 : vector<64x32xf32>
    %c0_42 = arith.constant 0 : index
    %c0_43 = arith.constant 0 : index
    %c0_44 = arith.constant 0 : index
    %105 = vector.load %arg9[%c0_42, %c0_43, %c0_44] : memref<1x1x32xf32, #tpu.memory_space<vmem>>, vector<1x1x32xf32>
    %106 = vector.shape_cast %105 : vector<1x1x32xf32> to vector<1x32xf32>
    %107 = vector.broadcast %106 : vector<1x32xf32> to vector<64x32xf32>
    %108 = arith.addf %104, %107 : vector<64x32xf32>
    %109 = arith.addf %108, %4 : vector<64x32xf32>
    %c0_45 = arith.constant 0 : index
    %c0_46 = arith.constant 0 : index
    %c0_47 = arith.constant 0 : index
    %110 = vector.load %arg10[%c0_45, %c0_46, %c0_47] : memref<1x1x32xf32, #tpu.memory_space<vmem>>, vector<1x1x32xf32>
    %111 = vector.shape_cast %110 : vector<1x1x32xf32> to vector<1x32xf32>
    %c0_48 = arith.constant 0 : index
    %c0_49 = arith.constant 0 : index
    %c0_50 = arith.constant 0 : index
    %112 = vector.load %arg11[%c0_48, %c0_49, %c0_50] : memref<1x1x32xf32, #tpu.memory_space<vmem>>, vector<1x1x32xf32>
    %113 = vector.shape_cast %112 : vector<1x1x32xf32> to vector<1x32xf32>
    %cst_51 = arith.constant dense<0.000000e+00> : vector<64xf32>
    %114 = vector.multi_reduction <add>, %109, %cst_51 [1] : vector<64x32xf32> to vector<64xf32>
    %115 = vector.shape_cast %114 : vector<64xf32> to vector<64x1xf32>
    %cst_52 = arith.constant 3.200000e+01 : f32
    %116 = vector.broadcast %cst_52 : f32 to vector<64x1xf32>
    %117 = arith.divf %115, %116 : vector<64x1xf32>
    %118 = vector.broadcast %117 : vector<64x1xf32> to vector<64x32xf32>
    %119 = arith.subf %109, %118 : vector<64x32xf32>
    %120 = arith.mulf %119, %119 : vector<64x32xf32>
    %cst_53 = arith.constant dense<0.000000e+00> : vector<64xf32>
    %121 = vector.multi_reduction <add>, %120, %cst_53 [1] : vector<64x32xf32> to vector<64xf32>
    %122 = vector.shape_cast %121 : vector<64xf32> to vector<64x1xf32>
    %cst_54 = arith.constant 3.200000e+01 : f32
    %123 = vector.broadcast %cst_54 : f32 to vector<64x1xf32>
    %124 = arith.divf %122, %123 : vector<64x1xf32>
    %125 = vector.broadcast %117 : vector<64x1xf32> to vector<64x32xf32>
    %126 = arith.subf %109, %125 : vector<64x32xf32>
    %cst_55 = arith.constant 9.99999974E-6 : f32
    %127 = vector.broadcast %cst_55 : f32 to vector<64x1xf32>
    %128 = arith.addf %124, %127 : vector<64x1xf32>
    %129 = math.rsqrt %128 : vector<64x1xf32>
    %130 = vector.broadcast %129 : vector<64x1xf32> to vector<64x32xf32>
    %131 = arith.mulf %126, %130 : vector<64x32xf32>
    %132 = vector.broadcast %111 : vector<1x32xf32> to vector<64x32xf32>
    %133 = arith.mulf %131, %132 : vector<64x32xf32>
    %134 = vector.broadcast %113 : vector<1x32xf32> to vector<64x32xf32>
    %135 = arith.addf %133, %134 : vector<64x32xf32>
    %136 = arith.truncf %135 : vector<64x32xf32> to vector<64x32xbf16>
    %c0_56 = arith.constant 0 : index
    %c0_57 = arith.constant 0 : index
    %c0_58 = arith.constant 0 : index
    %137 = vector.load %arg12[%c0_56, %c0_57, %c0_58] : memref<1x32x128xbf16, #tpu.memory_space<vmem>>, vector<1x32x128xbf16>
    %138 = vector.shape_cast %137 : vector<1x32x128xbf16> to vector<32x128xbf16>
    %cst_59 = arith.constant dense<0.000000e+00> : vector<64x128xf32>
    %139 = tpu.matmul %136, %138, %cst_59 {dimension_numbers = #tpu.dot_dimension_numbers<[1], [0], [0], [1], [0, 0, 1, 1], [], []>} : vector<64x32xbf16>, vector<32x128xbf16>, vector<64x128xf32> -> vector<64x128xf32>
    %c0_60 = arith.constant 0 : index
    %c0_61 = arith.constant 0 : index
    %c0_62 = arith.constant 0 : index
    %140 = vector.load %arg13[%c0_60, %c0_61, %c0_62] : memref<1x1x128xf32, #tpu.memory_space<vmem>>, vector<1x1x128xf32>
    %141 = vector.shape_cast %140 : vector<1x1x128xf32> to vector<1x128xf32>
    %142 = vector.broadcast %141 : vector<1x128xf32> to vector<64x128xf32>
    %143 = arith.addf %139, %142 : vector<64x128xf32>
    %cst_63 = arith.constant 0.000000e+00 : f32
    %144 = vector.broadcast %cst_63 : f32 to vector<64x128xf32>
    %145 = arith.maximumf %143, %144 : vector<64x128xf32>
    %146 = arith.truncf %145 : vector<64x128xf32> to vector<64x128xbf16>
    %c0_64 = arith.constant 0 : index
    %c0_65 = arith.constant 0 : index
    %c0_66 = arith.constant 0 : index
    %147 = vector.load %arg14[%c0_64, %c0_65, %c0_66] : memref<1x128x32xbf16, #tpu.memory_space<vmem>>, vector<1x128x32xbf16>
    %148 = vector.shape_cast %147 : vector<1x128x32xbf16> to vector<128x32xbf16>
    %cst_67 = arith.constant dense<0.000000e+00> : vector<64x32xf32>
    %149 = tpu.matmul %146, %148, %cst_67 {dimension_numbers = #tpu.dot_dimension_numbers<[1], [0], [0], [1], [0, 0, 1, 1], [], []>} : vector<64x128xbf16>, vector<128x32xbf16>, vector<64x32xf32> -> vector<64x32xf32>
    %c0_68 = arith.constant 0 : index
    %c0_69 = arith.constant 0 : index
    %c0_70 = arith.constant 0 : index
    %150 = vector.load %arg15[%c0_68, %c0_69, %c0_70] : memref<1x1x32xf32, #tpu.memory_space<vmem>>, vector<1x1x32xf32>
    %151 = vector.shape_cast %150 : vector<1x1x32xf32> to vector<1x32xf32>
    %152 = vector.broadcast %151 : vector<1x32xf32> to vector<64x32xf32>
    %153 = arith.addf %149, %152 : vector<64x32xf32>
    %154 = arith.addf %153, %135 : vector<64x32xf32>
    %c0_71 = arith.constant 0 : index
    %c0_72 = arith.constant 0 : index
    %c0_73 = arith.constant 0 : index
    %155 = vector.load %arg16[%c0_71, %c0_72, %c0_73] : memref<1x1x32xf32, #tpu.memory_space<vmem>>, vector<1x1x32xf32>
    %156 = vector.shape_cast %155 : vector<1x1x32xf32> to vector<1x32xf32>
    %c0_74 = arith.constant 0 : index
    %c0_75 = arith.constant 0 : index
    %c0_76 = arith.constant 0 : index
    %157 = vector.load %arg17[%c0_74, %c0_75, %c0_76] : memref<1x1x32xf32, #tpu.memory_space<vmem>>, vector<1x1x32xf32>
    %158 = vector.shape_cast %157 : vector<1x1x32xf32> to vector<1x32xf32>
    %cst_77 = arith.constant dense<0.000000e+00> : vector<64xf32>
    %159 = vector.multi_reduction <add>, %154, %cst_77 [1] : vector<64x32xf32> to vector<64xf32>
    %160 = vector.shape_cast %159 : vector<64xf32> to vector<64x1xf32>
    %cst_78 = arith.constant 3.200000e+01 : f32
    %161 = vector.broadcast %cst_78 : f32 to vector<64x1xf32>
    %162 = arith.divf %160, %161 : vector<64x1xf32>
    %163 = vector.broadcast %162 : vector<64x1xf32> to vector<64x32xf32>
    %164 = arith.subf %154, %163 : vector<64x32xf32>
    %165 = arith.mulf %164, %164 : vector<64x32xf32>
    %cst_79 = arith.constant dense<0.000000e+00> : vector<64xf32>
    %166 = vector.multi_reduction <add>, %165, %cst_79 [1] : vector<64x32xf32> to vector<64xf32>
    %167 = vector.shape_cast %166 : vector<64xf32> to vector<64x1xf32>
    %cst_80 = arith.constant 3.200000e+01 : f32
    %168 = vector.broadcast %cst_80 : f32 to vector<64x1xf32>
    %169 = arith.divf %167, %168 : vector<64x1xf32>
    %170 = vector.broadcast %162 : vector<64x1xf32> to vector<64x32xf32>
    %171 = arith.subf %154, %170 : vector<64x32xf32>
    %cst_81 = arith.constant 9.99999974E-6 : f32
    %172 = vector.broadcast %cst_81 : f32 to vector<64x1xf32>
    %173 = arith.addf %169, %172 : vector<64x1xf32>
    %174 = math.rsqrt %173 : vector<64x1xf32>
    %175 = vector.broadcast %174 : vector<64x1xf32> to vector<64x32xf32>
    %176 = arith.mulf %171, %175 : vector<64x32xf32>
    %177 = vector.broadcast %156 : vector<1x32xf32> to vector<64x32xf32>
    %178 = arith.mulf %176, %177 : vector<64x32xf32>
    %179 = vector.broadcast %158 : vector<1x32xf32> to vector<64x32xf32>
    %180 = arith.addf %178, %179 : vector<64x32xf32>
    %181 = arith.addf %180, %4 : vector<64x32xf32>
    %c0_82 = arith.constant 0 : index
    %c0_83 = arith.constant 0 : index
    %c0_84 = arith.constant 0 : index
    %182 = vector.load %arg18[%c0_82, %c0_83, %c0_84] : memref<1x1x32xf32, #tpu.memory_space<vmem>>, vector<1x1x32xf32>
    %183 = vector.shape_cast %182 : vector<1x1x32xf32> to vector<1x32xf32>
    %c0_85 = arith.constant 0 : index
    %c0_86 = arith.constant 0 : index
    %c0_87 = arith.constant 0 : index
    %184 = vector.load %arg19[%c0_85, %c0_86, %c0_87] : memref<1x1x32xf32, #tpu.memory_space<vmem>>, vector<1x1x32xf32>
    %185 = vector.shape_cast %184 : vector<1x1x32xf32> to vector<1x32xf32>
    %cst_88 = arith.constant dense<0.000000e+00> : vector<64xf32>
    %186 = vector.multi_reduction <add>, %181, %cst_88 [1] : vector<64x32xf32> to vector<64xf32>
    %187 = vector.shape_cast %186 : vector<64xf32> to vector<64x1xf32>
    %cst_89 = arith.constant 3.200000e+01 : f32
    %188 = vector.broadcast %cst_89 : f32 to vector<64x1xf32>
    %189 = arith.divf %187, %188 : vector<64x1xf32>
    %190 = vector.broadcast %189 : vector<64x1xf32> to vector<64x32xf32>
    %191 = arith.subf %181, %190 : vector<64x32xf32>
    %192 = arith.mulf %191, %191 : vector<64x32xf32>
    %cst_90 = arith.constant dense<0.000000e+00> : vector<64xf32>
    %193 = vector.multi_reduction <add>, %192, %cst_90 [1] : vector<64x32xf32> to vector<64xf32>
    %194 = vector.shape_cast %193 : vector<64xf32> to vector<64x1xf32>
    %cst_91 = arith.constant 3.200000e+01 : f32
    %195 = vector.broadcast %cst_91 : f32 to vector<64x1xf32>
    %196 = arith.divf %194, %195 : vector<64x1xf32>
    %197 = vector.broadcast %189 : vector<64x1xf32> to vector<64x32xf32>
    %198 = arith.subf %181, %197 : vector<64x32xf32>
    %cst_92 = arith.constant 9.99999974E-6 : f32
    %199 = vector.broadcast %cst_92 : f32 to vector<64x1xf32>
    %200 = arith.addf %196, %199 : vector<64x1xf32>
    %201 = math.rsqrt %200 : vector<64x1xf32>
    %202 = vector.broadcast %201 : vector<64x1xf32> to vector<64x32xf32>
    %203 = arith.mulf %198, %202 : vector<64x32xf32>
    %204 = vector.broadcast %183 : vector<1x32xf32> to vector<64x32xf32>
    %205 = arith.mulf %203, %204 : vector<64x32xf32>
    %206 = vector.broadcast %185 : vector<1x32xf32> to vector<64x32xf32>
    %207 = arith.addf %205, %206 : vector<64x32xf32>
    %208 = vector.shape_cast %207 : vector<64x32xf32> to vector<8x8x32xf32>
    %c0_93 = arith.constant 0 : index
    %c0_94 = arith.constant 0 : index
    %c0_95 = arith.constant 0 : index
    %209 = vector.load %arg25[%c0_93, %c0_94, %c0_95] : memref<8x8x32xf32, #tpu.memory_space<vmem>>, vector<8x8x32xf32>
    tpu.vector_store %arg25[%c0_93, %c0_94, %c0_95], %208 {strides = array<i32>} : memref<8x8x32xf32, #tpu.memory_space<vmem>>, vector<8x8x32xf32>,
    %c2_i32 = arith.constant 2 : i32
    %210 = arith.cmpi eq, %arg1, %c2_i32 : i32
    %211 = arith.extui %210 : i1 to i32
    %c0_i32_96 = arith.constant 0 : i32
    %212 = arith.cmpi ne, %211, %c0_i32_96 : i32
    scf.if %212 {
      %213 = vector.shape_cast %207 : vector<64x32xf32> to vector<8x8x32xf32>
      %c0_97 = arith.constant 0 : index
      %c0_98 = arith.constant 0 : index
      %214 = vector.load %arg20[%c0_97, %c0_98] : memref<6x8xf32, #tpu.memory_space<vmem>>, vector<6x8xf32>
      %215 = vector.shape_cast %214 : vector<6x8xf32> to vector<1x6x8xf32>
      %216 = vector.broadcast %215 : vector<1x6x8xf32> to vector<8x6x8xf32>
      %cst_99 = arith.constant dense<0.000000e+00> : vector<8x6x32xf32>
      %217 = tpu.matmul %216, %213, %cst_99 {dimension_numbers = #tpu.dot_dimension_numbers<[2], [1], [1], [2], [0, 0, 0, 1, 1, 2], [0], [0]>} : vector<8x6x8xf32>, vector<8x8x32xf32>, vector<8x6x32xf32> -> vector<8x6x32xf32>
      %c0_100 = arith.constant 0 : index
      %c0_101 = arith.constant 0 : index
      %c0_102 = arith.constant 0 : index
      %218 = vector.load %arg21[%c0_100, %c0_101, %c0_102] : memref<1x6x1xf32, #tpu.memory_space<vmem>>, vector<1x6x1xf32>
      %219 = vector.broadcast %218 : vector<1x6x1xf32> to vector<8x6x32xf32>
      %220 = arith.addf %217, %219 : vector<8x6x32xf32>
      %cst_103 = arith.constant 0.000000e+00 : f32
      %221 = vector.broadcast %cst_103 : f32 to vector<8x6x32xf32>
      %222 = arith.maximumf %220, %221 : vector<8x6x32xf32>
      %c0_104 = arith.constant 0 : index
      %c0_105 = arith.constant 0 : index
      %223 = vector.load %arg22[%c0_104, %c0_105] : memref<1x32xf32, #tpu.memory_space<vmem>>, vector<1x32xf32>
      %224 = vector.shape_cast %223 : vector<1x32xf32> to vector<1x1x32xf32>
      %225 = vector.broadcast %224 : vector<1x1x32xf32> to vector<8x6x32xf32>
      %226 = arith.mulf %222, %225 : vector<8x6x32xf32>
      %cst_106 = arith.constant dense<0.000000e+00> : vector<8x6xf32>
      %227 = vector.multi_reduction <add>, %226, %cst_106 [2] : vector<8x6x32xf32> to vector<8x6xf32>
      %c0_107 = arith.constant 0 : index
      %c0_108 = arith.constant 0 : index
      %228 = vector.load %arg23[%c0_107, %c0_108] : memref<1x1xf32, #tpu.memory_space<vmem>>, vector<1x1xf32>
      %229 = vector.broadcast %228 : vector<1x1xf32> to vector<8x6xf32>
      %230 = arith.addf %227, %229 : vector<8x6xf32>
      %c0_109 = arith.constant 0 : index
      %c0_110 = arith.constant 0 : index
      %c0_111 = arith.constant 0 : index
      %231 = vector.load %arg24[%c0_109, %c0_110, %c0_111] : memref<1x8x6xf32, #tpu.memory_space<vmem>>, vector<1x8x6xf32>
      %232 = vector.shape_cast %231 : vector<1x8x6xf32> to vector<8x6xf32>
      %233 = vector.shape_cast %230 : vector<8x6xf32> to vector<1x8x6xf32>
      tpu.vector_store %arg24[%c0_109, %c0_110, %c0_111], %233 {strides = array<i32>} : memref<1x8x6xf32, #tpu.memory_space<vmem>>, vector<1x8x6xf32>,
    } else {
    }
    return
  }
  func.func @transform_0(%arg0: i32, %arg1: i32) -> (i32, i32, i32) {
    %c0_i32 = arith.constant 0 : i32
    %c0_i32_0 = arith.constant 0 : i32
    %c0_i32_1 = arith.constant 0 : i32
    return %arg0, %c0_i32, %c0_i32_0 : i32, i32, i32
  }
  func.func @transform_1(%arg0: i32, %arg1: i32) -> (i32, i32) {
    %c0_i32 = arith.constant 0 : i32
    %c0_i32_0 = arith.constant 0 : i32
    %c0_i32_1 = arith.constant 0 : i32
    return %c0_i32, %c0_i32_0 : i32, i32
  }
  func.func @transform_2(%arg0: i32, %arg1: i32) -> (i32, i32) {
    %c0_i32 = arith.constant 0 : i32
    %c0_i32_0 = arith.constant 0 : i32
    %c0_i32_1 = arith.constant 0 : i32
    return %c0_i32, %c0_i32_0 : i32, i32
  }
  func.func @transform_3(%arg0: i32, %arg1: i32) -> (i32, i32, i32) {
    %c0_i32 = arith.constant 0 : i32
    %c0_i32_0 = arith.constant 0 : i32
    %c0_i32_1 = arith.constant 0 : i32
    return %arg1, %c0_i32, %c0_i32_0 : i32, i32, i32
  }
  func.func @transform_4(%arg0: i32, %arg1: i32) -> (i32, i32, i32) {
    %c0_i32 = arith.constant 0 : i32
    %c0_i32_0 = arith.constant 0 : i32
    %c0_i32_1 = arith.constant 0 : i32
    return %arg1, %c0_i32, %c0_i32_0 : i32, i32, i32
  }
  func.func @transform_5(%arg0: i32, %arg1: i32) -> (i32, i32, i32) {
    %c0_i32 = arith.constant 0 : i32
    %c0_i32_0 = arith.constant 0 : i32
    %c0_i32_1 = arith.constant 0 : i32
    return %arg1, %c0_i32, %c0_i32_0 : i32, i32, i32
  }
  func.func @transform_6(%arg0: i32, %arg1: i32) -> (i32, i32, i32) {
    %c0_i32 = arith.constant 0 : i32
    %c0_i32_0 = arith.constant 0 : i32
    %c0_i32_1 = arith.constant 0 : i32
    return %arg1, %c0_i32, %c0_i32_0 : i32, i32, i32
  }
  func.func @transform_7(%arg0: i32, %arg1: i32) -> (i32, i32, i32) {
    %c0_i32 = arith.constant 0 : i32
    %c0_i32_0 = arith.constant 0 : i32
    %c0_i32_1 = arith.constant 0 : i32
    return %arg1, %c0_i32, %c0_i32_0 : i32, i32, i32
  }
  func.func @transform_8(%arg0: i32, %arg1: i32) -> (i32, i32, i32) {
    %c0_i32 = arith.constant 0 : i32
    %c0_i32_0 = arith.constant 0 : i32
    %c0_i32_1 = arith.constant 0 : i32
    return %arg1, %c0_i32, %c0_i32_0 : i32, i32, i32
  }
  func.func @transform_9(%arg0: i32, %arg1: i32) -> (i32, i32, i32) {
    %c0_i32 = arith.constant 0 : i32
    %c0_i32_0 = arith.constant 0 : i32
    %c0_i32_1 = arith.constant 0 : i32
    return %arg1, %c0_i32, %c0_i32_0 : i32, i32, i32
  }
  func.func @transform_10(%arg0: i32, %arg1: i32) -> (i32, i32, i32) {
    %c0_i32 = arith.constant 0 : i32
    %c0_i32_0 = arith.constant 0 : i32
    %c0_i32_1 = arith.constant 0 : i32
    return %arg1, %c0_i32, %c0_i32_0 : i32, i32, i32
  }
  func.func @transform_11(%arg0: i32, %arg1: i32) -> (i32, i32, i32) {
    %c0_i32 = arith.constant 0 : i32
    %c0_i32_0 = arith.constant 0 : i32
    %c0_i32_1 = arith.constant 0 : i32
    return %arg1, %c0_i32, %c0_i32_0 : i32, i32, i32
  }
  func.func @transform_12(%arg0: i32, %arg1: i32) -> (i32, i32, i32) {
    %c0_i32 = arith.constant 0 : i32
    %c0_i32_0 = arith.constant 0 : i32
    %c0_i32_1 = arith.constant 0 : i32
    return %arg1, %c0_i32, %c0_i32_0 : i32, i32, i32
  }
  func.func @transform_13(%arg0: i32, %arg1: i32) -> (i32, i32, i32) {
    %c0_i32 = arith.constant 0 : i32
    %c0_i32_0 = arith.constant 0 : i32
    %c0_i32_1 = arith.constant 0 : i32
    return %arg1, %c0_i32, %c0_i32_0 : i32, i32, i32
  }
  func.func @transform_14(%arg0: i32, %arg1: i32) -> (i32, i32, i32) {
    %c0_i32 = arith.constant 0 : i32
    %c0_i32_0 = arith.constant 0 : i32
    %c0_i32_1 = arith.constant 0 : i32
    return %arg1, %c0_i32, %c0_i32_0 : i32, i32, i32
  }
  func.func @transform_15(%arg0: i32, %arg1: i32) -> (i32, i32, i32) {
    %c0_i32 = arith.constant 0 : i32
    %c0_i32_0 = arith.constant 0 : i32
    %c0_i32_1 = arith.constant 0 : i32
    return %arg1, %c0_i32, %c0_i32_0 : i32, i32, i32
  }
  func.func @transform_16(%arg0: i32, %arg1: i32) -> (i32, i32, i32) {
    %c0_i32 = arith.constant 0 : i32
    %c0_i32_0 = arith.constant 0 : i32
    %c0_i32_1 = arith.constant 0 : i32
    return %arg1, %c0_i32, %c0_i32_0 : i32, i32, i32
  }
  func.func @transform_17(%arg0: i32, %arg1: i32) -> (i32, i32, i32) {
    %c0_i32 = arith.constant 0 : i32
    %c0_i32_0 = arith.constant 0 : i32
    %c0_i32_1 = arith.constant 0 : i32
    return %arg1, %c0_i32, %c0_i32_0 : i32, i32, i32
  }
  func.func @transform_18(%arg0: i32, %arg1: i32) -> (i32, i32) {
    %c0_i32 = arith.constant 0 : i32
    %c0_i32_0 = arith.constant 0 : i32
    %c0_i32_1 = arith.constant 0 : i32
    return %c0_i32, %c0_i32_0 : i32, i32
  }
  func.func @transform_19(%arg0: i32, %arg1: i32) -> (i32, i32, i32) {
    %c0_i32 = arith.constant 0 : i32
    %c0_i32_0 = arith.constant 0 : i32
    %c0_i32_1 = arith.constant 0 : i32
    %c0_i32_2 = arith.constant 0 : i32
    return %c0_i32, %c0_i32_0, %c0_i32_1 : i32, i32, i32
  }
  func.func @transform_20(%arg0: i32, %arg1: i32) -> (i32, i32) {
    %c0_i32 = arith.constant 0 : i32
    %c0_i32_0 = arith.constant 0 : i32
    %c0_i32_1 = arith.constant 0 : i32
    return %c0_i32, %c0_i32_0 : i32, i32
  }
  func.func @transform_21(%arg0: i32, %arg1: i32) -> (i32, i32) {
    %c0_i32 = arith.constant 0 : i32
    %c0_i32_0 = arith.constant 0 : i32
    %c0_i32_1 = arith.constant 0 : i32
    return %c0_i32, %c0_i32_0 : i32, i32
  }
  func.func @transform_22(%arg0: i32, %arg1: i32) -> (i32, i32, i32) {
    %c0_i32 = arith.constant 0 : i32
    %c0_i32_0 = arith.constant 0 : i32
    %c0_i32_1 = arith.constant 0 : i32
    return %arg0, %c0_i32, %c0_i32_0 : i32, i32, i32
  }
}

</mosaic_0001>

<bundles_post_ra>
// kernel: st_transformer_forward.1
= control target key start
LH: loop header
LB: loop body
LE: loop exit
PB: predicated region body
PF: predicated region fallthrough
CT: control target
= control target key end

     0   :  { %s10143_s29 = smov 0   ;;  %s10145_s30 = smov 0   ;;  %s11470_s0 = inlined_call_operand.vmem [shape: f32[16,8,16], index: 0, kind: input, shape index: {}]   ;;  %s11471_s1 = inlined_call_operand.vmem [shape: bf16[16,32], index: 1, kind: input, shape index: {}]   ;;  %s11472_s2 = inlined_call_operand.vmem [shape: f32[1,32], index: 2, kind: input, shape index: {}]   ;;  %s11473_s3 = inlined_call_operand.vmem [shape: bf16[3,32,32], index: 3, kind: input, shape index: {}]   ;;  %s11474_s4 = inlined_call_operand.vmem [shape: bf16[3,32,32], index: 4, kind: input, shape index: {}]   ;;  %s11475_s5 = inlined_call_operand.vmem [shape: bf16[3,32,32], index: 5, kind: input, shape index: {}]   ;;  %s11476_s6 = inlined_call_operand.vmem [shape: f32[3,32,32], index: 6, kind: input, shape index: {}]   ;;  %s11477_s7 = inlined_call_operand.vmem [shape: f32[3,1,32], index: 7, kind: input, shape index: {}]   ;;  %s11478_s8 = inlined_call_operand.vmem [shape: f32[3,1,32], index: 8, kind: input, shape index: {}]   ;;  %s11479_s9 = inlined_call_operand.vmem [shape: f32[3,1,32], index: 9, kind: input, shape index: {}]   ;;  %s11480_s10 = inlined_call_operand.vmem [shape: bf16[3,32,128], index: 10, kind: input, shape index: {}]   ;;  %s11481_s11 = inlined_call_operand.vmem [shape: f32[3,1,128], index: 11, kind: input, shape index: {}]   ;;  %s11482_s12 = inlined_call_operand.vmem [shape: bf16[3,128,32], index: 12, kind: input, shape index: {}]   ;;  %s11483_s13 = inlined_call_operand.vmem [shape: f32[3,1,32], index: 13, kind: input, shape index: {}]   ;;  %s11484_s14 = inlined_call_operand.vmem [shape: f32[3,1,32], index: 14, kind: input, shape index: {}]   ;;  %s11485_s15 = inlined_call_operand.vmem [shape: f32[3,1,32], index: 15, kind: input, shape index: {}]   ;;  %s11486_s16 = inlined_call_operand.vmem [shape: f32[3,1,32], index: 16, kind: input, shape index: {}]   ;;  %s11487_s17 = inlined_call_operand.vmem [shape: f32[3,1,32], index: 17, kind: input, shape index: {}]   ;;  %s11488_s18 = inlined_call_operand.vmem [shape: f32[6,8], index: 18, kind: input, shape index: {}]   ;;  %s11489_s19 = inlined_call_operand.vmem [shape: f32[1,6,1], index: 19, kind: input, shape index: {}]   ;;  %s11490_s20 = inlined_call_operand.vmem [shape: f32[1,32], index: 20, kind: input, shape index: {}]   ;;  %s11491_s21 = inlined_call_operand.<no memory space> [shape: f32[1,1], index: 21, kind: input, shape index: {}]   ;;  %s11492_s22 = inlined_call_operand.vmem [shape: f32[2,8,6], index: 22, kind: output, shape index: {}]  }
   0x1   :  { %11500 = sst [smem:[#allocation13_spill]] %s11470_s0  ;;  %v27_v0 = vstv %s11491_s21  ;;  %s10149_s0 = smov 0  }
   0x2   :  { %11501 = sst [smem:[#allocation14_spill]] %s11471_s1  ;;  %28 = vst [vmem:[#allocation3] sm:$0x1] %v27_v0  ;;  %s10151_s23 = smov 0  }
   0x3   :  { %11502 = sst [smem:[#allocation15_spill]] %s11472_s2 }
   0x4   :  { %11503 = sst [smem:[#allocation16_spill]] %s11473_s3 }
   0x5   :  { %11504 = sst [smem:[#allocation17_spill]] %s11474_s4  ;;  %s10147_s4 = smov 0  }
   0x6   :  { %11505 = sst [smem:[#allocation18_spill]] %s11475_s5 }
   0x7   :  { %11506 = sst [smem:[#allocation19_spill]] %s11476_s6 }
   0x8   :  { %11507 = sst [smem:[#allocation20_spill]] %s11480_s10 }
   0x9   :  { %11508 = sst [smem:[#allocation21_spill]] %s11482_s12 }
   0xa   :  { %11509 = sst [smem:[#allocation22_spill]] %s11487_s17 }
   0xb   :  { %11510 = sst [smem:[#allocation23_spill]] %s11488_s18 }
   0xc   :  { %11511 = sst [smem:[#allocation24_spill]] %s11489_s19 }
   0xd   :  { %11512 = sst [smem:[#allocation25_spill]] %s11490_s20 }
   0xe   :  { %11513 = sst [smem:[#allocation26_spill]] %s11492_s22 }
   0xf LB: > { %11514 = sst [smem:[#allocation4_spill]] %s9999_s29  ;;  %s43_s21 = sadd.s32 1, %s10007_s4  ;;  %s10015_s23 = sphi %s10151_s23, %s34_s23   ;;  %s10011_s0 = sphi %s10149_s0, %s11553_s0   ;;  %s10007_s4 = sphi %s10147_s4, %s11552_s4   ;;  %s10003_s30 = sphi %s10145_s30, %s11551_s30   ;;  %s9999_s29 = sphi %s10143_s29, %s11550_s29  }
  0x10   : > { %11515 = sst [smem:[#allocation5_spill]] %s10007_s4  ;;  %s46_s1 = sadd.s32 1, %s10011_s0 }
  0x11   : > { %11516 = sst [smem:[#allocation6_spill]] %s10011_s0  ;;  %p44_p0 = scmp.ge.s32.totalorder %s43_s21, 3 }
  0x12   : > { %11517 = sst [smem:[#allocation7_spill]] %s10015_s23  ;;  %p8770_p1 = scmp.ge.s32.totalorder %s10015_s23, 1 }
  0x13   : > { %p759_p2 = scmp.lt.s32.totalorder %s10015_s23, 7  ;;  %s11555_s21 = smov (%p44_p0, %s43_s21), 0 }
  0x14   : > { %11518 = sst [smem:[#allocation8_spill]] %s11555_s21  ;;  %s11557_s1 = smov (!%p44_p0, %s46_s1), %s10011_s0 }
  0x15   : > { %p760_p3 = pnand %p8770_p1, %p759_p2  ;;  %p48_p4 = scmp.ge.s32.totalorder %s11557_s1, 2 }
  0x17   : > { %s11559_s1 = smov (%p48_p4, %s11557_s1), 0  ;;  %763 = sbr.rel (%p760_p3) target bundleno = 5242 (0x147a), region = 108 }
  0x18   : > { %11519 = sst [smem:[#allocation9_spill]] %s11559_s1 }
  0x1e   : > { %s8771_s5 = sshll.u32 %s10003_s30, 3  ;;  %p883_p5 = scmp.lt.s32.totalorder %s9999_s29, 2 }
  0x1f   : > { %p878_p6 = scmp.lt.s32.totalorder %s8771_s5, 15  ;;  %p940_p7 = scmp.lt.s32.totalorder %s10003_s30, 1 }
  0x20   : > { %s10181_s24 = scalar_select %p883_p5, %s9999_s29, 2 }
  0x21   : > { %s11561_s5 = smov (!%p878_p6, %s8771_s5), 15  ;;  %s11520_s3 = sld [smem:[#allocation16_spill]] }
  0x22   : > { %s8975_s6 = sshll.u32 %s10181_s24, 4  ;;  %s8978_s25 = sshll.u32 %s10181_s24, 5 }
  0x23   : > { %s8772_s26 = sshll.u32 %s11561_s5, 3  ;;  %s11522_s0 = sld [smem:[#allocation13_spill]] }
  0x24   : > { %s11524_s19 = sld [smem:[#allocation17_spill]]  ;;  %s11526_s22 = sld [smem:[#allocation18_spill]] }
  0x25   : > { %s11528_s10 = sld [smem:[#allocation20_spill]]  ;;  %s11529_s12 = sld [smem:[#allocation21_spill]] }
  0x26   : > { %s930_s29 = scalar_lea.vmem %s11484_s14, %s10181_s24  ;;  %s11563_s30 = smov (!%p940_p7, %s10003_s30), 1 }
  0x27   : > { %s10188_s28 = scalar_lea.vmem %s11520_s3, %s8975_s6  ;;  %s8980_s3 = sshll.u32 %s10181_s24, 6 }
  0x28   : > { %11521 = sst [smem:[#allocation10_spill]] %s10188_s28  ;;  %s11527_s28 = sld [smem:[#allocation19_spill]] }
  0x29   : > { %s10193_s4 = scalar_lea.vmem %s11522_s0, %s8772_s26  ;;  %s8785_s26 = sshll.u32 %s11563_s30, 3 }
  0x2a   : > { %11523 = sst [smem:[#allocation11_spill]] %s10193_s4  ;;  %s10198_s18 = scalar_lea.vmem %s11524_s19, %s8975_s6 }
  0x2b   : > { %11525 = sst [smem:[#allocation12_spill]] %s10198_s18  ;;  %s10203_s2 = scalar_lea.vmem %s11526_s22, %s8975_s6 }
  0x2c   : > { %s10225_s5 = scalar_lea.vmem %s11528_s10, %s8975_s6  ;;  %s10235_s1 = scalar_lea.vmem %s11529_s12, %s8980_s3 }
  0x2d   : > { %s11530_s3 = sld [smem:[#allocation22_spill]]  ;;  %s11531_s12 = sld [smem:[#allocation26_spill]] }
  0x2e   : > { %s10208_s17 = scalar_lea.vmem %s11527_s28, %s8978_s25  ;;  %s936_s28 = scalar_lea.vmem %s11486_s16, %s10181_s24 }
  0x2f   : > { %s11532_s19 = sld [smem:[#allocation4_spill]] }
  0x33   : > { %s939_s0 = scalar_lea.vmem %s11530_s3, %s10181_s24  ;;  %s10263_s4 = scalar_lea.vmem %s11531_s12, %s8785_s26 }
  0x35   : > { %p8786_p8 = scmp.ne.s32.totalorder %s11532_s19, 0 }
  0x36   : > { %s11533_s23 = sld [smem:[#allocation14_spill]] (!%p8786_p8)  ;;  %s11534_s27 = sld [smem:[#allocation11_spill]] (!%p8786_p8)  ;;  %vm976_vm0 = vcmask (!%p8786_p8), 130048   ;;  %vm1054_vm1 = vcmask (!%p8786_p8), 261120  }
  0x37   : > { %948 = sbr.rel (%p8786_p8) target bundleno = 284 (0x11c), region = 112  ;;  %s11535_s30 = sld [smem:[#allocation15_spill]] (!%p8786_p8) }
  0x3c   : > { %v9774_v1 = vld [vmem:[%s11533_s23] sm:$0xff] (!%p8786_p8)   ;;  %v950_v3 = vld [vmem:[%s11534_s27 + $0x8] sm:$0xff] (!%p8786_p8)  ;;  %v951_v7 = vld [vmem:[%s11534_s27 + $0x10] sm:$0xff] (!%p8786_p8) }
  0x3d   : > { %v949_v2 = vld [vmem:[%s11534_s27] sm:$0xff] (!%p8786_p8)  ;;  %9202 = vmatprep.subr.bf16.mxu0 (!%p8786_p8), %v9774_v1  ;;  %9700 = vmatprep.subr.bf16.mxu1 (!%p8786_p8), %v9774_v1  ;;  %v954_v6 = vld [vmem:[%s11534_s27 + $0x28] sm:$0xff] (!%p8786_p8)  ;;  %v952_v8 = vld [vmem:[%s11534_s27 + $0x18] sm:$0xff] (!%p8786_p8) }
  0x3e   : > { %v953_v4 = vld [vmem:[%s11534_s27 + $0x20] sm:$0xff]  ;;  %v957_v5 = vpack.c.bf16 %v950_v3, %v949_v2  ;;  %9203 = vmatpush3.bf16.msra.mxu0 %v9774_v1  ;;  %9701 = vmatpush3.bf16.msra.mxu1 %v9774_v1  ;;  %v958_v10 = vpack.c.bf16 %v952_v8, %v951_v7  ;;  %v955_v11 = vld [vmem:[%s11534_s27 + $0x30] sm:$0xff]  ;;  %v956_v12 = vld [vmem:[%s11534_s27 + $0x38] sm:$0xff] }
  0x3f   : > { %v959_v9 = vpack.c.bf16 %v954_v6, %v953_v4  ;;  %v960_v13 = vpack.c.bf16 %v956_v12, %v955_v11  ;;  %v8787_v14 = vld [vmem:[%s11535_s30] ss:$0 sm:$0xff] }
  0x40   : > { %9204 = vmatprep.mubr.msk.bf16.mxu0 %vm976_vm0, %v957_v5 }
  0x41   : > { %9208 = vmatprep.mubr.msk.bf16.mxu1 %vm976_vm0, %v959_v9  ;;  %9205 = vmatmul.mubr.msk.bf16.vlgmr.msra.gmra.mrb[0].mxu0 %vm976_vm0, %v958_v10 }
  0x42   : > { %9209 = vmatmul.mubr.msk.bf16.vlgmr.msra.gmra.mrb[0].mxu1 %vm976_vm0, %v960_v13 }
 0x114   : > { %v9206_v15 = vpop.f32.mrb[0].mxu0 }
 0x115   : > { %v9210_v16 = vpop.f32.mrb[0].mxu1  ;;  %v1032_v17 = vadd.f32 %v9206_v15, %v8787_v14  ;;  %v1023_v19 = vpop.f32.mrb[1].mxu0 }
 0x116   : > { %v1048_v18 = vadd.f32 %v9210_v16, %v8787_v14  ;;  %v1039_v20 = vpop.f32.mrb[1].mxu1  ;;  %v1024_v21 = vadd.f32 %v8787_v14, %v1023_v19  ;;  %v9207_v23 = vpop.f32.mrb[2].mxu0 }
 0x117   : > { %v1040_v22 = vadd.f32 %v8787_v14, %v1039_v20  ;;  %v9211_v24 = vpop.f32.mrb[2].mxu1  ;;  %1057 = vst.msk [vmem:[#allocation2 + $0x10] sm:$0xff] %vm1054_vm1, %v1032_v17  ;;  %v1035_v25 = vadd.f32 %v9207_v23, %v8787_v14  ;;  %v1026_v27 = vpop.f32.mrb[3].mxu0 }
 0x118   : > { %1061 = vst.msk [vmem:[#allocation2 + $0x30] sm:$0xff] %vm1054_vm1, %v1048_v18  ;;  %v1051_v26 = vadd.f32 %v9211_v24, %v8787_v14  ;;  %v1042_v28 = vpop.f32.mrb[3].mxu1  ;;  %1055 = vst.msk [vmem:[#allocation2] sm:$0xff] %vm1054_vm1, %v1024_v21  ;;  %v1027_v29 = vadd.f32 %v8787_v14, %v1026_v27 }
 0x119   : > { %1059 = vst.msk [vmem:[#allocation2 + $0x20] sm:$0xff] %vm1054_vm1, %v1040_v22  ;;  %v1043_v30 = vadd.f32 %v8787_v14, %v1042_v28  ;;  %1058 = vst.msk [vmem:[#allocation2 + $0x18] sm:$0xff] %vm1054_vm1, %v1035_v25 }
 0x11a   : > { %1062 = vst.msk [vmem:[#allocation2 + $0x38] sm:$0xff] %vm1054_vm1, %v1051_v26  ;;  %1056 = vst.msk [vmem:[#allocation2 + $0x8] sm:$0xff] %vm1054_vm1, %v1027_v29 }
 0x11b   : > { %1060 = vst.msk [vmem:[#allocation2 + $0x28] sm:$0xff] %vm1054_vm1, %v1043_v30 }
 0x11c PF: > { %s11536_s23 = sld [smem:[#allocation10_spill]]  ;;  %s11537_s18 = sld [smem:[#allocation12_spill]]  ;;  %vm1091_vm2 = vcmask 261120   ;;  %v9779_v47 = vld [vmem:[%s10203_s2] sm:$0xff]   ;;  %v9780_v48 = vld [vmem:[%s10203_s2 + $0x8] sm:$0xff]   ;;  %v10017_v49 = vmov 0.0  }
 0x11d   : > { %9236 = vmatprep.subr.bf16.mxu0 %v9779_v47  ;;  %vm10018_vm3 = vmmov 0   ;;  %vm1335_vm4 = vcmask 64512   ;;  %s10019_s2 = smov 120   ;;  %s10020_s25 = smov 112  }
 0x11e   : > { %v1065_v36 = vld [vmem:[#allocation2 + $0x10] sm:$0xff]  ;;  %9237 = vmatpush3.bf16.msra.mxu0 %v9779_v47  ;;  %s10021_s21 = smov 104   ;;  %s11538_s26 = scalar_lea.vmem %s11477_s7, %s10181_s24 }
 0x11f   : > { %v1063_v33 = vld [vmem:[#allocation2] sm:$0xff]  ;;  %v1069_v44 = vld [vmem:[#allocation2 + $0x30] sm:$0xff]  ;;  %9238 = vmatprep.subr.bf16.mxu0 %v9780_v48  ;;  %s11539_s19 = scalar_lea.vmem %s11478_s8, %s10181_s24  ;;  %s11540_s27 = scalar_lea.vmem %s11479_s9, %s10181_s24 }
 0x120   : > { %v1066_v37 = vld [vmem:[#allocation2 + $0x18] sm:$0xff]  ;;  %v1067_v38 = vld [vmem:[#allocation2 + $0x20] sm:$0xff]  ;;  %s11541_s12 = scalar_lea.vmem %s11481_s11, %s10181_s24  ;;  %s11543_s3 = scalar_lea.vmem %s11485_s15, %s10181_s24 }
 0x121   : > { %v1064_v34 = vld [vmem:[#allocation2 + $0x8] sm:$0xff]  ;;  %v1072_v41 = vpack.c.bf16 %v1066_v37, %v1065_v36  ;;  %v1070_v45 = vld [vmem:[#allocation2 + $0x38] sm:$0xff] }
 0x122   : > { %v9775_v31 = vld [vmem:[%s11536_s23] sm:$0xff]   ;;  %v9776_v32 = vld [vmem:[%s11536_s23 + $0x8] sm:$0xff]   ;;  %v1071_v35 = vpack.c.bf16 %v1064_v34, %v1063_v33  ;;  %v1074_v46 = vpack.c.bf16 %v1070_v45, %v1069_v44  ;;  %9239 = vmatpush3.bf16.msra.mxu0 %v9780_v48 }
 0x123   : > { %9212 = vmatprep.subr.bf16.mxu1 %v9775_v31  ;;  %v1068_v39 = vld [vmem:[#allocation2 + $0x28] sm:$0xff]  ;;  %v9777_v40 = vld [vmem:[%s11537_s18] sm:$0xff]   ;;  %9268 = vmatprep.subr.mxu0 %v10017_v49 }
 0x124   : > { %9213 = vmatpush3.bf16.msra.mxu1 %v9775_v31  ;;  %9216 = vmatprep.mubr.msk.bf16.mxu1 %vm1091_vm2, %v1071_v35  ;;  %v9778_v42 = vld [vmem:[%s11537_s18 + $0x8] sm:$0xff]   ;;  %v1073_v43 = vpack.c.bf16 %v1068_v39, %v1067_v38  ;;  %s11542_s18 = scalar_lea.vmem %s11483_s13, %s10181_s24  ;;  %s11545_s24 = sld [smem:[#allocation4_spill]] }
 0x125   : > { %9214 = vmatprep.subr.bf16.mxu1 %v9776_v32  ;;  %9240 = vmatprep.mubr.msk.bf16.mxu0 %vm1091_vm2, %v1071_v35 }
 0x126   : > { %9241 = vmatmul.mubr.msk.bf16.vlgmr.msra.gmra.mrb[0].mxu0 %vm1091_vm2, %v1072_v41 }
 0x127   : > { %9244 = vmatprep.mubr.msk.bf16.mxu0 %vm1091_vm2, %v1073_v43 }
 0x128   : > { %9215 = vmatpush3.bf16.msra.mxu1 %v9776_v32 }
 0x129   : > { %9224 = vmatprep.subr.bf16.mxu1 %v9777_v40 }
 0x12a   : > { %p8962_p9 = scmp.ne.s32.totalorder %s11545_s24, 2 }
 0x12b   : > { %9217 = vmatmul.mubr.msk.bf16.vlgmr.msra.gmra.mrb[0].mxu1 %vm1091_vm2, %v1072_v41  ;;  %s11546_s6 = sld [smem:[#allocation23_spill]] (!%p8962_p9)  ;;  %vm10023_vm5 = vmmov (!%p8962_p9), 0   ;;  %s11548_s30 = sld [smem:[#allocation25_spill]] (!%p8962_p9)  ;;  %vm8447_vm6 = vcmask (!%p8962_p9), 259072   ;;  %vm8532_vm7 = vcmask (!%p8962_p9), 1041409   ;;  %vm8534_vm8 = vcmask (!%p8962_p9), 1042434  }
 0x12c   : > { %9220 = vmatprep.mubr.msk.bf16.mxu1 %vm1091_vm2, %v1073_v43  ;;  %9225 = vmatpush3.bf16.msra.mxu1 %v9777_v40  ;;  %vm8536_vm9 = vcmask (!%p8962_p9), 1043459   ;;  %vm8538_vm10 = vcmask (!%p8962_p9), 1044484   ;;  %vm8540_vm11 = vcmask (!%p8962_p9), 1045509   ;;  %vm8542_vm12 = vcmask (!%p8962_p9), 1046534  }
 0x12d   : > { %9226 = vmatprep.subr.bf16.mxu1 %v9778_v42  ;;  %vm8544_vm13 = vcmask (!%p8962_p9), 1047559   ;;  %vm8547_vm14 = vcmask (!%p8962_p9), 48128  }
 0x12e   : > { %9245 = vmatmul.mubr.msk.bf16.gmra.mrb[4].mxu0 %vm1091_vm2, %v1074_v46 }
 0x12f   : > { %9270 = vmatprep.mubr.msk.f32.mxu0 %vm10018_vm3, %v10017_v49 }
 0x130   : > { %9227 = vmatpush3.bf16.msra.mxu1 %v9778_v42 }
 0x131   : > { %9248 = vmatprep.subr.mxu1 %v10017_v49 }
 0x133   : > { %9221 = vmatmul.mubr.msk.bf16.gmra.mrb[4].mxu1 %vm1091_vm2, %v1074_v46 }
 0x134   : > { %9228 = vmatprep.mubr.msk.bf16.mxu1 %vm1091_vm2, %v1071_v35 }
 0x13b   : > { %9229 = vmatmul.mubr.msk.bf16.vlgmr.msra.gmra.mrb[8].mxu1 %vm1091_vm2, %v1072_v41 }
 0x13c   : > { %9232 = vmatprep.mubr.msk.bf16.mxu1 %vm1091_vm2, %v1073_v43 }
 0x143   : > { %9233 = vmatmul.mubr.msk.bf16.gmra.mrb[12].mxu1 %vm1091_vm2, %v1074_v46 }
 0x144   : > { %9250 = vmatprep.mubr.msk.f32.mxu1 %vm10018_vm3, %v10017_v49 }
 0x1f9   : > { %v10404_v2 = vpop.f32.mrb[0].mxu0 }
 0x1fa   : > { %v10406_v3 = vpop.f32.mrb[1].mxu0 }
 0x1fb   : > { %v10408_v4 = vpop.f32.mrb[2].mxu0 }
 0x1fc   : > { %v10411_v5 = vpop.f32.mrb[3].mxu0 }
 0x1fe   : > { %v10316_v50 = vpop.f32.mrb[0].mxu1 }
 0x1ff   : > { %v10318_v51 = vpop.f32.mrb[1].mxu1 }
 0x200   : > { %v10320_v52 = vpop.f32.mrb[2].mxu1 }
 0x201   : > { %v10322_v53 = vpop.f32.mrb[3].mxu1  ;;  %v10414_v6 = vpop.f32.mrb[4].mxu0 }
 0x202   : > { %v10417_v7 = vpop.f32.mrb[5].mxu0 }
 0x203   : > { %v10420_v8 = vpop.f32.mrb[6].mxu0 }
 0x204   : > { %v10422_v9 = vpop.f32.mrb[7].mxu0 }
 0x206   : > { %v10324_v54 = vpop.f32.mrb[4].mxu1 }
 0x207   : > { %v10326_v55 = vpop.f32.mrb[5].mxu1 }
 0x208   : > { %v10328_v56 = vpop.f32.mrb[6].mxu1 }
 0x209   : > { %v10330_v57 = vpop.f32.mrb[7].mxu1 }
 0x20e   : > { %v10332_v58 = vpop.f32.mrb[8].mxu1 }
 0x20f   : > { %v10334_v59 = vpop.f32.mrb[9].mxu1 }
 0x210   : > { %v10336_v60 = vpop.f32.mrb[10].mxu1  ;;  %9249 = vmatpush3.xpose.msk.msra.mxu1 %vm1335_vm4, %v10334_v59 }
 0x211   : > { %v10340_v61 = vpop.f32.mrb[11].mxu1  ;;  %9253 = vmatprep.subr.mxu1 %v10017_v49 }
 0x213   : > { %9251 = vmatmul.mubr.msk.f32.vlgmr.msra.gmra.mrb[16].mxu1 %vm1335_vm4, %v10318_v51 }
 0x214   : > { %9254 = vmatpush3.xpose.msk.msra.mxu1 %vm1335_vm4, %v10340_v61  ;;  %9255 = vmatprep.mubr.msk.f32.mxu1 %vm10018_vm3, %v10017_v49 }
 0x215   : > { %9258 = vmatprep.subr.mxu1 %v10017_v49 }
 0x216   : > { %v10350_v62 = vpop.f32.mrb[12].mxu1 }
 0x217   : > { %v10352_v63 = vpop.f32.mrb[13].mxu1  ;;  %9256 = vmatmul.mubr.msk.f32.vlgmr.msra.gmra.mrb[18].mxu1 %vm1335_vm4, %v10322_v53 }
 0x218   : > { %9259 = vmatpush3.xpose.msk.msra.mxu1 %vm1335_vm4, %v10332_v58  ;;  %9269 = vmatpush3.xpose.msk.msra.mxu0 %vm1335_vm4, %v10352_v63  ;;  %v10360_v0 = vpop.f32.mrb[14].mxu1 }
 0x219   : > { %9260 = vmatprep.mubr.msk.f32.mxu1 %vm10018_vm3, %v10017_v49  ;;  %9263 = vmatprep.subr.mxu1 %v10017_v49  ;;  %v10365_v1 = vpop.f32.mrb[15].mxu1 }
 0x21a   : > { %9278 = vmatprep.subr.mxu0 %v10017_v49 }
 0x21b   : > { %9261 = vmatmul.mubr.msk.f32.vlgmr.msra.gmra.mrb[20].mxu1 %vm1335_vm4, %v10316_v50  ;;  %9271 = vmatmul.mubr.msk.f32.vlgmr.msra.gmra.mrb[8].mxu0 %vm1335_vm4, %v10326_v55 }
 0x21c   : > { %9264 = vmatpush3.xpose.msk.msra.mxu1 %vm1335_vm4, %v10336_v60  ;;  %9279 = vmatpush3.xpose.msk.msra.mxu0 %vm1335_vm4, %v10350_v62 }
 0x21d   : > { %9265 = vmatprep.mubr.msk.f32.mxu1 %vm10018_vm3, %v10017_v49  ;;  %9280 = vmatprep.mubr.msk.f32.mxu0 %vm10018_vm3, %v10017_v49 }
 0x21e   : > { %9273 = vmatprep.subr.mxu1 %v10017_v49  ;;  %9288 = vmatprep.subr.mxu0 %v10017_v49 }
 0x21f   : > { %9266 = vmatmul.mubr.msk.f32.vlgmr.msra.gmra.mrb[22].mxu1 %vm1335_vm4, %v10320_v52  ;;  %9281 = vmatmul.mubr.msk.f32.vlgmr.msra.gmra.mrb[10].mxu0 %vm1335_vm4, %v10324_v54 }
 0x220   : > { %9274 = vmatpush3.xpose.msk.msra.mxu1 %vm1335_vm4, %v10365_v1  ;;  %9275 = vmatprep.mubr.msk.f32.mxu1 %vm10018_vm3, %v10017_v49 }
 0x221   : > { %9283 = vmatprep.subr.mxu1 %v10017_v49  ;;  %9290 = vmatprep.mubr.msk.f32.mxu0 %vm10018_vm3, %v10017_v49 }
 0x222   : > { %9289 = vmatpush3.msra.mxu0 %v10406_v3 }
 0x223   : > { %9276 = vmatmul.mubr.msk.f32.vlgmr.msra.gmra.mrb[24].mxu1 %vm1335_vm4, %v10330_v57  ;;  %9298 = vmatprep.subr.mxu0 %v10017_v49 }
 0x224   : > { %9284 = vmatpush3.xpose.msk.msra.mxu1 %vm1335_vm4, %v10360_v0  ;;  %9285 = vmatprep.mubr.msk.f32.mxu1 %vm10018_vm3, %v10017_v49 }
 0x225   : > { %9293 = vmatprep.subr.mxu1 %v10017_v49 }
 0x227   : > { %9286 = vmatmul.mubr.msk.f32.vlgmr.msra.gmra.mrb[26].mxu1 %vm1335_vm4, %v10328_v56 }
 0x228   : > { %9295 = vmatprep.mubr.msk.f32.mxu1 %vm10018_vm3, %v10017_v49  ;;  %9294 = vmatpush3.msra.mxu1 %v10411_v5 }
 0x229   : > { %9303 = vmatprep.subr.mxu1 %v10017_v49 }
 0x2e6   : > { %v1408_v10 = vpop.f32.mrb[16].mxu1 }
 0x2e7   : > { %v9252_v11 = vpop.f32.mrb[17].mxu1 }
 0x2ea   : > { %v1484_v12 = vpop.f32.mrb[18].mxu1 }
 0x2eb   : > { %v1945_v13 = vmul.f32 0.17677669, %v1484_v12  ;;  %v9257_v14 = vpop.f32.mrb[19].mxu1 }
 0x2ed   : > { %v1955_v15 = vsel %vm1335_vm4, %v1945_v13, -inf }
 0x2ee   : > { %v1712_v16 = vpop.f32.mrb[8].mxu0  ;;  %1956 = vmax.xlane.f32.xlu0 %v1955_v15  ;;  %v10425_v17 = vpop.f32.mrb[20].mxu1 }
 0x2ef   : > { %v9262_v18 = vpop.f32.mrb[21].mxu1  ;;  %v9272_v19 = vpop.f32.mrb[9].mxu0 }
 0x2f0   : > { %v1944_v18 = vmul.f32 0.17677669, %v1408_v10  ;;  %v1948_v19 = vmul.f32 0.17677669, %v1712_v16  ;;  %v10457_v10 = vmul.f32 0.17677669, %v10425_v17 }
 0x2f2   : > { %v1636_v20 = vpop.f32.mrb[22].mxu1  ;;  %v1864_v21 = vpop.f32.mrb[10].mxu0  ;;  %v1958_v16 = vsel %vm1335_vm4, %v10457_v10, -inf }
 0x2f3   : > { %v1947_v22 = vmul.f32 0.17677669, %v1636_v20  ;;  %v9267_v23 = vpop.f32.mrb[23].mxu1  ;;  %v9282_v24 = vpop.f32.mrb[11].mxu0  ;;  %v1952_v20 = vsel %vm1335_vm4, %v1944_v18, -inf }
 0x2f4   : > { %v1964_v23 = vsel %vm1335_vm4, %v1948_v19, -inf }
 0x2f5   : > { %v1961_v25 = vsel %vm1335_vm4, %v1947_v22, -inf }
 0x2f6   : > { %1962 = vmax.xlane.f32.xlu0 %v1961_v25  ;;  %v1788_v26 = vpop.f32.mrb[24].mxu1 }
 0x2f7   : > { %v1949_v27 = vmul.f32 0.17677669, %v1788_v26  ;;  %v9277_v28 = vpop.f32.mrb[25].mxu1 }
 0x2f9   : > { %v1967_v29 = vsel %vm1335_vm4, %v1949_v27, -inf }
 0x2fa   : > { %1968 = vmax.xlane.f32.xlu1 %v1967_v29  ;;  %v1940_v30 = vpop.f32.mrb[26].mxu1 }
 0x2fb   : > { %v1951_v31 = vmul.f32 0.17677669, %v1940_v30  ;;  %v9287_v32 = vpop.f32.mrb[27].mxu1 }
 0x2fd   : > { %v1973_v33 = vsel %vm1335_vm4, %v1951_v31, -inf }
 0x2fe   : > { %1974 = vmax.xlane.f32.xlu1 %v1973_v33 }
 0x37b   : > { %v1957_v34 = vpop.xlane.xlu0 %1956 }
 0x37c   : > { %v1977_v35 = vsub.f32 %v1945_v13, %v1957_v34 }
 0x37e   : > { %v1986_v36 = vmul.f32 1.442695, %v1977_v35 }
 0x380   : > { %9791 = vpow2.f32 %v1986_v36 }
 0x383   : > { %v1963_v37 = vpop.xlane.xlu0 %1962 }
 0x384   : > { %v1979_v38 = vsub.f32 %v1947_v22, %v1963_v37  ;;  %v10445_v22 = vmul.f32 0.17677669, %v1864_v21 }
 0x386   : > { %v1990_v39 = vmul.f32 1.442695, %v1979_v38  ;;  %v1970_v24 = vsel %vm1335_vm4, %v10445_v22, -inf }
 0x387   : > { %v1969_v40 = vpop.xlane.xlu1 %1968 }
 0x388   : > { %9793 = vpow2.f32 %v1990_v39  ;;  %v1981_v41 = vsub.f32 %v1949_v27, %v1969_v40 }
 0x38a   : > { %v9792_v42 = vpop.eup %9791  ;;  %v1994_v43 = vmul.f32 1.442695, %v1981_v41 }
 0x38b   : > { %v2003_v44 = vsel %vm1335_vm4, %v9792_v42, 0.0  ;;  %v1975_v11 = vpop.xlane.xlu1 %1974 }
 0x38c   : > { %9795 = vpow2.f32 %v1994_v43  ;;  %2004 = vadd.xlane.f32.xlu0 %v2003_v44  ;;  %v1983_v12 = vsub.f32 %v1951_v31, %v1975_v11 }
 0x38e   : > { %v1998_v13 = vmul.f32 1.442695, %v1983_v12 }
 0x390   : > { %9797 = vpow2.f32 %v1998_v13 }
 0x392   : > { %v9794_v45 = vpop.eup %9793 }
 0x393   : > { %v2009_v46 = vsel %vm1335_vm4, %v9794_v45, 0.0 }
 0x394   : > { %2010 = vadd.xlane.f32.xlu1 %v2009_v46 }
 0x396   : > { %v9796_v47 = vpop.eup %9795 }
 0x397   : > { %v2015_v48 = vsel %vm1335_vm4, %v9796_v47, 0.0 }
 0x398   : > { %2016 = vadd.xlane.f32.xlu0 %v2015_v48 }
 0x39a   : > { %v9798_v14 = vpop.eup %9797 }
 0x39b   : > { %v2021_v15 = vsel %vm1335_vm4, %v9798_v14, 0.0 }
 0x3a5   : > { %2702 = vrot.lane.b32.xlu1 %v10322_v53, %s10019_s2 }
 0x3a9   : > { %2860 = vrot.lane.b32.xlu1 %v10336_v60, %s10019_s2 }
 0x3ae   : > { %2704 = vrot.lane.b32.xlu0 %v10340_v61, %s10019_s2 }
 0x3b2   : > { %3016 = vrot.lane.b32.xlu0 %v10365_v1, %s10019_s2 }
 0x3b6   : > { %3172 = vrot.lane.b32.xlu0 %v10360_v0, %s10019_s2 }
 0x3cd   : > { %2022 = vadd.xlane.f32.xlu1 %v2021_v15 }
 0x3d5   : > { %1953 = vmax.xlane.f32.xlu0 %v1952_v20 }
 0x3d9   : > { %1965 = vmax.xlane.f32.xlu0 %v1964_v23 }
 0x3dd   : > { %1971 = vmax.xlane.f32.xlu0 %v1970_v24 }
 0x3de   : > { %2858 = vrot.lane.b32.xlu1 %v10320_v52, %s10019_s2 }
 0x3e2   : > { %3014 = vrot.lane.b32.xlu1 %v10330_v57, %s10019_s2 }
 0x3e6   : > { %3170 = vrot.lane.b32.xlu1 %v10328_v56, %s10019_s2 }
 0x40a   : > { %1959 = vmax.xlane.f32.xlu1 %v1958_v16 }
 0x419   : > { %v2005_v21 = vpop.xlane.xlu0 %2004 }
 0x41a   : > { %9799 = vrcp.f32 %v2005_v21 }
 0x421   : > { %v2011_v25 = vpop.xlane.xlu1 %2010 }
 0x422   : > { %9801 = vrcp.f32 %v2011_v25 }
 0x424   : > { %v9800_v26 = vpop.eup %9799 }
 0x425   : > { %v2017_v27 = vpop.xlane.xlu0 %2016  ;;  %v2033_v28 = vmul.f32 %v9800_v26, %v9792_v42  ;;  %v2703_v32 = vpop.permute.xlu1 %2702 }
 0x426   : > { %9803 = vrcp.f32 %v2017_v27 }
 0x427   : > { %9296 = vmatmul.mubr.msk.f32.vlgmr.msra.gmra.mrb[28].mxu1 %vm1335_vm4, %v2033_v28 }
 0x428   : > { %9304 = vmatpush3.msra.mxu1 %v10408_v4  ;;  %9305 = vmatprep.mubr.msk.f32.mxu1 %vm10018_vm3, %v10017_v49 }
 0x429   : > { %9313 = vmatprep.subr.mxu1 %v10017_v49  ;;  %v2705_v33 = vpop.permute.xlu0 %2704  ;;  %v2861_v34 = vpop.permute.xlu1 %2860 }
 0x42c   : > { %v9802_v17 = vpop.eup %9801 }
 0x42d   : > { %v2035_v29 = vmul.f32 %v9802_v17, %v9794_v45  ;;  %v3017_v35 = vpop.permute.xlu0 %3016 }
 0x42f   : > { %9306 = vmatmul.mubr.msk.f32.vlgmr.msra.gmra.mrb[30].mxu1 %vm1335_vm4, %v2035_v29 }
 0x430   : > { %v9804_v30 = vpop.eup %9803  ;;  %9314 = vmatpush3.msra.mxu1 %v10422_v9  ;;  %9315 = vmatprep.mubr.msk.f32.mxu1 %vm10018_vm3, %v10017_v49 }
 0x431   : > { %v2037_v31 = vmul.f32 %v9804_v30, %v9796_v47  ;;  %9323 = vmatprep.subr.mxu1 %v10017_v49  ;;  %v3173_v37 = vpop.permute.xlu0 %3172 }
 0x433   : > { %9316 = vmatmul.mubr.msk.f32.vlgmr.msra.gmra.mrb[32].mxu1 %vm1335_vm4, %v2037_v31 }
 0x434   : > { %9324 = vmatpush3.msra.mxu1 %v10420_v8  ;;  %9325 = vmatprep.mubr.msk.f32.mxu1 %vm10018_vm3, %v10017_v49 }
 0x435   : > { %9333 = vmatprep.subr.mxu1 %v10017_v49 }
 0x45a   : > { %v2023_v36 = vpop.xlane.xlu1 %2022 }
 0x45b   : > { %9805 = vrcp.f32 %v2023_v36 }
 0x45e   : > { %v2859_v46 = vpop.permute.xlu1 %2858 }
 0x462   : > { %v1954_v38 = vpop.xlane.xlu0 %1953  ;;  %v3015_v48 = vpop.permute.xlu1 %3014 }
 0x463   : > { %v1976_v39 = vsub.f32 %v1944_v18, %v1954_v38 }
 0x465   : > { %v9806_v40 = vpop.eup %9805  ;;  %v1984_v41 = vmul.f32 1.442695, %v1976_v39 }
 0x466   : > { %v1966_v42 = vpop.xlane.xlu0 %1965  ;;  %v2039_v43 = vmul.f32 %v9806_v40, %v9798_v14  ;;  %v3171_v14 = vpop.permute.xlu1 %3170 }
 0x467   : > { %9807 = vpow2.f32 %v1984_v41  ;;  %v1980_v44 = vsub.f32 %v1948_v19, %v1966_v42 }
 0x468   : > { %9326 = vmatmul.mubr.msk.f32.vlgmr.msra.gmra.mrb[34].mxu1 %vm1335_vm4, %v2039_v43 }
 0x469   : > { %v1992_v45 = vmul.f32 1.442695, %v1980_v44  ;;  %9334 = vmatpush3.xpose.msk.msra.mxu1 %vm1335_vm4, %v2705_v33  ;;  %9335 = vmatprep.mubr.msk.f32.mxu1 %vm10018_vm3, %v10017_v49 }
 0x46a   : > { %9343 = vmatprep.subr.mxu1 %v10017_v49  ;;  %v1972_v15 = vpop.xlane.xlu0 %1971 }
 0x46b   : > { %9809 = vpow2.f32 %v1992_v45  ;;  %v1982_v18 = vsub.f32 %v10445_v22, %v1972_v15 }
 0x46c   : > { %9336 = vmatmul.mubr.msk.f32.vlgmr.msra.gmra.mrb[36].mxu1 %vm1335_vm4, %v2703_v32 }
 0x46d   : > { %9344 = vmatpush3.xpose.msk.msra.mxu1 %vm1335_vm4, %v2861_v34  ;;  %9345 = vmatprep.mubr.msk.f32.mxu1 %vm10018_vm3, %v10017_v49  ;;  %v1996_v23 = vmul.f32 1.442695, %v1982_v18 }
 0x46e   : > { %9353 = vmatprep.subr.mxu1 %v10017_v49 }
 0x470   : > { %9346 = vmatmul.mubr.msk.f32.vlgmr.msra.gmra.mrb[38].mxu1 %vm1335_vm4, %v2859_v46 }
 0x471   : > { %v9808_v47 = vpop.eup %9807  ;;  %9354 = vmatpush3.xpose.msk.msra.mxu1 %vm1335_vm4, %v3017_v35  ;;  %9355 = vmatprep.mubr.msk.f32.mxu1 %vm10018_vm3, %v10017_v49 }
 0x472   : > { %v2000_v11 = vsel %vm1335_vm4, %v9808_v47, 0.0  ;;  %9363 = vmatprep.subr.mxu1 %v10017_v49 }
 0x473   : > { %2001 = vadd.xlane.f32.xlu0 %v2000_v11 }
 0x474   : > { %9356 = vmatmul.mubr.msk.f32.vlgmr.msra.gmra.mrb[40].mxu1 %vm1335_vm4, %v3015_v48 }
 0x475   : > { %v10493_v12 = vpop.eup %9809  ;;  %9364 = vmatpush3.xpose.msk.msra.mxu1 %vm1335_vm4, %v3173_v37  ;;  %9365 = vmatprep.mubr.msk.f32.mxu1 %vm10018_vm3, %v10017_v49 }
 0x476   : > { %v2012_v13 = vsel %vm1335_vm4, %v10493_v12, 0.0  ;;  %9373 = vmatprep.subr.mxu1 %v10017_v49 }
 0x477   : > { %2013 = vadd.xlane.f32.xlu0 %v2012_v13 }
 0x478   : > { %9366 = vmatmul.mubr.msk.f32.vlgmr.msra.gmra.mrb[42].mxu1 %vm1335_vm4, %v3171_v14 }
 0x479   : > { %9375 = vmatprep.mubr.msk.f32.mxu1 %vm10018_vm3, %v10017_v49 }
 0x48d   : > { %2626 = vrot.lane.b32.xlu0 %v10334_v59, %s10019_s2 }
 0x491   : > { %2938 = vrot.lane.b32.xlu0 %v10352_v63, %s10019_s2 }
 0x495   : > { %3094 = vrot.lane.b32.xlu0 %v10350_v62, %s10019_s2 }
 0x497   : > { %v1960_v19 = vpop.xlane.xlu1 %1959 }
 0x498   : > { %v1978_v20 = vsub.f32 %v10457_v10, %v1960_v19 }
 0x49a   : > { %v1988_v24 = vmul.f32 1.442695, %v1978_v20 }
 0x49c   : > { %9811 = vpow2.f32 %v1988_v24 }
 0x49d   : > { %9813 = vpow2.f32 %v1996_v23 }
 0x4a6   : > { %v9812_v16 = vpop.eup %9811 }
 0x4a7   : > { %v2006_v21 = vsel %vm1335_vm4, %v9812_v16, 0.0  ;;  %v9814_v25 = vpop.eup %9813 }
 0x4a8   : > { %2007 = vadd.xlane.f32.xlu1 %v2006_v21  ;;  %v2018_v26 = vsel %vm1335_vm4, %v9814_v25, 0.0 }
 0x4ac   : > { %2019 = vadd.xlane.f32.xlu1 %v2018_v26 }
 0x4bd   : > { %2624 = vrot.lane.b32.xlu1 %v10318_v51, %s10019_s2 }
 0x4c1   : > { %2782 = vrot.lane.b32.xlu1 %v10332_v58, %s10019_s2 }
 0x4c5   : > { %2780 = vrot.lane.b32.xlu1 %v10316_v50, %s10019_s2 }
 0x4c9   : > { %2936 = vrot.lane.b32.xlu1 %v10326_v55, %s10019_s2 }
 0x4cd   : > { %3092 = vrot.lane.b32.xlu1 %v10324_v54, %s10019_s2 }
 0x4fa   : > { %v10524_v22 = vpop.f32.mrb[28].mxu1 }
 0x4fb   : > { %v9297_v10 = vpop.f32.mrb[29].mxu1 }
 0x500   : > { %v2002_v27 = vpop.xlane.xlu0 %2001 }
 0x501   : > { %9815 = vrcp.f32 %v2002_v27 }
 0x502   : > { %v10526_v28 = vpop.f32.mrb[30].mxu1 }
 0x503   : > { %v9307_v17 = vpop.f32.mrb[31].mxu1 }
 0x504   : > { %v2014_v33 = vpop.xlane.xlu0 %2013 }
 0x506   : > { %v10528_v29 = vpop.f32.mrb[32].mxu1 }
 0x507   : > { %v9317_v30 = vpop.f32.mrb[33].mxu1 }
 0x508   : > { %v2627_v26 = vpop.permute.xlu0 %2626 }
 0x50b   : > { %v9816_v31 = vpop.eup %9815 }
 0x50c   : > { %v2032_v32 = vmul.f32 %v9816_v31, %v9808_v47  ;;  %v2939_v27 = vpop.permute.xlu0 %2938 }
 0x50e   : > { %9291 = vmatmul.mubr.msk.f32.vlgmr.msra.gmra.mrb[12].mxu0 %vm1335_vm4, %v2032_v32 }
 0x50f   : > { %9299 = vmatpush3.msra.mxu0 %v10404_v2  ;;  %9300 = vmatprep.mubr.msk.f32.mxu0 %vm10018_vm3, %v10017_v49 }
 0x510   : > { %9308 = vmatprep.subr.mxu0 %v10017_v49  ;;  %v3095_v30 = vpop.permute.xlu0 %3094 }
 0x535   : > { %v2008_v34 = vpop.xlane.xlu1 %2007 }
 0x536   : > { %9817 = vrcp.f32 %v2008_v34 }
 0x537   : > { %9819 = vrcp.f32 %v2014_v33 }
 0x539   : > { %v2020_v35 = vpop.xlane.xlu1 %2019 }
 0x53a   : > { %9821 = vrcp.f32 %v2020_v35 }
 0x53b   : > { %v10535_v36 = vpop.f32.mrb[34].mxu1 }
 0x53c   : > { %v9327_v37 = vpop.f32.mrb[35].mxu1 }
 0x53d   : > { %v2625_v48 = vpop.permute.xlu1 %2624 }
 0x53f   : > { %v2776_v38 = vpop.f32.mrb[36].mxu1 }
 0x540   : > { %v9818_v39 = vpop.eup %9817  ;;  %v10537_v40 = vmul.f32 0.17677669, %v2776_v38  ;;  %v9337_v41 = vpop.f32.mrb[37].mxu1 }
 0x541   : > { %v2034_v42 = vmul.f32 %v9818_v39, %v9812_v16  ;;  %v9820_v43 = vpop.eup %9819 }
 0x542   : > { %v3259_v44 = vsel %vm1335_vm4, %v10537_v40, -inf  ;;  %v2036_v11 = vmul.f32 %v9820_v43, %v10493_v12  ;;  %v2783_v12 = vpop.permute.xlu1 %2782 }
 0x543   : > { %9301 = vmatmul.mubr.msk.f32.vlgmr.msra.gmra.mrb[14].mxu0 %vm1335_vm4, %v2034_v42  ;;  %3260 = vmax.xlane.f32.xlu0 %v3259_v44  ;;  %v2932_v45 = vpop.f32.mrb[38].mxu1 }
 0x544   : > { %9309 = vmatpush3.msra.mxu0 %v10417_v7  ;;  %v3251_v46 = vmul.f32 0.17677669, %v2932_v45  ;;  %v9347_v47 = vpop.f32.mrb[39].mxu1  ;;  %9310 = vmatprep.mubr.msk.f32.mxu0 %vm10018_vm3, %v10017_v49  ;;  %v9822_v13 = vpop.eup %9821 }
 0x545   : > { %9318 = vmatprep.subr.mxu0 %v10017_v49  ;;  %v2038_v20 = vmul.f32 %v9822_v13, %v9814_v25 }
 0x546   : > { %v3265_v14 = vsel %vm1335_vm4, %v3251_v46, -inf  ;;  %v2781_v25 = vpop.permute.xlu1 %2780 }
 0x547   : > { %9311 = vmatmul.mubr.msk.f32.vlgmr.msra.gmra.mrb[16].mxu0 %vm1335_vm4, %v2036_v11  ;;  %3266 = vmax.xlane.f32.xlu1 %v3265_v14  ;;  %v3088_v15 = vpop.f32.mrb[40].mxu1 }
 0x548   : > { %9319 = vmatpush3.msra.mxu0 %v10414_v6  ;;  %v3253_v18 = vmul.f32 0.17677669, %v3088_v15  ;;  %v9357_v19 = vpop.f32.mrb[41].mxu1  ;;  %9320 = vmatprep.mubr.msk.f32.mxu0 %vm10018_vm3, %v10017_v49 }
 0x549   : > { %9328 = vmatprep.subr.mxu0 %v10017_v49 }
 0x54a   : > { %v3271_v23 = vsel %vm1335_vm4, %v3253_v18, -inf  ;;  %v2937_v17 = vpop.permute.xlu1 %2936 }
 0x54b   : > { %9321 = vmatmul.mubr.msk.f32.vlgmr.msra.gmra.mrb[18].mxu0 %vm1335_vm4, %v2038_v20  ;;  %3272 = vmax.xlane.f32.xlu0 %v3271_v23  ;;  %v3244_v24 = vpop.f32.mrb[42].mxu1 }
 0x54c   : > { %v3255_v16 = vmul.f32 0.17677669, %v3244_v24  ;;  %v9367_v21 = vpop.f32.mrb[43].mxu1  ;;  %9330 = vmatprep.mubr.msk.f32.mxu0 %vm10018_vm3, %v10017_v49 }
 0x54e   : > { %v3277_v10 = vsel %vm1335_vm4, %v3255_v16, -inf  ;;  %v3093_v31 = vpop.permute.xlu1 %3092 }
 0x54f   : > { %9329 = vmatpush3.xpose.msk.msra.mxu0 %vm1335_vm4, %v2627_v26  ;;  %3278 = vmax.xlane.f32.xlu0 %v3277_v10 }
 0x550   : > { %9338 = vmatprep.subr.mxu0 %v10017_v49 }
 0x552   : > { %9331 = vmatmul.mubr.msk.f32.vlgmr.msra.gmra.mrb[20].mxu0 %vm1335_vm4, %v2625_v48 }
 0x553   : > { %9339 = vmatpush3.xpose.msk.msra.mxu0 %vm1335_vm4, %v2783_v12  ;;  %9340 = vmatprep.mubr.msk.f32.mxu0 %vm10018_vm3, %v10017_v49 }
 0x554   : > { %9348 = vmatprep.subr.mxu0 %v10017_v49 }
 0x556   : > { %9341 = vmatmul.mubr.msk.f32.vlgmr.msra.gmra.mrb[22].mxu0 %vm1335_vm4, %v2781_v25 }
 0x557   : > { %9349 = vmatpush3.xpose.msk.msra.mxu0 %vm1335_vm4, %v2939_v27  ;;  %9350 = vmatprep.mubr.msk.f32.mxu0 %vm10018_vm3, %v10017_v49 }
 0x558   : > { %3576 = vrot.lane.b32.xlu1 %v10408_v4, %s10019_s2  ;;  %9358 = vmatprep.subr.mxu0 %v10017_v49 }
 0x55a   : > { %9351 = vmatmul.mubr.msk.f32.vlgmr.msra.gmra.mrb[24].mxu0 %vm1335_vm4, %v2937_v17 }
 0x55b   : > { %9359 = vmatpush3.xpose.msk.msra.mxu0 %vm1335_vm4, %v3095_v30  ;;  %9360 = vmatprep.mubr.msk.f32.mxu0 %vm10018_vm3, %v10017_v49 }
 0x55c   : > { %3730 = vrot.lane.b32.xlu1 %v10422_v9, %s10019_s2  ;;  %9368 = vmatprep.subr.mxu0 %v10017_v49 }
 0x55e   : > { %9361 = vmatmul.mubr.msk.f32.vlgmr.msra.gmra.mrb[26].mxu0 %vm1335_vm4, %v3093_v31 }
 0x55f   : > { %9370 = vmatprep.mubr.msk.f32.mxu0 %vm10018_vm3, %v10017_v49 }
 0x560   : > { %3884 = vrot.lane.b32.xlu1 %v10420_v8, %s10019_s2 }
 0x5d0   : > { %v3261_v32 = vpop.xlane.xlu0 %3260 }
 0x5d1   : > { %v3281_v33 = vsub.f32 %v10537_v40, %v3261_v32 }
 0x5d3   : > { %v3290_v34 = vmul.f32 1.442695, %v3281_v33 }
 0x5d4   : > { %v3267_v35 = vpop.xlane.xlu1 %3266 }
 0x5d5   : > { %9823 = vpow2.f32 %v3290_v34  ;;  %v3283_v37 = vsub.f32 %v3251_v46, %v3267_v35 }
 0x5d7   : > { %v3294_v38 = vmul.f32 1.442695, %v3283_v37 }
 0x5d8   : > { %v3273_v45 = vpop.xlane.xlu0 %3272  ;;  %v3577_v33 = vpop.permute.xlu1 %3576 }
 0x5d9   : > { %9825 = vpow2.f32 %v3294_v38  ;;  %v3285_v46 = vsub.f32 %v3253_v18, %v3273_v45 }
 0x5db   : > { %v3298_v48 = vmul.f32 1.442695, %v3285_v46 }
 0x5dc   : > { %v3279_v47 = vpop.xlane.xlu0 %3278 }
 0x5dd   : > { %v3287_v11 = vsub.f32 %v3255_v16, %v3279_v47  ;;  %9827 = vpow2.f32 %v3298_v48 }
 0x5df   : > { %v10585_v39 = vpop.eup %9823  ;;  %v3302_v13 = vmul.f32 1.442695, %v3287_v11 }
 0x5e0   : > { %v3307_v41 = vsel %vm1335_vm4, %v10585_v39, 0.0 }
 0x5e1   : > { %v10589_v42 = vpop.f32.mrb[12].mxu0  ;;  %3308 = vadd.xlane.f32.xlu0 %v3307_v41  ;;  %9829 = vpow2.f32 %v3302_v13 }
 0x5e2   : > { %v9292_v43 = vpop.f32.mrb[13].mxu0 }
 0x5e3   : > { %v10591_v44 = vpop.eup %9825  ;;  %v3731_v43 = vpop.permute.xlu1 %3730 }
 0x5e4   : > { %v3313_v40 = vsel %vm1335_vm4, %v10591_v44, 0.0 }
 0x5e5   : > { %3314 = vadd.xlane.f32.xlu1 %v3313_v40 }
 0x5e7   : > { %v10599_v14 = vpop.eup %9827  ;;  %v3885_v46 = vpop.permute.xlu1 %3884 }
 0x5e8   : > { %v3319_v15 = vsel %vm1335_vm4, %v10599_v14, 0.0 }
 0x5eb   : > { %v10603_v19 = vpop.eup %9829 }
 0x5ec   : > { %v3325_v18 = vsel %vm1335_vm4, %v10603_v19, 0.0 }
 0x5f6   : > { %4218 = vrot.lane.b32.xlu1 %v10318_v51, %s10020_s25 }
 0x5f7   : > { %3422 = vrot.lane.b32.xlu0 %v10411_v5, %s10019_s2 }
 0x616   : > { %v10605_v20 = vpop.f32.mrb[14].mxu0  ;;  %3320 = vadd.xlane.f32.xlu0 %v3319_v15 }
 0x617   : > { %v9302_v23 = vpop.f32.mrb[15].mxu0 }
 0x61a   : > { %v10609_v12 = vpop.f32.mrb[16].mxu0  ;;  %3326 = vadd.xlane.f32.xlu1 %v3325_v18 }
 0x61b   : > { %v9312_v24 = vpop.f32.mrb[17].mxu0 }
 0x61e   : > { %v10611_v16 = vpop.f32.mrb[18].mxu0 }
 0x61f   : > { %v9322_v21 = vpop.f32.mrb[19].mxu0 }
 0x625   : > { %v2698_v26 = vpop.f32.mrb[20].mxu0 }
 0x626   : > { %v9332_v10 = vpop.f32.mrb[21].mxu0  ;;  %v10643_v34 = vmul.f32 0.17677669, %v2698_v26 }
 0x628   : > { %v3256_v38 = vsel %vm1335_vm4, %v10643_v34, -inf }
 0x629   : > { %v2854_v25 = vpop.f32.mrb[22].mxu0 }
 0x62a   : > { %v9342_v27 = vpop.f32.mrb[23].mxu0  ;;  %v10645_v35 = vmul.f32 0.17677669, %v2854_v25 }
 0x62b   : > { %4296 = vrot.lane.b32.xlu1 %v10322_v53, %s10020_s25 }
 0x62c   : > { %4220 = vrot.lane.b32.xlu0 %v10334_v59, %s10020_s25  ;;  %v3262_v41 = vsel %vm1335_vm4, %v10645_v35, -inf }
 0x62d   : > { %v3010_v17 = vpop.f32.mrb[24].mxu0 }
 0x62e   : > { %v9352_v30 = vpop.f32.mrb[25].mxu0  ;;  %v10647_v37 = vmul.f32 0.17677669, %v3010_v17 }
 0x62f   : > { %4374 = vrot.lane.b32.xlu1 %v10316_v50, %s10020_s25 }
 0x630   : > { %4298 = vrot.lane.b32.xlu0 %v10340_v61, %s10020_s25  ;;  %v3268_v45 = vsel %vm1335_vm4, %v10647_v37, -inf }
 0x631   : > { %v3166_v31 = vpop.f32.mrb[26].mxu0 }
 0x632   : > { %v9362_v32 = vpop.f32.mrb[27].mxu0  ;;  %v10653_v40 = vmul.f32 0.17677669, %v3166_v31 }
 0x633   : > { %4452 = vrot.lane.b32.xlu1 %v10320_v52, %s10020_s25 }
 0x634   : > { %4376 = vrot.lane.b32.xlu0 %v10332_v58, %s10020_s25  ;;  %v3274_v48 = vsel %vm1335_vm4, %v10653_v40, -inf }
 0x637   : > { %4530 = vrot.lane.b32.xlu1 %v10326_v55, %s10020_s25 }
 0x638   : > { %4454 = vrot.lane.b32.xlu0 %v10336_v60, %s10020_s25 }
 0x63b   : > { %4608 = vrot.lane.b32.xlu1 %v10330_v57, %s10020_s25 }
 0x63c   : > { %4532 = vrot.lane.b32.xlu0 %v10352_v63, %s10020_s25 }
 0x63f   : > { %4686 = vrot.lane.b32.xlu1 %v10324_v54, %s10020_s25 }
 0x640   : > { %4610 = vrot.lane.b32.xlu0 %v10365_v1, %s10020_s25 }
 0x643   : > { %4764 = vrot.lane.b32.xlu1 %v10328_v56, %s10020_s25 }
 0x644   : > { %4688 = vrot.lane.b32.xlu0 %v10350_v62, %s10020_s25 }
 0x648   : > { %4766 = vrot.lane.b32.xlu0 %v10360_v0, %s10020_s25 }
 0x667   : > { %3257 = vmax.xlane.f32.xlu0 %v3256_v38  ;;  %3263 = vmax.xlane.f32.xlu1 %v3262_v41 }
 0x66b   : > { %3269 = vmax.xlane.f32.xlu0 %v3268_v45 }
 0x66e   : > { %v3309_v47 = vpop.xlane.xlu0 %3308 }
 0x66f   : > { %9831 = vrcp.f32 %v3309_v47  ;;  %3275 = vmax.xlane.f32.xlu0 %v3274_v48 }
 0x672   : > { %v3315_v11 = vpop.xlane.xlu1 %3314  ;;  %v3423_v13 = vpop.permute.xlu0 %3422 }
 0x673   : > { %9833 = vrcp.f32 %v3315_v11  ;;  %9374 = vmatpush3.msra.mxu1 %v3423_v13 }
 0x674   : > { %9383 = vmatprep.subr.mxu1 %v10017_v49 }
 0x679   : > { %v9832_v15 = vpop.eup %9831 }
 0x67a   : > { %v3337_v23 = vmul.f32 %v9832_v15, %v10585_v39  ;;  %v4219_v39 = vpop.permute.xlu1 %4218 }
 0x67c   : > { %9376 = vmatmul.mubr.msk.f32.vlgmr.msra.gmra.mrb[44].mxu1 %vm1335_vm4, %v3337_v23 }
 0x67d   : > { %v9834_v18 = vpop.eup %9833  ;;  %9384 = vmatpush3.msra.mxu1 %v3577_v33  ;;  %9385 = vmatprep.mubr.msk.f32.mxu1 %vm10018_vm3, %v10017_v49 }
 0x67e   : > { %9393 = vmatprep.subr.mxu1 %v10017_v49  ;;  %v3339_v24 = vmul.f32 %v9834_v18, %v10591_v44 }
 0x680   : > { %9386 = vmatmul.mubr.msk.f32.vlgmr.msra.gmra.mrb[46].mxu1 %vm1335_vm4, %v3339_v24 }
 0x681   : > { %9394 = vmatpush3.msra.mxu1 %v3731_v43  ;;  %9395 = vmatprep.mubr.msk.f32.mxu1 %vm10018_vm3, %v10017_v49 }
 0x682   : > { %9403 = vmatprep.subr.mxu1 %v10017_v49 }
 0x6a3   : > { %v3321_v21 = vpop.xlane.xlu0 %3320 }
 0x6a4   : > { %9835 = vrcp.f32 %v3321_v21 }
 0x6a7   : > { %v3327_v26 = vpop.xlane.xlu1 %3326  ;;  %v4221_v10 = vpop.permute.xlu0 %4220 }
 0x6a8   : > { %9837 = vrcp.f32 %v3327_v26 }
 0x6ab   : > { %v4299_v17 = vpop.permute.xlu0 %4298  ;;  %v4297_v30 = vpop.permute.xlu1 %4296 }
 0x6ae   : > { %v9836_v25 = vpop.eup %9835 }
 0x6af   : > { %v3341_v27 = vmul.f32 %v9836_v25, %v10599_v14  ;;  %v4377_v32 = vpop.permute.xlu0 %4376  ;;  %v4375_v14 = vpop.permute.xlu1 %4374 }
 0x6b1   : > { %9396 = vmatmul.mubr.msk.f32.vlgmr.msra.gmra.mrb[48].mxu1 %vm1335_vm4, %v3341_v27 }
 0x6b2   : > { %v9838_v44 = vpop.eup %9837  ;;  %9404 = vmatpush3.msra.mxu1 %v3885_v46  ;;  %9405 = vmatprep.mubr.msk.f32.mxu1 %vm10018_vm3, %v10017_v49 }
 0x6b3   : > { %v3343_v31 = vmul.f32 %v9838_v44, %v10603_v19  ;;  %9436 = vmatprep.subr.mxu1 %v10017_v49  ;;  %v4455_v33 = vpop.permute.xlu0 %4454  ;;  %v4453_v19 = vpop.permute.xlu1 %4452 }
 0x6b5   : > { %9406 = vmatmul.mubr.msk.f32.vlgmr.msra.gmra.mrb[50].mxu1 %vm1335_vm4, %v3343_v31 }
 0x6b6   : > { %9438 = vmatprep.mubr.msk.f32.mxu1 %vm10018_vm3, %v10017_v49 }
 0x6b7   : > { %v4533_v38 = vpop.permute.xlu0 %4532  ;;  %v4531_v41 = vpop.permute.xlu1 %4530 }
 0x6b9   : > { %9437 = vmatpush3.xpose.msk.msra.mxu1 %vm1335_vm4, %v4221_v10 }
 0x6ba   : > { %9441 = vmatprep.subr.mxu1 %v10017_v49 }
 0x6bb   : > { %v4611_v43 = vpop.permute.xlu0 %4610  ;;  %v4609_v45 = vpop.permute.xlu1 %4608 }
 0x6bc   : > { %9439 = vmatmul.mubr.msk.f32.vlgmr.msra.gmra.mrb[52].mxu1 %vm1335_vm4, %v4219_v39 }
 0x6bd   : > { %9442 = vmatpush3.xpose.msk.msra.mxu1 %vm1335_vm4, %v4299_v17  ;;  %9443 = vmatprep.mubr.msk.f32.mxu1 %vm10018_vm3, %v10017_v49 }
 0x6be   : > { %9446 = vmatprep.subr.mxu1 %v10017_v49 }
 0x6bf   : > { %v4689_v46 = vpop.permute.xlu0 %4688  ;;  %v4687_v47 = vpop.permute.xlu1 %4686 }
 0x6c0   : > { %9444 = vmatmul.mubr.msk.f32.vlgmr.msra.gmra.mrb[54].mxu1 %vm1335_vm4, %v4297_v30 }
 0x6c1   : > { %9447 = vmatpush3.xpose.msk.msra.mxu1 %vm1335_vm4, %v4377_v32  ;;  %9448 = vmatprep.mubr.msk.f32.mxu1 %vm10018_vm3, %v10017_v49 }
 0x6c2   : > { %9451 = vmatprep.subr.mxu1 %v10017_v49 }
 0x6c3   : > { %v4767_v48 = vpop.permute.xlu0 %4766  ;;  %v4765_v11 = vpop.permute.xlu1 %4764 }
 0x6c4   : > { %9449 = vmatmul.mubr.msk.f32.vlgmr.msra.gmra.mrb[56].mxu1 %vm1335_vm4, %v4375_v14 }
 0x6c5   : > { %9452 = vmatpush3.xpose.msk.msra.mxu1 %vm1335_vm4, %v4455_v33  ;;  %9453 = vmatprep.mubr.msk.f32.mxu1 %vm10018_vm3, %v10017_v49 }
 0x6c6   : > { %9456 = vmatprep.subr.mxu1 %v10017_v49 }
 0x6c8   : > { %9454 = vmatmul.mubr.msk.f32.vlgmr.msra.gmra.mrb[58].mxu1 %vm1335_vm4, %v4453_v19 }
 0x6c9   : > { %9457 = vmatpush3.xpose.msk.msra.mxu1 %vm1335_vm4, %v4533_v38  ;;  %9458 = vmatprep.mubr.msk.f32.mxu1 %vm10018_vm3, %v10017_v49 }
 0x6ca   : > { %9461 = vmatprep.subr.mxu1 %v10017_v49 }
 0x6cc   : > { %9459 = vmatmul.mubr.msk.f32.vlgmr.msra.gmra.mrb[60].mxu1 %vm1335_vm4, %v4531_v41 }
 0x6cd   : > { %9462 = vmatpush3.xpose.msk.msra.mxu1 %vm1335_vm4, %v4611_v43  ;;  %9463 = vmatprep.mubr.msk.f32.mxu1 %vm10018_vm3, %v10017_v49 }
 0x6ce   : > { %9466 = vmatprep.subr.mxu1 %v10017_v49 }
 0x6d0   : > { %9464 = vmatmul.mubr.msk.f32.vlgmr.msra.gmra.mrb[62].mxu1 %vm1335_vm4, %v4609_v45 }
 0x6d1   : > { %9467 = vmatpush3.xpose.msk.msra.mxu1 %vm1335_vm4, %v4689_v46  ;;  %9468 = vmatprep.mubr.msk.f32.mxu1 %vm10018_vm3, %v10017_v49 }
 0x6d2   : > { %9471 = vmatprep.subr.mxu1 %v10017_v49 }
 0x6d4   : > { %9469 = vmatmul.mubr.msk.f32.vlgmr.msra.gmra.mrb[64].mxu1 %vm1335_vm4, %v4687_v47 }
 0x6d5   : > { %9472 = vmatpush3.xpose.msk.msra.mxu1 %vm1335_vm4, %v4767_v48  ;;  %9473 = vmatprep.mubr.msk.f32.mxu1 %vm10018_vm3, %v10017_v49 }
 0x6d6   : > { %9481 = vmatprep.subr.mxu1 %v10017_v49 }
 0x6d8   : > { %9474 = vmatmul.mubr.msk.f32.vlgmr.msra.gmra.mrb[66].mxu1 %vm1335_vm4, %v4765_v11 }
 0x6d9   : > { %9483 = vmatprep.mubr.msk.f32.mxu1 %vm10018_vm3, %v10017_v49 }
 0x6f4   : > { %v3264_v13 = vpop.xlane.xlu1 %3263  ;;  %v3258_v15 = vpop.xlane.xlu0 %3257 }
 0x6f5   : > { %v3282_v23 = vsub.f32 %v10645_v35, %v3264_v13  ;;  %v3280_v18 = vsub.f32 %v10643_v34, %v3258_v15 }
 0x6f7   : > { %v3292_v24 = vmul.f32 1.442695, %v3282_v23  ;;  %v3288_v39 = vmul.f32 1.442695, %v3280_v18 }
 0x6f8   : > { %v3270_v21 = vpop.xlane.xlu0 %3269 }
 0x6f9   : > { %9839 = vpow2.f32 %v3292_v24  ;;  %v3284_v26 = vsub.f32 %v10647_v37, %v3270_v21 }
 0x6fa   : > { %9841 = vpow2.f32 %v3288_v39 }
 0x6fb   : > { %v3296_v10 = vmul.f32 1.442695, %v3284_v26 }
 0x6fc   : > { %v3276_v25 = vpop.xlane.xlu0 %3275 }
 0x6fd   : > { %9843 = vpow2.f32 %v3296_v10  ;;  %v3286_v27 = vsub.f32 %v10653_v40, %v3276_v25 }
 0x6ff   : > { %v3300_v17 = vmul.f32 1.442695, %v3286_v27 }
 0x701   : > { %9845 = vpow2.f32 %v3300_v17 }
 0x703   : > { %v10723_v44 = vpop.eup %9839 }
 0x704   : > { %v9842_v30 = vpop.eup %9841  ;;  %v3310_v34 = vsel %vm1335_vm4, %v10723_v44, 0.0 }
 0x705   : > { %3311 = vadd.xlane.f32.xlu1 %v3310_v34  ;;  %v3304_v35 = vsel %vm1335_vm4, %v9842_v30, 0.0 }
 0x706   : > { %3305 = vadd.xlane.f32.xlu0 %v3304_v35 }
 0x707   : > { %v10728_v31 = vpop.eup %9843 }
 0x708   : > { %v3316_v37 = vsel %vm1335_vm4, %v10728_v31, 0.0 }
 0x70a   : > { %3317 = vadd.xlane.f32.xlu0 %v3316_v37 }
 0x70b   : > { %v10732_v32 = vpop.eup %9845 }
 0x70c   : > { %v3322_v40 = vsel %vm1335_vm4, %v10732_v32, 0.0 }
 0x70d   : > { %3323 = vadd.xlane.f32.xlu1 %v3322_v40 }
 0x71e   : > { %3499 = vrot.lane.b32.xlu1 %v10404_v2, %s10019_s2 }
 0x720   : > { %3345 = vrot.lane.b32.xlu0 %v10406_v3, %s10019_s2 }
 0x722   : > { %3653 = vrot.lane.b32.xlu1 %v10417_v7, %s10019_s2 }
 0x726   : > { %3807 = vrot.lane.b32.xlu1 %v10414_v6, %s10019_s2 }
 0x74f   : > { %v10744_v14 = vpop.f32.mrb[44].mxu1 }
 0x750   : > { %v9377_v33 = vpop.f32.mrb[45].mxu1 }
 0x753   : > { %v10746_v19 = vpop.f32.mrb[46].mxu1 }
 0x754   : > { %v9387_v38 = vpop.f32.mrb[47].mxu1 }
 0x784   : > { %v10748_v41 = vpop.f32.mrb[48].mxu1 }
 0x785   : > { %v9397_v43 = vpop.f32.mrb[49].mxu1 }
 0x788   : > { %v10750_v45 = vpop.f32.mrb[50].mxu1 }
 0x789   : > { %v9407_v46 = vpop.f32.mrb[51].mxu1 }
 0x78f   : > { %v4292_v47 = vpop.f32.mrb[52].mxu1 }
 0x790   : > { %v10752_v48 = vmul.f32 0.17677669, %v4292_v47  ;;  %v9440_v11 = vpop.f32.mrb[53].mxu1 }
 0x792   : > { %v3312_v13 = vpop.xlane.xlu1 %3311  ;;  %v4850_v15 = vsel %vm1335_vm4, %v10752_v48, -inf }
 0x793   : > { %v3306_v23 = vpop.xlane.xlu0 %3305  ;;  %4851 = vmax.xlane.f32.xlu0 %v4850_v15  ;;  %v4370_v18 = vpop.f32.mrb[54].mxu1 }
 0x794   : > { %9847 = vrcp.f32 %v3306_v23  ;;  %v10756_v24 = vmul.f32 0.17677669, %v4370_v18  ;;  %v9445_v39 = vpop.f32.mrb[55].mxu1 }
 0x795   : > { %9849 = vrcp.f32 %v3312_v13 }
 0x796   : > { %v4853_v21 = vsel %vm1335_vm4, %v10756_v24, -inf }
 0x797   : > { %v3318_v26 = vpop.xlane.xlu0 %3317  ;;  %4854 = vmax.xlane.f32.xlu1 %v4853_v21  ;;  %v4448_v10 = vpop.f32.mrb[56].mxu1 }
 0x798   : > { %v10760_v25 = vmul.f32 0.17677669, %v4448_v10  ;;  %v9450_v27 = vpop.f32.mrb[57].mxu1  ;;  %9851 = vrcp.f32 %v3318_v26 }
 0x79a   : > { %v3324_v17 = vpop.xlane.xlu1 %3323  ;;  %v4856_v34 = vsel %vm1335_vm4, %v10760_v25, -inf }
 0x79b   : > { %v3346_v35 = vpop.permute.xlu0 %3345  ;;  %4857 = vmax.xlane.f32.xlu0 %v4856_v34  ;;  %v4526_v37 = vpop.f32.mrb[58].mxu1  ;;  %9853 = vrcp.f32 %v3324_v17 }
 0x79c   : > { %v10764_v40 = vmul.f32 0.17677669, %v4526_v37  ;;  %9369 = vmatpush3.msra.mxu0 %v3346_v35  ;;  %v9455_v33 = vpop.f32.mrb[59].mxu1 }
 0x79d   : > { %9378 = vmatprep.subr.mxu0 %v10017_v49 }
 0x79e   : > { %v9848_v38 = vpop.eup %9847  ;;  %v3500_v43 = vpop.permute.xlu1 %3499  ;;  %v4859_v46 = vsel %vm1335_vm4, %v10764_v40, -inf }
 0x79f   : > { %4860 = vmax.xlane.f32.xlu0 %v4859_v46  ;;  %v4604_v47 = vpop.f32.mrb[60].mxu1  ;;  %v3336_v11 = vmul.f32 %v9848_v38, %v9842_v30  ;;  %v9850_v13 = vpop.eup %9849 }
 0x7a0   : > { %v10769_v15 = vmul.f32 0.17677669, %v4604_v47  ;;  %v9460_v23 = vpop.f32.mrb[61].mxu1  ;;  %v3338_v30 = vmul.f32 %v9850_v13, %v10723_v44 }
 0x7a1   : > { %9371 = vmatmul.mubr.msk.f32.vlgmr.msra.gmra.mrb[28].mxu0 %vm1335_vm4, %v3336_v11  ;;  %v10808_v23 = vld [vmem:[%s10208_s17] sm:$0xff] }
 0x7a2   : > { %9379 = vmatpush3.msra.mxu0 %v3500_v43  ;;  %v3654_v18 = vpop.permute.xlu1 %3653  ;;  %v4862_v39 = vsel %vm1335_vm4, %v10769_v15, -inf  ;;  %9380 = vmatprep.mubr.msk.f32.mxu0 %vm10018_vm3, %v10017_v49  ;;  %v9852_v26 = vpop.eup %9851 }
 0x7a3   : > { %4863 = vmax.xlane.f32.xlu0 %v4862_v39  ;;  %v4682_v21 = vpop.f32.mrb[62].mxu1  ;;  %9388 = vmatprep.subr.mxu0 %v10017_v49  ;;  %v3340_v44 = vmul.f32 %v9852_v26, %v10728_v31 }
 0x7a4   : > { %v10778_v10 = vmul.f32 0.17677669, %v4682_v21  ;;  %v9465_v27 = vpop.f32.mrb[63].mxu1 }
 0x7a5   : > { %9381 = vmatmul.mubr.msk.f32.vlgmr.msra.gmra.mrb[30].mxu0 %vm1335_vm4, %v3338_v30  ;;  %v9854_v37 = vpop.eup %9853 }
 0x7a6   : > { %9389 = vmatpush3.msra.mxu0 %v3654_v18  ;;  %v4865_v17 = vsel %vm1335_vm4, %v10778_v10, -inf  ;;  %9390 = vmatprep.mubr.msk.f32.mxu0 %vm10018_vm3, %v10017_v49  ;;  %v3808_v34 = vpop.permute.xlu1 %3807  ;;  %v3342_v47 = vmul.f32 %v9854_v37, %v10732_v32  ;;  %v1332_v32 = vld [vmem:[%s10208_s17 + $0x8] sm:$0xff] }
 0x7a7   : > { %4866 = vmax.xlane.f32.xlu1 %v4865_v17  ;;  %v4760_v35 = vpop.f32.mrb[64].mxu1  ;;  %9398 = vmatprep.subr.mxu0 %v10017_v49 }
 0x7a8   : > { %v4848_v33 = vmul.f32 0.17677669, %v4760_v35  ;;  %v9470_v38 = vpop.f32.mrb[65].mxu1 }
 0x7a9   : > { %9391 = vmatmul.mubr.msk.f32.vlgmr.msra.gmra.mrb[32].mxu0 %vm1335_vm4, %v3340_v44 }
 0x7aa   : > { %9399 = vmatpush3.msra.mxu0 %v3808_v34  ;;  %v4868_v43 = vsel %vm1335_vm4, %v4848_v33, -inf  ;;  %9400 = vmatprep.mubr.msk.f32.mxu0 %vm10018_vm3, %v10017_v49 }
 0x7ab   : > { %4869 = vmax.xlane.f32.xlu0 %v4868_v43  ;;  %v4838_v46 = vpop.f32.mrb[66].mxu1  ;;  %9408 = vmatprep.subr.mxu0 %v1332_v32 }
 0x7ac   : > { %v4849_v11 = vmul.f32 0.17677669, %v4838_v46  ;;  %v9475_v13 = vpop.f32.mrb[67].mxu1 }
 0x7ad   : > { %9401 = vmatmul.mubr.msk.f32.vlgmr.msra.gmra.mrb[34].mxu0 %vm1335_vm4, %v3342_v47 }
 0x7ae   : > { %v4871_v31 = vsel %vm1335_vm4, %v4849_v11, -inf  ;;  %9409 = vmatpush3.msra.mxu0 %v1332_v32 }
 0x7af   : > { %4872 = vmax.xlane.f32.xlu1 %v4871_v31  ;;  %9422 = vmatprep.subr.mxu0 %v10808_v23 }
 0x7c0   : > { %5014 = vrot.lane.b32.xlu1 %v10411_v5, %s10020_s25 }
 0x7c1   : > { %4938 = vrot.lane.b32.xlu0 %v10406_v3, %s10020_s25 }
 0x7c4   : > { %5090 = vrot.lane.b32.xlu1 %v10404_v2, %s10020_s25 }
 0x7c5   : > { %5242 = vrot.lane.b32.xlu0 %v10417_v7, %s10020_s25 }
 0x7c8   : > { %5166 = vrot.lane.b32.xlu1 %v10408_v4, %s10020_s25 }
 0x7cc   : > { %5318 = vrot.lane.b32.xlu1 %v10422_v9, %s10020_s25 }
 0x820   : > { %v4852_v18 = vpop.xlane.xlu0 %4851 }
 0x821   : > { %v4874_v39 = vsub.f32 %v10752_v48, %v4852_v18 }
 0x823   : > { %v4882_v21 = vmul.f32 1.442695, %v4874_v39 }
 0x824   : > { %v4855_v30 = vpop.xlane.xlu1 %4854 }
 0x825   : > { %9855 = vpow2.f32 %v4882_v21  ;;  %v4875_v26 = vsub.f32 %v10756_v24, %v4855_v30 }
 0x827   : > { %v4884_v27 = vmul.f32 1.442695, %v4875_v26 }
 0x828   : > { %v4858_v17 = vpop.xlane.xlu0 %4857 }
 0x829   : > { %9857 = vpow2.f32 %v4884_v27  ;;  %v4876_v34 = vsub.f32 %v10760_v25, %v4858_v17 }
 0x82b   : > { %v4886_v35 = vmul.f32 1.442695, %v4876_v34 }
 0x82c   : > { %v4861_v44 = vpop.xlane.xlu0 %4860 }
 0x82d   : > { %9859 = vpow2.f32 %v4886_v35  ;;  %v4877_v37 = vsub.f32 %v10764_v40, %v4861_v44 }
 0x82f   : > { %v10815_v38 = vpop.eup %9855  ;;  %v4888_v43 = vmul.f32 1.442695, %v4877_v37 }
 0x830   : > { %v4864_v46 = vpop.xlane.xlu0 %4863  ;;  %v4898_v48 = vsel %vm1335_vm4, %v10815_v38, 0.0 }
 0x831   : > { %9861 = vpow2.f32 %v4888_v43  ;;  %v4878_v24 = vsub.f32 %v10769_v15, %v4864_v46  ;;  %4899 = vadd.xlane.f32.xlu0 %v4898_v48 }
 0x833   : > { %v10820_v47 = vpop.eup %9857  ;;  %v4890_v13 = vmul.f32 1.442695, %v4878_v24 }
 0x834   : > { %v4867_v25 = vpop.xlane.xlu1 %4866  ;;  %v4901_v31 = vsel %vm1335_vm4, %v10820_v47, 0.0 }
 0x835   : > { %9863 = vpow2.f32 %v4890_v13  ;;  %v4879_v40 = vsub.f32 %v10778_v10, %v4867_v25  ;;  %4902 = vadd.xlane.f32.xlu1 %v4901_v31  ;;  %v1333_v25 = vld [vmem:[%s10208_s17 + $0x10] sm:$0xff] }
 0x837   : > { %v10825_v32 = vpop.eup %9859  ;;  %v4892_v18 = vmul.f32 1.442695, %v4879_v40 }
 0x838   : > { %v4870_v39 = vpop.xlane.xlu0 %4869  ;;  %v4904_v21 = vsel %vm1335_vm4, %v10825_v32, 0.0 }
 0x839   : > { %9865 = vpow2.f32 %v4892_v18  ;;  %v4880_v15 = vsub.f32 %v4848_v33, %v4870_v39  ;;  %4905 = vadd.xlane.f32.xlu0 %v4904_v21 }
 0x83b   : > { %v10829_v30 = vpop.eup %9861  ;;  %v4894_v26 = vmul.f32 1.442695, %v4880_v15 }
 0x83c   : > { %v4873_v27 = vpop.xlane.xlu1 %4872  ;;  %v4907_v17 = vsel %vm1335_vm4, %v10829_v30, 0.0 }
 0x83d   : > { %9867 = vpow2.f32 %v4894_v26  ;;  %v4881_v10 = vsub.f32 %v4849_v11, %v4873_v27  ;;  %4908 = vadd.xlane.f32.xlu1 %v4907_v17 }
 0x83f   : > { %v10833_v34 = vpop.eup %9863  ;;  %v4896_v35 = vmul.f32 1.442695, %v4881_v10 }
 0x840   : > { %v5015_v44 = vpop.permute.xlu1 %5014  ;;  %v4910_v37 = vsel %vm1335_vm4, %v10833_v34, 0.0 }
 0x841   : > { %9869 = vpow2.f32 %v4896_v35  ;;  %4911 = vadd.xlane.f32.xlu0 %v4910_v37  ;;  %9482 = vmatpush3.msra.mxu1 %v5015_v44 }
 0x842   : > { %9491 = vmatprep.subr.mxu1 %v10017_v49 }
 0x843   : > { %v10838_v33 = vpop.eup %9865 }
 0x844   : > { %v4913_v43 = vsel %vm1335_vm4, %v10838_v33, 0.0 }
 0x845   : > { %4914 = vadd.xlane.f32.xlu1 %v4913_v43 }
 0x847   : > { %v10842_v11 = vpop.eup %9867 }
 0x848   : > { %v4916_v46 = vsel %vm1335_vm4, %v10842_v11, 0.0 }
 0x849   : > { %4917 = vadd.xlane.f32.xlu0 %v4916_v46 }
 0x84b   : > { %v10846_v48 = vpop.eup %9869 }
 0x84c   : > { %v4919_v24 = vsel %vm1335_vm4, %v10846_v48, 0.0 }
 0x84d   : > { %4920 = vadd.xlane.f32.xlu1 %v4919_v24 }
 0x85e   : > { %5470 = vrot.lane.b32.xlu1 %v10420_v8, %s10020_s25 }
 0x85f   : > { %5394 = vrot.lane.b32.xlu0 %v10414_v6, %s10020_s25 }
 0x862   : > { %5683 = vrot.lane.b32.xlu1 %v10318_v51, %s10021_s21 }
 0x863   : > { %5685 = vrot.lane.b32.xlu0 %v10334_v59, %s10021_s21 }
 0x866   : > { %5761 = vrot.lane.b32.xlu1 %v10322_v53, %s10021_s21 }
 0x867   : > { %5763 = vrot.lane.b32.xlu0 %v10340_v61, %s10021_s21 }
 0x86a   : > { %5839 = vrot.lane.b32.xlu1 %v10316_v50, %s10021_s21 }
 0x86b   : > { %5841 = vrot.lane.b32.xlu0 %v10332_v58, %s10021_s21 }
 0x86e   : > { %5917 = vrot.lane.b32.xlu1 %v10320_v52, %s10021_s21 }
 0x86f   : > { %5919 = vrot.lane.b32.xlu0 %v10336_v60, %s10021_s21  ;;  %v4939_v60 = vpop.permute.xlu0 %4938 }
 0x872   : > { %6075 = vrot.lane.b32.xlu1 %v10365_v1, %s10021_s21 }
 0x873   : > { %5997 = vrot.lane.b32.xlu0 %v10352_v63, %s10021_s21  ;;  %v5243_v61 = vpop.permute.xlu0 %5242 }
 0x874   : > { %v3417_v51 = vpop.f32.mrb[28].mxu0 }
 0x875   : > { %v9372_v53 = vpop.f32.mrb[29].mxu0  ;;  %9410 = vmatprep.mubr.msk.f32.mxu0 %vm1335_vm4, %v3417_v51 }
 0x876   : > { %9411 = vmatmul.mubr.msk.f32.vlgmr.msra.gmra.mrb[36].mxu0 %vm1335_vm4, %v10744_v14  ;;  %6073 = vrot.lane.b32.xlu1 %v10330_v57, %s10021_s21 }
 0x877   : > { %5995 = vrot.lane.b32.xlu0 %v10326_v55, %s10021_s21  ;;  %9423 = vmatpush3.msra.mxu0 %v10808_v23 }
 0x878   : > { %v3571_v50 = vpop.f32.mrb[30].mxu0  ;;  %9476 = vmatprep.subr.mxu0 %v10017_v49 }
 0x879   : > { %v9382_v52 = vpop.f32.mrb[31].mxu0  ;;  %9413 = vmatprep.mubr.msk.f32.mxu0 %vm1335_vm4, %v3571_v50 }
 0x87a   : > { %9414 = vmatmul.mubr.msk.f32.gmra.mrb[38].mxu0 %vm1335_vm4, %v10746_v19  ;;  %6231 = vrot.lane.b32.xlu1 %v10360_v0, %s10021_s21 }
 0x87b   : > { %6153 = vrot.lane.b32.xlu0 %v10350_v62, %s10021_s21 }
 0x87c   : > { %v3725_v57 = vpop.f32.mrb[32].mxu0 }
 0x87d   : > { %v9392_v58 = vpop.f32.mrb[33].mxu0  ;;  %9416 = vmatprep.mubr.msk.f32.mxu0 %vm1335_vm4, %v3725_v57 }
 0x87e   : > { %9417 = vmatmul.mubr.msk.f32.gmra.mrb[40].mxu0 %vm1335_vm4, %v10748_v41  ;;  %6229 = vrot.lane.b32.xlu1 %v10328_v56, %s10021_s21 }
 0x87f   : > { %6151 = vrot.lane.b32.xlu0 %v10324_v54, %s10021_s21  ;;  %v5091_v54 = vpop.permute.xlu1 %5090 }
 0x880   : > { %v3879_v55 = vpop.f32.mrb[34].mxu0 }
 0x881   : > { %v9402_v59 = vpop.f32.mrb[35].mxu0  ;;  %9419 = vmatprep.mubr.msk.f32.mxu0 %vm1335_vm4, %v3879_v55 }
 0x882   : > { %9420 = vmatmul.mubr.msk.f32.gmra.mrb[42].mxu0 %vm1335_vm4, %v10750_v45 }
 0x883   : > { %9424 = vmatprep.mubr.msk.f32.mxu0 %vm1335_vm4, %v10589_v42  ;;  %v5167_v56 = vpop.permute.xlu1 %5166 }
 0x886   : > { %9425 = vmatmul.mubr.msk.f32.vlgmr.msra.gmra.mrb[36].mxu0 %vm1335_vm4, %v10524_v22 }
 0x887   : > { %9477 = vmatpush3.msra.mxu0 %v4939_v60  ;;  %9427 = vmatprep.mubr.msk.f32.mxu0 %vm1335_vm4, %v10605_v20  ;;  %v5319_v62 = vpop.permute.xlu1 %5318 }
 0x888   : > { %9486 = vmatprep.subr.mxu0 %v10017_v49 }
 0x88a   : > { %9428 = vmatmul.mubr.msk.f32.gmra.mrb[38].mxu0 %vm1335_vm4, %v10526_v28 }
 0x88b   : > { %9430 = vmatprep.mubr.msk.f32.mxu0 %vm1335_vm4, %v10609_v12 }
 0x88e   : > { %9431 = vmatmul.mubr.msk.f32.gmra.mrb[40].mxu0 %vm1335_vm4, %v10528_v29 }
 0x88f   : > { %9433 = vmatprep.mubr.msk.f32.mxu0 %vm1335_vm4, %v10611_v16 }
 0x892   : > { %9434 = vmatmul.mubr.msk.f32.gmra.mrb[42].mxu0 %vm1335_vm4, %v10535_v36 }
 0x893   : > { %9478 = vmatprep.mubr.msk.f32.mxu0 %vm10018_vm3, %v10017_v49 }
 0x8be   : > { %v4900_v63 = vpop.xlane.xlu0 %4899 }
 0x8bf   : > { %9871 = vrcp.f32 %v4900_v63 }
 0x8c2   : > { %v4903_v0 = vpop.xlane.xlu1 %4902 }
 0x8c3   : > { %9873 = vrcp.f32 %v4903_v0 }
 0x8c6   : > { %v4906_v1 = vpop.xlane.xlu0 %4905 }
 0x8c7   : > { %9875 = vrcp.f32 %v4906_v1 }
 0x8c9   : > { %v9872_v22 = vpop.eup %9871 }
 0x8ca   : > { %v4930_v28 = vmul.f32 %v9872_v22, %v10815_v38  ;;  %v4909_v29 = vpop.xlane.xlu1 %4908 }
 0x8cb   : > { %9877 = vrcp.f32 %v4909_v29 }
 0x8cc   : > { %9479 = vmatmul.mubr.msk.f32.vlgmr.msra.gmra.mrb[44].mxu0 %vm1335_vm4, %v4930_v28 }
 0x8cd   : > { %v9874_v36 = vpop.eup %9873  ;;  %9487 = vmatpush3.msra.mxu0 %v5091_v54  ;;  %9488 = vmatprep.mubr.msk.f32.mxu0 %vm10018_vm3, %v10017_v49 }
 0x8ce   : > { %v4931_v42 = vmul.f32 %v9874_v36, %v10820_v47  ;;  %v4912_v20 = vpop.xlane.xlu0 %4911  ;;  %9496 = vmatprep.subr.mxu0 %v10017_v49 }
 0x8cf   : > { %9879 = vrcp.f32 %v4912_v20 }
 0x8d0   : > { %9484 = vmatmul.mubr.msk.f32.vlgmr.msra.gmra.mrb[68].mxu1 %vm1335_vm4, %v4931_v42 }
 0x8d1   : > { %v9876_v12 = vpop.eup %9875  ;;  %9492 = vmatpush3.msra.mxu1 %v5167_v56  ;;  %9493 = vmatprep.mubr.msk.f32.mxu1 %vm10018_vm3, %v10017_v49 }
 0x8d2   : > { %v4932_v16 = vmul.f32 %v9876_v12, %v10825_v32  ;;  %v4915_v14 = vpop.xlane.xlu1 %4914  ;;  %9501 = vmatprep.subr.mxu1 %v10017_v49 }
 0x8d3   : > { %9881 = vrcp.f32 %v4915_v14 }
 0x8d4   : > { %9489 = vmatmul.mubr.msk.f32.vlgmr.msra.gmra.mrb[46].mxu0 %vm1335_vm4, %v4932_v16 }
 0x8d5   : > { %v9878_v19 = vpop.eup %9877  ;;  %9497 = vmatpush3.msra.mxu0 %v5243_v61  ;;  %9498 = vmatprep.mubr.msk.f32.mxu0 %vm10018_vm3, %v10017_v49 }
 0x8d6   : > { %v4933_v41 = vmul.f32 %v9878_v19, %v10829_v30  ;;  %v4918_v45 = vpop.xlane.xlu0 %4917  ;;  %9506 = vmatprep.subr.mxu0 %v10017_v49 }
 0x8d7   : > { %9883 = vrcp.f32 %v4918_v45 }
 0x8d8   : > { %9494 = vmatmul.mubr.msk.f32.vlgmr.msra.gmra.mrb[70].mxu1 %vm1335_vm4, %v4933_v41 }
 0x8d9   : > { %v9880_v23 = vpop.eup %9879  ;;  %9502 = vmatpush3.msra.mxu1 %v5319_v62  ;;  %9503 = vmatprep.mubr.msk.f32.mxu1 %vm10018_vm3, %v10017_v49 }
 0x8da   : > { %v4934_v38 = vmul.f32 %v9880_v23, %v10833_v34  ;;  %v5395_v47 = vpop.permute.xlu0 %5394  ;;  %v4921_v13 = vpop.xlane.xlu1 %4920  ;;  %9511 = vmatprep.subr.mxu1 %v10017_v49 }
 0x8db   : > { %9885 = vrcp.f32 %v4921_v13 }
 0x8dc   : > { %9499 = vmatmul.mubr.msk.f32.vlgmr.msra.gmra.mrb[48].mxu0 %vm1335_vm4, %v4934_v38 }
 0x8dd   : > { %v9882_v31 = vpop.eup %9881  ;;  %9507 = vmatpush3.msra.mxu0 %v5395_v47  ;;  %9508 = vmatprep.mubr.msk.f32.mxu0 %vm10018_vm3, %v10017_v49 }
 0x8de   : > { %v4935_v40 = vmul.f32 %v9882_v31, %v10838_v33  ;;  %v5471_v32 = vpop.permute.xlu1 %5470  ;;  %9516 = vmatprep.subr.mxu0 %v1333_v25  ;;  %v5686_v21 = vpop.permute.xlu0 %5685 }
 0x8e0   : > { %9504 = vmatmul.mubr.msk.f32.vlgmr.msra.gmra.mrb[72].mxu1 %vm1335_vm4, %v4935_v40 }
 0x8e1   : > { %v9884_v18 = vpop.eup %9883  ;;  %9512 = vmatpush3.msra.mxu1 %v5471_v32  ;;  %9513 = vmatprep.mubr.msk.f32.mxu1 %vm10018_vm3, %v10017_v49 }
 0x8e2   : > { %v4936_v39 = vmul.f32 %v9884_v18, %v10842_v11  ;;  %v5684_v15 = vpop.permute.xlu1 %5683  ;;  %9530 = vmatprep.subr.mxu1 %v10017_v49  ;;  %v5764_v17 = vpop.permute.xlu0 %5763 }
 0x8e4   : > { %9509 = vmatmul.mubr.msk.f32.vlgmr.msra.gmra.mrb[50].mxu0 %vm1335_vm4, %v4936_v39 }
 0x8e5   : > { %v9886_v30 = vpop.eup %9885  ;;  %9517 = vmatpush3.msra.mxu0 %v1333_v25 }
 0x8e6   : > { %v4937_v26 = vmul.f32 %v9886_v30, %v10846_v48  ;;  %v5762_v27 = vpop.permute.xlu1 %5761  ;;  %9550 = vmatprep.subr.mxu0 %v10017_v49  ;;  %v5842_v34 = vpop.permute.xlu0 %5841 }
 0x8e8   : > { %9514 = vmatmul.mubr.msk.f32.vlgmr.msra.gmra.mrb[74].mxu1 %vm1335_vm4, %v4937_v26 }
 0x8e9   : > { %9531 = vmatpush3.xpose.msk.msra.mxu1 %vm1335_vm4, %v5686_v21  ;;  %9532 = vmatprep.mubr.msk.f32.mxu1 %vm10018_vm3, %v10017_v49 }
 0x8ea   : > { %v5840_v10 = vpop.permute.xlu1 %5839  ;;  %9535 = vmatprep.subr.mxu1 %v10017_v49  ;;  %v5920_v37 = vpop.permute.xlu0 %5919 }
 0x8ec   : > { %9533 = vmatmul.mubr.msk.f32.vlgmr.msra.gmra.mrb[76].mxu1 %vm1335_vm4, %v5684_v15 }
 0x8ed   : > { %9536 = vmatpush3.xpose.msk.msra.mxu1 %vm1335_vm4, %v5764_v17  ;;  %9537 = vmatprep.mubr.msk.f32.mxu1 %vm10018_vm3, %v10017_v49 }
 0x8ee   : > { %v5918_v35 = vpop.permute.xlu1 %5917  ;;  %9540 = vmatprep.subr.mxu1 %v10017_v49  ;;  %v5998_v51 = vpop.permute.xlu0 %5997 }
 0x8f0   : > { %9538 = vmatmul.mubr.msk.f32.vlgmr.msra.gmra.mrb[78].mxu1 %vm1335_vm4, %v5762_v27 }
 0x8f1   : > { %9541 = vmatpush3.xpose.msk.msra.mxu1 %vm1335_vm4, %v5842_v34  ;;  %9542 = vmatprep.mubr.msk.f32.mxu1 %vm10018_vm3, %v10017_v49 }
 0x8f2   : > { %v6076_v44 = vpop.permute.xlu1 %6075  ;;  %9545 = vmatprep.subr.mxu1 %v10017_v49  ;;  %v5996_v56 = vpop.permute.xlu0 %5995 }
 0x8f4   : > { %9543 = vmatmul.mubr.msk.f32.vlgmr.msra.gmra.mrb[80].mxu1 %vm1335_vm4, %v5840_v10 }
 0x8f5   : > { %9546 = vmatpush3.xpose.msk.msra.mxu1 %vm1335_vm4, %v5920_v37  ;;  %9547 = vmatprep.mubr.msk.f32.mxu1 %vm10018_vm3, %v10017_v49 }
 0x8f6   : > { %v6074_v33 = vpop.permute.xlu1 %6073  ;;  %9555 = vmatprep.subr.mxu1 %v10017_v49  ;;  %v6154_v1 = vpop.permute.xlu0 %6153 }
 0x8f8   : > { %9548 = vmatmul.mubr.msk.f32.vlgmr.msra.gmra.mrb[82].mxu1 %vm1335_vm4, %v5918_v35 }
 0x8f9   : > { %9556 = vmatpush3.xpose.msk.msra.mxu1 %vm1335_vm4, %v6076_v44  ;;  %9557 = vmatprep.mubr.msk.f32.mxu1 %vm10018_vm3, %v10017_v49 }
 0x8fa   : > { %v6232_v43 = vpop.permute.xlu1 %6231  ;;  %9565 = vmatprep.subr.mxu1 %v10017_v49  ;;  %v6152_v42 = vpop.permute.xlu0 %6151 }
 0x8fc   : > { %9558 = vmatmul.mubr.msk.f32.vlgmr.msra.gmra.mrb[84].mxu1 %vm1335_vm4, %v6074_v33 }
 0x8fd   : > { %9566 = vmatpush3.xpose.msk.msra.mxu1 %vm1335_vm4, %v6232_v43  ;;  %9567 = vmatprep.mubr.msk.f32.mxu1 %vm10018_vm3, %v10017_v49 }
 0x8fe   : > { %v6230_v11 = vpop.permute.xlu1 %6229  ;;  %9575 = vmatprep.subr.mxu1 %v10017_v49 }
 0x900   : > { %9568 = vmatmul.mubr.msk.f32.vlgmr.msra.gmra.mrb[86].mxu1 %vm1335_vm4, %v6230_v11 }
 0x901   : > { %9577 = vmatprep.mubr.msk.f32.mxu1 %vm10018_vm3, %v10017_v49 }
 0x99f   : > { %v5010_v46 = vpop.f32.mrb[44].mxu0 }
 0x9a0   : > { %v9480_v48 = vpop.f32.mrb[45].mxu0  ;;  %9518 = vmatprep.mubr.msk.f32.mxu0 %vm1335_vm4, %v5010_v46 }
 0x9a3   : > { %v5086_v24 = vpop.f32.mrb[68].mxu1 }
 0x9a4   : > { %v9485_v53 = vpop.f32.mrb[69].mxu1  ;;  %9519 = vmatmul.mubr.msk.f32.vlgmr.msra.gmra.mrb[36].mxu0 %vm1335_vm4, %v5086_v24 }
 0x9a5   : > { %9551 = vmatpush3.xpose.msk.msra.mxu0 %vm1335_vm4, %v5998_v51 }
 0x9a6   : > { %9560 = vmatprep.subr.mxu0 %v10017_v49 }
 0x9a7   : > { %v5162_v50 = vpop.f32.mrb[46].mxu0 }
 0x9a8   : > { %v9490_v52 = vpop.f32.mrb[47].mxu0  ;;  %9521 = vmatprep.mubr.msk.f32.mxu0 %vm1335_vm4, %v5162_v50 }
 0x9ab   : > { %v5238_v57 = vpop.f32.mrb[70].mxu1 }
 0x9ac   : > { %v9495_v58 = vpop.f32.mrb[71].mxu1  ;;  %9522 = vmatmul.mubr.msk.f32.gmra.mrb[38].mxu0 %vm1335_vm4, %v5238_v57 }
 0x9af   : > { %v5314_v55 = vpop.f32.mrb[48].mxu0 }
 0x9b0   : > { %v9500_v59 = vpop.f32.mrb[49].mxu0  ;;  %9524 = vmatprep.mubr.msk.f32.mxu0 %vm1335_vm4, %v5314_v55 }
 0x9b3   : > { %v5390_v60 = vpop.f32.mrb[72].mxu1 }
 0x9b4   : > { %v9505_v54 = vpop.f32.mrb[73].mxu1  ;;  %9525 = vmatmul.mubr.msk.f32.gmra.mrb[40].mxu0 %vm1335_vm4, %v5390_v60 }
 0x9b7   : > { %v5466_v61 = vpop.f32.mrb[50].mxu0 }
 0x9b8   : > { %v9510_v62 = vpop.f32.mrb[51].mxu0  ;;  %9527 = vmatprep.mubr.msk.f32.mxu0 %vm1335_vm4, %v5466_v61 }
 0x9bb   : > { %v5542_v63 = vpop.f32.mrb[74].mxu1 }
 0x9bc   : > { %v9515_v0 = vpop.f32.mrb[75].mxu1  ;;  %9528 = vmatmul.mubr.msk.f32.gmra.mrb[42].mxu0 %vm1335_vm4, %v5542_v63 }
 0x9bd   : > { %9552 = vmatprep.mubr.msk.f32.mxu0 %vm10018_vm3, %v10017_v49 }
 0x9bf   : > { %v5757_v22 = vpop.f32.mrb[76].mxu1 }
 0x9c0   : > { %v10998_v28 = vmul.f32 0.17677669, %v5757_v22  ;;  %v9534_v29 = vpop.f32.mrb[77].mxu1  ;;  %9553 = vmatmul.mubr.msk.f32.vlgmr.msra.gmra.mrb[52].mxu0 %vm1335_vm4, %v5996_v56 }
 0x9c1   : > { %9561 = vmatpush3.xpose.msk.msra.mxu0 %vm1335_vm4, %v6154_v1  ;;  %9562 = vmatprep.mubr.msk.f32.mxu0 %vm10018_vm3, %v10017_v49 }
 0x9c2   : > { %v6315_v36 = vsel %vm1335_vm4, %v10998_v28, -inf  ;;  %9570 = vmatprep.subr.mxu0 %v10017_v49 }
 0x9c3   : > { %6316 = vmax.xlane.f32.xlu0 %v6315_v36  ;;  %v5835_v20 = vpop.f32.mrb[78].mxu1 }
 0x9c4   : > { %v6308_v12 = vmul.f32 0.17677669, %v5835_v20  ;;  %v9539_v16 = vpop.f32.mrb[79].mxu1  ;;  %9563 = vmatmul.mubr.msk.f32.vlgmr.msra.gmra.mrb[54].mxu0 %vm1335_vm4, %v6152_v42 }
 0x9c5   : > { %9572 = vmatprep.mubr.msk.f32.mxu0 %vm10018_vm3, %v10017_v49 }
 0x9c6   : > { %v6318_v14 = vsel %vm1335_vm4, %v6308_v12, -inf }
 0x9c7   : > { %6319 = vmax.xlane.f32.xlu1 %v6318_v14  ;;  %v5913_v19 = vpop.f32.mrb[80].mxu1 }
 0x9c8   : > { %v6309_v41 = vmul.f32 0.17677669, %v5913_v19  ;;  %v9544_v45 = vpop.f32.mrb[81].mxu1 }
 0x9ca   : > { %v6321_v23 = vsel %vm1335_vm4, %v6309_v41, -inf }
 0x9cb   : > { %6322 = vmax.xlane.f32.xlu0 %v6321_v23  ;;  %v5991_v38 = vpop.f32.mrb[82].mxu1 }
 0x9cc   : > { %v6310_v47 = vmul.f32 0.17677669, %v5991_v38  ;;  %v9549_v13 = vpop.f32.mrb[83].mxu1 }
 0x9ce   : > { %v6324_v25 = vsel %vm1335_vm4, %v6310_v47, -inf }
 0x9cf   : > { %6325 = vmax.xlane.f32.xlu0 %v6324_v25  ;;  %v6147_v31 = vpop.f32.mrb[84].mxu1 }
 0x9d0   : > { %v6312_v40 = vmul.f32 0.17677669, %v6147_v31  ;;  %v9559_v32 = vpop.f32.mrb[85].mxu1 }
 0x9d2   : > { %v6330_v18 = vsel %vm1335_vm4, %v6312_v40, -inf }
 0x9d3   : > { %6331 = vmax.xlane.f32.xlu1 %v6330_v18  ;;  %v6303_v39 = vpop.f32.mrb[86].mxu1 }
 0x9d4   : > { %v6314_v21 = vmul.f32 0.17677669, %v6303_v39  ;;  %v9569_v15 = vpop.f32.mrb[87].mxu1 }
 0x9d6   : > { %v6336_v30 = vsel %vm1335_vm4, %v6314_v21, -inf }
 0x9d7   : > { %6337 = vmax.xlane.f32.xlu1 %v6336_v30 }
 0xa50   : > { %v6317_v26 = vpop.xlane.xlu0 %6316 }
 0xa51   : > { %v6339_v60 = vsub.f32 %v10998_v28, %v6317_v26 }
 0xa53   : > { %v6347_v54 = vmul.f32 1.442695, %v6339_v60 }
 0xa54   : > { %v6320_v27 = vpop.xlane.xlu1 %6319 }
 0xa55   : > { %v6340_v17 = vsub.f32 %v6308_v12, %v6320_v27 }
 0xa57   : > { %v6349_v10 = vmul.f32 1.442695, %v6340_v17 }
 0xa58   : > { %v6323_v34 = vpop.xlane.xlu0 %6322 }
 0xa59   : > { %9887 = vpow2.f32 %v6349_v10  ;;  %v6341_v56 = vsub.f32 %v6309_v41, %v6323_v34 }
 0xa5b   : > { %v6351_v61 = vmul.f32 1.442695, %v6341_v56 }
 0xa5c   : > { %v6326_v35 = vpop.xlane.xlu0 %6325 }
 0xa5d   : > { %v6342_v44 = vsub.f32 %v6310_v47, %v6326_v35 }
 0xa5f   : > { %v6353_v37 = vmul.f32 1.442695, %v6342_v44 }
 0xa60   : > { %v6332_v33 = vpop.xlane.xlu1 %6331 }
 0xa61   : > { %9889 = vpow2.f32 %v6353_v37  ;;  %v6344_v43 = vsub.f32 %v6312_v40, %v6332_v33 }
 0xa63   : > { %v9888_v11 = vpop.eup %9887  ;;  %v6357_v46 = vmul.f32 1.442695, %v6344_v43 }
 0xa64   : > { %v6338_v48 = vpop.xlane.xlu1 %6337  ;;  %v6366_v24 = vsel %vm1335_vm4, %v9888_v11, 0.0 }
 0xa65   : > { %9891 = vpow2.f32 %v6357_v46  ;;  %v6346_v51 = vsub.f32 %v6314_v21, %v6338_v48  ;;  %6367 = vadd.xlane.f32.xlu1 %v6366_v24 }
 0xa67   : > { %v6361_v53 = vmul.f32 1.442695, %v6346_v51 }
 0xa69   : > { %9893 = vpow2.f32 %v6361_v53  ;;  %v1334_v53 = vld [vmem:[%s10208_s17 + $0x18] sm:$0xff] }
 0xa6a   : > { %9895 = vpow2.f32 %v6347_v54 }
 0xa6b   : > { %v9890_v50 = vpop.eup %9889  ;;  %9897 = vpow2.f32 %v6351_v61 }
 0xa6c   : > { %v6372_v52 = vsel %vm1335_vm4, %v9890_v50, 0.0 }
 0xa6d   : > { %6373 = vadd.xlane.f32.xlu1 %v6372_v52 }
 0xa6f   : > { %v9892_v57 = vpop.eup %9891 }
 0xa70   : > { %v6378_v58 = vsel %vm1335_vm4, %v9892_v57, 0.0 }
 0xa71   : > { %6379 = vadd.xlane.f32.xlu1 %v6378_v58 }
 0xa73   : > { %v11018_v55 = vpop.eup %9893 }
 0xa74   : > { %v6384_v59 = vsel %vm1335_vm4, %v11018_v55, 0.0  ;;  %v11035_v28 = vpop.eup %9895 }
 0xa75   : > { %6385 = vadd.xlane.f32.xlu1 %v6384_v59  ;;  %v11039_v29 = vpop.eup %9897 }
 0xa86   : > { %6479 = vrot.lane.b32.xlu1 %v10411_v5, %s10021_s21 }
 0xa8a   : > { %6555 = vrot.lane.b32.xlu1 %v10404_v2, %s10021_s21 }
 0xa8e   : > { %6631 = vrot.lane.b32.xlu1 %v10408_v4, %s10021_s21 }
 0xa92   : > { %6783 = vrot.lane.b32.xlu1 %v10422_v9, %s10021_s21  ;;  %v6363_v9 = vsel %vm1335_vm4, %v11035_v28, 0.0 }
 0xa93   : > { %v6069_v62 = vpop.f32.mrb[52].mxu0 }
 0xa94   : > { %v6311_v63 = vmul.f32 0.17677669, %v6069_v62  ;;  %v9554_v0 = vpop.f32.mrb[53].mxu0 }
 0xa96   : > { %6935 = vrot.lane.b32.xlu1 %v10420_v8, %s10021_s21  ;;  %v6327_v5 = vsel %vm1335_vm4, %v6311_v63, -inf  ;;  %v6369_v8 = vsel %vm1335_vm4, %v11039_v29, 0.0 }
 0xa97   : > { %v6225_v2 = vpop.f32.mrb[54].mxu0  ;;  %6328 = vmax.xlane.f32.xlu0 %v6327_v5 }
 0xa98   : > { %v6313_v1 = vmul.f32 0.17677669, %v6225_v2  ;;  %v9564_v22 = vpop.f32.mrb[55].mxu0 }
 0xa9a   : > { %v6333_v4 = vsel %vm1335_vm4, %v6313_v1, -inf }
 0xa9b   : > { %6334 = vmax.xlane.f32.xlu0 %v6333_v4  ;;  %v8939_v4 = vld [vmem:[%s11538_s26] ss:$0 sm:$0xff] }
 0xa9f   : > { %6364 = vadd.xlane.f32.xlu0 %v6363_v9 }
 0xaa3   : > { %6370 = vadd.xlane.f32.xlu0 %v6369_v8 }
 0xab9   : > { %6403 = vrot.lane.b32.xlu0 %v10406_v3, %s10021_s21 }
 0xabd   : > { %6707 = vrot.lane.b32.xlu0 %v10417_v7, %s10021_s21 }
 0xaf2   : > { %v6368_v36 = vpop.xlane.xlu1 %6367 }
 0xaf3   : > { %9899 = vrcp.f32 %v6368_v36  ;;  %v11094_v36 = vld [vmem:[#allocation2 + $0x8] sm:$0xff] }
 0xafa   : > { %v6374_v42 = vpop.xlane.xlu1 %6373 }
 0xafb   : > { %9901 = vrcp.f32 %v6374_v42 }
 0xafd   : > { %v9900_v16 = vpop.eup %9899 }
 0xafe   : > { %v6380_v20 = vpop.xlane.xlu1 %6379  ;;  %v6396_v14 = vmul.f32 %v9900_v16, %v9888_v11 }
 0xaff   : > { %9903 = vrcp.f32 %v6380_v20  ;;  %v11097_v20 = vld [vmem:[#allocation2] sm:$0xff] }
 0xb02   : > { %v6386_v12 = vpop.xlane.xlu1 %6385 }
 0xb03   : > { %9905 = vrcp.f32 %v6386_v12 }
 0xb05   : > { %v9902_v7 = vpop.eup %9901 }
 0xb06   : > { %v6480_v19 = vpop.permute.xlu1 %6479  ;;  %v6398_v41 = vmul.f32 %v9902_v7, %v9890_v50 }
 0xb07   : > { %9576 = vmatpush3.msra.mxu1 %v6480_v19 }
 0xb08   : > { %9578 = vmatmul.mubr.msk.f32.vlgmr.msra.gmra.mrb[88].mxu1 %vm1335_vm4, %v6396_v14  ;;  %9585 = vmatprep.subr.mxu1 %v10017_v49 }
 0xb09   : > { %9587 = vmatprep.mubr.msk.f32.mxu1 %vm10018_vm3, %v10017_v49  ;;  %v9904_v23 = vpop.eup %9903 }
 0xb0a   : > { %v6556_v3 = vpop.permute.xlu1 %6555  ;;  %v6400_v38 = vmul.f32 %v9904_v23, %v9892_v57 }
 0xb0d   : > { %v9906_v13 = vpop.eup %9905 }
 0xb0e   : > { %v6632_v45 = vpop.permute.xlu1 %6631  ;;  %v6402_v25 = vmul.f32 %v9906_v13, %v11018_v55 }
 0xb0f   : > { %9586 = vmatpush3.msra.mxu1 %v6632_v45  ;;  %v11102_v45 = vld [vmem:[#allocation2 + $0x18] sm:$0xff] }
 0xb10   : > { %9588 = vmatmul.mubr.msk.f32.vlgmr.msra.gmra.mrb[90].mxu1 %vm1335_vm4, %v6398_v41  ;;  %9595 = vmatprep.subr.mxu1 %v10017_v49 }
 0xb11   : > { %9597 = vmatprep.mubr.msk.f32.mxu1 %vm10018_vm3, %v10017_v49 }
 0xb12   : > { %v6784_v47 = vpop.permute.xlu1 %6783 }
 0xb13   : > { %9596 = vmatpush3.msra.mxu1 %v6784_v47  ;;  %v11106_v47 = vld [vmem:[#allocation2 + $0x10] sm:$0xff] }
 0xb14   : > { %9598 = vmatmul.mubr.msk.f32.vlgmr.msra.gmra.mrb[92].mxu1 %vm1335_vm4, %v6400_v38  ;;  %9605 = vmatprep.subr.mxu1 %v10017_v49 }
 0xb15   : > { %9607 = vmatprep.mubr.msk.f32.mxu1 %vm10018_vm3, %v10017_v49 }
 0xb16   : > { %v6936_v31 = vpop.permute.xlu1 %6935 }
 0xb17   : > { %9606 = vmatpush3.msra.mxu1 %v6936_v31 }
 0xb18   : > { %9608 = vmatmul.mubr.msk.f32.vlgmr.msra.gmra.mrb[94].mxu1 %vm1335_vm4, %v6402_v25 }
 0xb24   : > { %v6329_v40 = vpop.xlane.xlu0 %6328 }
 0xb25   : > { %v6343_v32 = vsub.f32 %v6311_v63, %v6329_v40 }
 0xb27   : > { %v6355_v18 = vmul.f32 1.442695, %v6343_v32 }
 0xb28   : > { %v6335_v39 = vpop.xlane.xlu0 %6334 }
 0xb29   : > { %9907 = vpow2.f32 %v6355_v18  ;;  %v6345_v21 = vsub.f32 %v6313_v1, %v6335_v39 }
 0xb2b   : > { %v6359_v15 = vmul.f32 1.442695, %v6345_v21 }
 0xb2c   : > { %v6365_v30 = vpop.xlane.xlu0 %6364 }
 0xb2d   : > { %9909 = vpow2.f32 %v6359_v15 }
 0xb2e   : > { %9911 = vrcp.f32 %v6365_v30 }
 0xb30   : > { %v6371_v26 = vpop.xlane.xlu0 %6370 }
 0xb31   : > { %9913 = vrcp.f32 %v6371_v26  ;;  %v11110_v26 = vld [vmem:[#allocation2 + $0x28] sm:$0xff] }
 0xb33   : > { %v9908_v27 = vpop.eup %9907 }
 0xb34   : > { %v6404_v17 = vpop.permute.xlu0 %6403  ;;  %v6375_v10 = vsel %vm1335_vm4, %v9908_v27, 0.0 }
 0xb35   : > { %6376 = vadd.xlane.f32.xlu0 %v6375_v10  ;;  %9571 = vmatpush3.msra.mxu0 %v6404_v17  ;;  %v11113_v10 = vld [vmem:[#allocation2 + $0x20] sm:$0xff] }
 0xb36   : > { %9580 = vmatprep.subr.mxu0 %v10017_v49 }
 0xb37   : > { %v9910_v34 = vpop.eup %9909 }
 0xb38   : > { %v9912_v35 = vpop.eup %9911  ;;  %v6381_v44 = vsel %vm1335_vm4, %v9910_v34, 0.0  ;;  %v6708_v11 = vpop.permute.xlu0 %6707 }
 0xb39   : > { %v6395_v37 = vmul.f32 %v9912_v35, %v11035_v28  ;;  %6382 = vadd.xlane.f32.xlu0 %v6381_v44 }
 0xb3b   : > { %v9914_v33 = vpop.eup %9913  ;;  %9573 = vmatmul.mubr.msk.f32.vlgmr.msra.gmra.mrb[56].mxu0 %vm1335_vm4, %v6395_v37 }
 0xb3c   : > { %v6397_v43 = vmul.f32 %v9914_v33, %v11039_v29  ;;  %9581 = vmatpush3.msra.mxu0 %v6556_v3  ;;  %9582 = vmatprep.mubr.msk.f32.mxu0 %vm10018_vm3, %v10017_v49 }
 0xb3d   : > { %9590 = vmatprep.subr.mxu0 %v10017_v49 }
 0xb3f   : > { %9583 = vmatmul.mubr.msk.f32.vlgmr.msra.gmra.mrb[58].mxu0 %vm1335_vm4, %v6397_v43 }
 0xb40   : > { %9591 = vmatpush3.msra.mxu0 %v6708_v11  ;;  %9592 = vmatprep.mubr.msk.f32.mxu0 %vm10018_vm3, %v10017_v49 }
 0xb41   : > { %9600 = vmatprep.subr.mxu0 %v10017_v49 }
 0xb4f   : > { %6859 = vrot.lane.b32.xlu0 %v10414_v6, %s10021_s21 }
 0xbc2   : > { %v6377_v46 = vpop.xlane.xlu0 %6376 }
 0xbc3   : > { %9915 = vrcp.f32 %v6377_v46 }
 0xbc6   : > { %v6383_v48 = vpop.xlane.xlu0 %6382 }
 0xbc7   : > { %9917 = vrcp.f32 %v6383_v48 }
 0xbca   : > { %v6860_v50 = vpop.permute.xlu0 %6859 }
 0xbcd   : > { %v9916_v24 = vpop.eup %9915 }
 0xbce   : > { %v6399_v51 = vmul.f32 %v9916_v24, %v9908_v27 }
 0xbd0   : > { %9593 = vmatmul.mubr.msk.f32.vlgmr.msra.gmra.mrb[60].mxu0 %vm1335_vm4, %v6399_v51  ;;  %v11122_v51 = vld [vmem:[#allocation2 + $0x38] sm:$0xff] }
 0xbd1   : > { %v9918_v52 = vpop.eup %9917  ;;  %9601 = vmatpush3.msra.mxu0 %v6860_v50  ;;  %9602 = vmatprep.mubr.msk.f32.mxu0 %vm10018_vm3, %v10017_v49 }
 0xbd2   : > { %v6401_v57 = vmul.f32 %v9918_v52, %v9910_v34  ;;  %9610 = vmatprep.subr.mxu0 %v1334_v53  ;;  %v11125_v52 = vld [vmem:[#allocation2 + $0x30] sm:$0xff] }
 0xbd4   : > { %9603 = vmatmul.mubr.msk.f32.vlgmr.msra.gmra.mrb[62].mxu0 %vm1335_vm4, %v6401_v57 }
 0xbd5   : > { %9611 = vmatpush3.msra.mxu0 %v1334_v53 }
 0xbdb   : > { %v6551_v6 = vpop.f32.mrb[88].mxu1 }
 0xbdc   : > { %v9579_v58 = vpop.f32.mrb[89].mxu1 }
 0xbe3   : > { %v6703_v55 = vpop.f32.mrb[90].mxu1 }
 0xbe4   : > { %v9589_v59 = vpop.f32.mrb[91].mxu1 }
 0xbe7   : > { %v6855_v60 = vpop.f32.mrb[92].mxu1 }
 0xbe8   : > { %v9599_v54 = vpop.f32.mrb[93].mxu1 }
 0xbeb   : > { %v7007_v56 = vpop.f32.mrb[94].mxu1 }
 0xbec   : > { %v9609_v61 = vpop.f32.mrb[95].mxu1 }
 0xc0e   : > { %v6475_v62 = vpop.f32.mrb[56].mxu0 }
 0xc0f   : > { %v9574_v63 = vpop.f32.mrb[57].mxu0  ;;  %9612 = vmatprep.mubr.msk.f32.mxu0 %vm1335_vm4, %v6475_v62 }
 0xc10   : > { %9613 = vmatmul.mubr.msk.f32.vlgmr.msra.gmra.mrb[36].mxu0 %vm1335_vm4, %v6551_v6 }
 0xc12   : > { %v6627_v49 = vpop.f32.mrb[58].mxu0 }
 0xc13   : > { %v9584_v0 = vpop.f32.mrb[59].mxu0  ;;  %9615 = vmatprep.mubr.msk.f32.mxu0 %vm1335_vm4, %v6627_v49 }
 0xc14   : > { %9616 = vmatmul.mubr.msk.f32.gmra.mrb[38].mxu0 %vm1335_vm4, %v6703_v55 }
 0xca3   : > { %v6779_v5 = vpop.f32.mrb[60].mxu0 }
 0xca4   : > { %v9594_v2 = vpop.f32.mrb[61].mxu0  ;;  %9618 = vmatprep.mubr.msk.f32.mxu0 %vm1335_vm4, %v6779_v5 }
 0xca5   : > { %9619 = vmatmul.mubr.msk.f32.gmra.mrb[40].mxu0 %vm1335_vm4, %v6855_v60  ;;  %v9781_v2 = vld [vmem:[%s10225_s5] sm:$0xff]  }
 0xca6   : > { %9624 = vmatprep.subr.bf16.mxu1 %v9781_v2 }
 0xca7   : > { %v6931_v1 = vpop.f32.mrb[62].mxu0  ;;  %9625 = vmatpush3.bf16.msra.mxu1 %v9781_v2  ;;  %v9785_v2 = vld [vmem:[%s10235_s1 + $0x10] sm:$0xff]  }
 0xca8   : > { %v9604_v22 = vpop.f32.mrb[63].mxu0  ;;  %9621 = vmatprep.mubr.msk.f32.mxu0 %vm1335_vm4, %v6931_v1  ;;  %v9782_v1 = vld [vmem:[%s10225_s5 + $0x8] sm:$0xff]  }
 0xca9   : > { %9622 = vmatmul.mubr.msk.f32.gmra.mrb[42].mxu0 %vm1335_vm4, %v7007_v56  ;;  %9626 = vmatprep.subr.bf16.mxu1 %v9782_v1 }
 0xcab   : > { %9627 = vmatpush3.bf16.msra.mxu1 %v9782_v1  ;;  %v9786_v1 = vld [vmem:[%s10235_s1 + $0x18] sm:$0xff]  }
 0xce3   : > { %v9614_v28 = vpop.f32.mrb[36].mxu0 }
 0xce4   : > { %v7156_v9 = vadd.f32 %v9614_v28, %v8939_v4  ;;  %v7101_v29 = vpop.f32.mrb[37].mxu0 }
 0xce5   : > { %v7155_v8 = vadd.f32 %v8939_v4, %v7101_v29 }
 0xce6   : > { %v7164_v42 = vadd.f32 %v11094_v36, %v7156_v9 }
 0xce7   : > { %v7163_v12 = vadd.f32 %v11097_v20, %v7155_v8  ;;  %v9617_v16 = vpop.f32.mrb[38].mxu0 }
 0xce8   : > { %v7158_v14 = vadd.f32 %v9617_v16, %v8939_v4  ;;  %v7111_v19 = vpop.f32.mrb[39].mxu0  ;;  %v7176_v3 = vsel %vm1091_vm2, %v7164_v42, 0.0 }
 0xce9   : > { %v7157_v7 = vadd.f32 %v8939_v4, %v7111_v19  ;;  %7177 = vadd.xlane.f32.xlu1 %v7176_v3  ;;  %v7173_v41 = vsel %vm1091_vm2, %v7163_v12, 0.0 }
 0xcea   : > { %v7166_v23 = vadd.f32 %v11102_v45, %v7158_v14  ;;  %7174 = vadd.xlane.f32.xlu0 %v7173_v41 }
 0xceb   : > { %v7165_v13 = vadd.f32 %v11106_v47, %v7157_v7 }
 0xcec   : > { %v7182_v38 = vsel %vm1091_vm2, %v7166_v23, 0.0 }
 0xced   : > { %v7179_v25 = vsel %vm1091_vm2, %v7165_v13, 0.0 }
 0xcee   : > { %7183 = vadd.xlane.f32.xlu0 %v7182_v38 }
 0xcf2   : > { %7180 = vadd.xlane.f32.xlu0 %v7179_v25 }
 0xd76   : > { %v7178_v31 = vpop.xlane.xlu1 %7177 }
 0xd77   : > { %v7175_v40 = vpop.xlane.xlu0 %7174  ;;  %v7199_v18 = vmul.f32 0.03125, %v7178_v31 }
 0xd78   : > { %v9620_v32 = vpop.f32.mrb[40].mxu0  ;;  %v7198_v15 = vmul.f32 0.03125, %v7175_v40 }
 0xd79   : > { %v7160_v39 = vadd.f32 %v9620_v32, %v8939_v4  ;;  %v7121_v21 = vpop.f32.mrb[41].mxu0  ;;  %v11116_v44 = vsub.f32 %v7164_v42, %v7199_v18 }
 0xd7a   : > { %v7159_v30 = vadd.f32 %v8939_v4, %v7121_v21  ;;  %v11119_v46 = vsub.f32 %v7163_v12, %v7198_v15 }
 0xd7b   : > { %v7168_v27 = vadd.f32 %v11110_v26, %v7160_v39  ;;  %v7184_v17 = vpop.xlane.xlu0 %7183  ;;  %v7215_v59 = vmul.f32 %v11116_v44, %v11116_v44 }
 0xd7c   : > { %v7167_v34 = vadd.f32 %v11113_v10, %v7159_v30  ;;  %v9623_v35 = vpop.f32.mrb[42].mxu0  ;;  %v7201_v37 = vmul.f32 0.03125, %v7184_v17  ;;  %v7214_v56 = vmul.f32 %v11119_v46, %v11119_v46 }
 0xd7d   : > { %v7162_v33 = vadd.f32 %v9623_v35, %v8939_v4  ;;  %v7131_v43 = vpop.f32.mrb[43].mxu0  ;;  %v7188_v11 = vsel %vm1091_vm2, %v7168_v27, 0.0  ;;  %v7225_v61 = vsel %vm1091_vm2, %v7215_v59, 0.0 }
 0xd7e   : > { %v7161_v48 = vadd.f32 %v8939_v4, %v7131_v43  ;;  %7189 = vadd.xlane.f32.xlu1 %v7188_v11  ;;  %v7185_v24 = vsel %vm1091_vm2, %v7167_v34, 0.0  ;;  %v11128_v58 = vsub.f32 %v7166_v23, %v7201_v37  ;;  %v7222_v63 = vsel %vm1091_vm2, %v7214_v56, 0.0  ;;  %v11173_v11 = vld [vmem:[%s11539_s19] ss:$0 sm:$0xff] }
 0xd7f   : > { %v7170_v53 = vadd.f32 %v11122_v51, %v7162_v33  ;;  %v7181_v50 = vpop.xlane.xlu0 %7180  ;;  %7186 = vadd.xlane.f32.xlu0 %v7185_v24 }
 0xd80   : > { %v7169_v57 = vadd.f32 %v11125_v52, %v7161_v48  ;;  %v7200_v6 = vmul.f32 0.03125, %v7181_v50  ;;  %v7217_v62 = vmul.f32 %v11128_v58, %v11128_v58  ;;  %v11182_v50 = vld [vmem:[%s11540_s27] ss:$0 sm:$0xff] }
 0xd81   : > { %v7194_v55 = vsel %vm1091_vm2, %v7170_v53, 0.0 }
 0xd82   : > { %v11133_v60 = vsub.f32 %v7165_v13, %v7200_v6  ;;  %7195 = vadd.xlane.f32.xlu1 %v7194_v55  ;;  %v7191_v54 = vsel %vm1091_vm2, %v7169_v57, 0.0  ;;  %v7231_v0 = vsel %vm1091_vm2, %v7217_v62, 0.0 }
 0xd83   : > { %7192 = vadd.xlane.f32.xlu0 %v7191_v54 }
 0xd84   : > { %v7216_v49 = vmul.f32 %v11133_v60, %v11133_v60 }
 0xd86   : > { %7226 = vadd.xlane.f32.xlu1 %v7225_v61  ;;  %v7228_v5 = vsel %vm1091_vm2, %v7216_v49, 0.0 }
 0xd87   : > { %7223 = vadd.xlane.f32.xlu0 %v7222_v63 }
 0xd8a   : > { %7232 = vadd.xlane.f32.xlu1 %v7231_v0  ;;  %v9783_v0 = vld [vmem:[%s10235_s1] sm:$0xff]  }
 0xd8b   : > { %7229 = vadd.xlane.f32.xlu0 %v7228_v5  ;;  %v9784_v5 = vld [vmem:[%s10235_s1 + $0x8] sm:$0xff]   ;;  %9636 = vmatprep.subr.bf16.mxu0 %v9783_v0 }
 0xd8c   : > { %9637 = vmatpush3.bf16.msra.mxu0 %v9783_v0 }
 0xd8d   : > { %9638 = vmatprep.subr.bf16.mxu0 %v9784_v5 }
 0xd90   : > { %9639 = vmatpush3.bf16.msra.mxu0 %v9784_v5 }
 0xd91   : > { %9640 = vmatprep.subr.bf16.mxu0 %v9785_v2 }
 0xd94   : > { %9641 = vmatpush3.bf16.msra.mxu0 %v9785_v2 }
 0xd95   : > { %9642 = vmatprep.subr.bf16.mxu0 %v9786_v1 }
 0xd98   : > { %9643 = vmatpush3.bf16.msra.mxu0 %v9786_v1 }
 0xe0b   : > { %v7190_v22 = vpop.xlane.xlu1 %7189 }
 0xe0c   : > { %v7203_v4 = vmul.f32 0.03125, %v7190_v22  ;;  %v7187_v28 = vpop.xlane.xlu0 %7186  ;;  %v9787_v22 = vld [vmem:[%s10235_s1 + $0x20] sm:$0xff]  }
 0xe0d   : > { %v7202_v9 = vmul.f32 0.03125, %v7187_v28  ;;  %9644 = vmatprep.subr.bf16.mxu0 %v9787_v22  ;;  %v9789_v28 = vld [vmem:[%s10235_s1 + $0x30] sm:$0xff]  }
 0xe0e   : > { %v11148_v29 = vsub.f32 %v7168_v27, %v7203_v4  ;;  %v9788_v4 = vld [vmem:[%s10235_s1 + $0x28] sm:$0xff]   ;;  %9645 = vmatpush3.bf16.msra.mxu0 %v9787_v22 }
 0xe0f   : > { %v11150_v8 = vsub.f32 %v7167_v34, %v7202_v9  ;;  %v7196_v42 = vpop.xlane.xlu1 %7195  ;;  %9646 = vmatprep.subr.bf16.mxu0 %v9788_v4  ;;  %v9790_v9 = vld [vmem:[%s10235_s1 + $0x38] sm:$0xff]   ;;  %s11547_s1 = sld [smem:[#allocation24_spill]] (!%p8962_p9) }
 0xe10   : > { %v7205_v12 = vmul.f32 0.03125, %v7196_v42  ;;  %v7193_v16 = vpop.xlane.xlu0 %7192  ;;  %v7219_v14 = vmul.f32 %v11148_v29, %v11148_v29 }
 0xe11   : > { %v7204_v19 = vmul.f32 0.03125, %v7193_v16  ;;  %v7218_v3 = vmul.f32 %v11150_v8, %v11150_v8 }
 0xe12   : > { %v11156_v7 = vsub.f32 %v7170_v53, %v7205_v12  ;;  %v7237_v41 = vsel %vm1091_vm2, %v7219_v14, 0.0  ;;  %9647 = vmatpush3.bf16.msra.mxu0 %v9788_v4 }
 0xe13   : > { %v11159_v23 = vsub.f32 %v7169_v57, %v7204_v19  ;;  %7238 = vadd.xlane.f32.xlu1 %v7237_v41  ;;  %v7227_v38 = vpop.xlane.xlu1 %7226  ;;  %v7234_v13 = vsel %vm1091_vm2, %v7218_v3, 0.0  ;;  %9648 = vmatprep.subr.bf16.mxu0 %v9789_v28 }
 0xe14   : > { %v7247_v25 = vmul.f32 0.03125, %v7227_v38  ;;  %7235 = vadd.xlane.f32.xlu0 %v7234_v13  ;;  %v7224_v31 = vpop.xlane.xlu0 %7223  ;;  %v7221_v40 = vmul.f32 %v11156_v7, %v11156_v7 }
 0xe15   : > { %v7246_v32 = vmul.f32 0.03125, %v7224_v31  ;;  %v7220_v18 = vmul.f32 %v11159_v23, %v11159_v23 }
 0xe16   : > { %v7255_v39 = vadd.f32 1e-05, %v7247_v25  ;;  %v7243_v21 = vsel %vm1091_vm2, %v7221_v40, 0.0  ;;  %9649 = vmatpush3.bf16.msra.mxu0 %v9789_v28 }
 0xe17   : > { %v7254_v15 = vadd.f32 1e-05, %v7246_v32  ;;  %7244 = vadd.xlane.f32.xlu1 %v7243_v21  ;;  %v7233_v30 = vpop.xlane.xlu1 %7232  ;;  %v7240_v27 = vsel %vm1091_vm2, %v7220_v18, 0.0  ;;  %9650 = vmatprep.subr.bf16.mxu0 %v9790_v9 }
 0xe18   : > { %9919 = vrsqrt.f32 %v7255_v39  ;;  %v7249_v17 = vmul.f32 0.03125, %v7233_v30  ;;  %7241 = vadd.xlane.f32.xlu0 %v7240_v27  ;;  %v7230_v34 = vpop.xlane.xlu0 %7229 }
 0xe19   : > { %9921 = vrsqrt.f32 %v7254_v15  ;;  %v7248_v35 = vmul.f32 0.03125, %v7230_v34 }
 0xe1a   : > { %v7257_v37 = vadd.f32 1e-05, %v7249_v17  ;;  %9651 = vmatpush3.bf16.msra.mxu0 %v9790_v9 }
 0xe1b   : > { %v7256_v33 = vadd.f32 1e-05, %v7248_v35 }
 0xe1c   : > { %9923 = vrsqrt.f32 %v7257_v37 }
 0xe1d   : > { %9925 = vrsqrt.f32 %v7256_v33 }
 0xe22   : > { %v9920_v43 = vpop.eup %9919 }
 0xe23   : > { %v9922_v48 = vpop.eup %9921  ;;  %v7271_v24 = vmul.f32 %v9920_v43, %v11116_v44 }
 0xe24   : > { %v7270_v53 = vmul.f32 %v9922_v48, %v11119_v46 }
 0xe25   : > { %v7285_v57 = vmul.f32 %v11173_v11, %v7271_v24  ;;  %v8942_v24 = vld [vmem:[%s11541_s12] ss:$0 sm:$0xff] }
 0xe26   : > { %v9924_v6 = vpop.eup %9923  ;;  %v7284_v55 = vmul.f32 %v11173_v11, %v7270_v53 }
 0xe27   : > { %v9926_v59 = vpop.eup %9925  ;;  %v7273_v54 = vmul.f32 %v9924_v6, %v11128_v58  ;;  %v11188_v44 = vadd.f32 %v11182_v50, %v7285_v57 }
 0xe28   : > { %v7272_v46 = vmul.f32 %v9926_v59, %v11133_v60  ;;  %v11192_v56 = vadd.f32 %v11182_v50, %v7284_v55 }
 0xe29   : > { %v7287_v61 = vmul.f32 %v11173_v11, %v7273_v54 }
 0xe2a   : > { %v7286_v62 = vmul.f32 %v11173_v11, %v7272_v46  ;;  %v7306_v63 = vpack.c.bf16 %v11188_v44, %v11192_v56 }
 0xe2b   : > { %v11199_v49 = vadd.f32 %v11182_v50, %v7287_v61 }
 0xe2c   : > { %9628 = vmatprep.mubr.msk.bf16.mxu1 %vm1091_vm2, %v7306_v63  ;;  %v11203_v58 = vadd.f32 %v11182_v50, %v7286_v62 }
 0xe2e   : > { %v7307_v60 = vpack.c.bf16 %v11199_v49, %v11203_v58 }
 0xe30   : > { %9629 = vmatmul.mubr.msk.bf16.vlgmr.msra.gmra.mrb[96].mxu1 %vm1091_vm2, %v7307_v60 }
 0xea0   : > { %v7239_v42 = vpop.xlane.xlu1 %7238 }
 0xea1   : > { %v7251_v12 = vmul.f32 0.03125, %v7239_v42  ;;  %v7236_v16 = vpop.xlane.xlu0 %7235 }
 0xea2   : > { %v7250_v14 = vmul.f32 0.03125, %v7236_v16 }
 0xea3   : > { %v7259_v19 = vadd.f32 1e-05, %v7251_v12 }
 0xea4   : > { %v7258_v3 = vadd.f32 1e-05, %v7250_v14  ;;  %v7245_v41 = vpop.xlane.xlu1 %7244 }
 0xea5   : > { %9927 = vrsqrt.f32 %v7259_v19  ;;  %v7253_v38 = vmul.f32 0.03125, %v7245_v41  ;;  %v7242_v13 = vpop.xlane.xlu0 %7241 }
 0xea6   : > { %9929 = vrsqrt.f32 %v7258_v3  ;;  %v7252_v25 = vmul.f32 0.03125, %v7242_v13 }
 0xea7   : > { %v7261_v31 = vadd.f32 1e-05, %v7253_v38  ;;  %v8949_v38 = vld [vmem:[%s11542_s18] ss:$0 sm:$0xff] }
 0xea8   : > { %v7260_v40 = vadd.f32 1e-05, %v7252_v25 }
 0xea9   : > { %9931 = vrsqrt.f32 %v7261_v31 }
 0xeaa   : > { %9933 = vrsqrt.f32 %v7260_v40 }
 0xeaf   : > { %v9928_v32 = vpop.eup %9927 }
 0xeb0   : > { %v9930_v18 = vpop.eup %9929  ;;  %v7275_v39 = vmul.f32 %v9928_v32, %v11148_v29 }
 0xeb1   : > { %v7274_v21 = vmul.f32 %v9930_v18, %v11150_v8 }
 0xeb2   : > { %v7289_v15 = vmul.f32 %v11173_v11, %v7275_v39 }
 0xeb3   : > { %v9932_v30 = vpop.eup %9931  ;;  %v7288_v27 = vmul.f32 %v11173_v11, %v7274_v21 }
 0xeb4   : > { %v9934_v17 = vpop.eup %9933  ;;  %v7277_v34 = vmul.f32 %v9932_v30, %v11156_v7  ;;  %v11222_v35 = vadd.f32 %v11182_v50, %v7289_v15 }
 0xeb5   : > { %v7276_v37 = vmul.f32 %v9934_v17, %v11159_v23  ;;  %v11226_v33 = vadd.f32 %v11182_v50, %v7288_v27 }
 0xeb6   : > { %v7291_v29 = vmul.f32 %v11173_v11, %v7277_v34 }
 0xeb7   : > { %v7308_v8 = vpack.c.bf16 %v11222_v35, %v11226_v33  ;;  %v7290_v43 = vmul.f32 %v11173_v11, %v7276_v37 }
 0xeb8   : > { %v11233_v48 = vadd.f32 %v11182_v50, %v7291_v29 }
 0xeb9   : > { %9632 = vmatprep.mubr.msk.bf16.mxu1 %vm1091_vm2, %v7308_v8  ;;  %v11237_v7 = vadd.f32 %v11182_v50, %v7290_v43 }
 0xebb   : > { %v7309_v23 = vpack.c.bf16 %v11233_v48, %v11237_v7 }
 0xebd   : > { %9633 = vmatmul.mubr.msk.bf16.gmra.mrb[100].mxu1 %vm1091_vm2, %v7309_v23 }
 0xf03   : > { %v9630_v53 = vpop.f32.mrb[96].mxu1 }
 0xf04   : > { %v7388_v11 = vadd.f32 %v9630_v53, %v8942_v24  ;;  %v7379_v57 = vpop.f32.mrb[97].mxu1 }
 0xf05   : > { %v7380_v6 = vadd.f32 %v8942_v24, %v7379_v57  ;;  %v9631_v55 = vpop.f32.mrb[98].mxu1 }
 0xf06   : > { %v7391_v59 = vadd.f32 %v9631_v55, %v8942_v24  ;;  %v7382_v54 = vpop.f32.mrb[99].mxu1  ;;  %v7412_v50 = vmax.f32 %v7388_v11, 0.0 }
 0xf07   : > { %v7383_v46 = vadd.f32 %v8942_v24, %v7382_v54  ;;  %v7410_v62 = vmax.f32 %v7380_v6, 0.0 }
 0xf08   : > { %v7413_v61 = vmax.f32 %v7391_v59, 0.0 }
 0xf09   : > { %v7411_v63 = vmax.f32 %v7383_v46, 0.0 }
 0xf0a   : > { %v7419_v60 = vpack.c.bf16 %v7413_v61, %v7412_v50 }
 0xf0b   : > { %v7418_v0 = vpack.c.bf16 %v7411_v63, %v7410_v62 }
 0xf0d   : > { %9652 = vmatprep.mubr.bf16.mxu0 %v7418_v0 }
 0xf0e   : > { %9653 = vmatmul.mubr.bf16.vlgmr.msra.gmra.mrb[64].mxu0 %v7419_v60 }
 0xf90   : > { %v9634_v5 = vpop.f32.mrb[100].mxu1 }
 0xf91   : > { %v7404_v2 = vadd.f32 %v9634_v5, %v8942_v24  ;;  %v7395_v1 = vpop.f32.mrb[101].mxu1 }
 0xf92   : > { %v7396_v22 = vadd.f32 %v8942_v24, %v7395_v1  ;;  %v9635_v4 = vpop.f32.mrb[102].mxu1 }
 0xf93   : > { %v7407_v28 = vadd.f32 %v9635_v4, %v8942_v24  ;;  %v7398_v9 = vpop.f32.mrb[103].mxu1  ;;  %v7416_v12 = vmax.f32 %v7404_v2, 0.0 }
 0xf94   : > { %v7399_v42 = vadd.f32 %v8942_v24, %v7398_v9  ;;  %v7414_v14 = vmax.f32 %v7396_v22, 0.0 }
 0xf95   : > { %v7417_v16 = vmax.f32 %v7407_v28, 0.0 }
 0xf96   : > { %v7415_v19 = vmax.f32 %v7399_v42, 0.0 }
 0xf97   : > { %v7421_v3 = vpack.c.bf16 %v7417_v16, %v7416_v12 }
 0xf98   : > { %v7420_v41 = vpack.c.bf16 %v7415_v19, %v7414_v14 }
 0xf9a   : > { %9656 = vmatprep.mubr.bf16.mxu0 %v7420_v41 }
 0xf9b   : > { %9657 = vmatmul.mubr.bf16.gmra.mrb[68].mxu0 %v7421_v3 }
 0xfe1   : > { %v9654_v13 = vpop.f32.mrb[64].mxu0 }
 0xfe2   : > { %v7536_v25 = vadd.f32 %v9654_v13, %v8949_v38  ;;  %v7527_v31 = vpop.f32.mrb[65].mxu0 }
 0xfe3   : > { %v7528_v40 = vadd.f32 %v8949_v38, %v7527_v31  ;;  %v9655_v32 = vpop.f32.mrb[66].mxu0 }
 0xfe4   : > { %v7560_v18 = vadd.f32 %v7536_v25, %v11203_v58  ;;  %v7539_v39 = vadd.f32 %v9655_v32, %v8949_v38  ;;  %v7530_v21 = vpop.f32.mrb[67].mxu0 }
 0xfe5   : > { %v7531_v15 = vadd.f32 %v8949_v38, %v7530_v21  ;;  %v7558_v30 = vadd.f32 %v7528_v40, %v11192_v56 }
 0xfe6   : > { %v7561_v27 = vadd.f32 %v7539_v39, %v11199_v49  ;;  %v7574_v17 = vsel %vm1091_vm2, %v7560_v18, 0.0 }
 0xfe7   : > { %7575 = vadd.xlane.f32.xlu0 %v7574_v17  ;;  %v7559_v34 = vadd.f32 %v7531_v15, %v11188_v44  ;;  %v7568_v29 = vsel %vm1091_vm2, %v7558_v30, 0.0 }
 0xfe8   : > { %v7577_v37 = vsel %vm1091_vm2, %v7561_v27, 0.0 }
 0xfe9   : > { %7578 = vadd.xlane.f32.xlu1 %v7577_v37  ;;  %v7571_v58 = vsel %vm1091_vm2, %v7559_v34, 0.0 }
 0xfeb   : > { %7569 = vadd.xlane.f32.xlu0 %v7568_v29 }
 0xfed   : > { %7572 = vadd.xlane.f32.xlu1 %v7571_v58 }
0x106e   : > { %v9658_v8 = vpop.f32.mrb[68].mxu0 }
0x106f   : > { %v7543_v43 = vpop.f32.mrb[69].mxu0  ;;  %v7552_v23 = vadd.f32 %v9658_v8, %v8949_v38 }
0x1070   : > { %v7544_v56 = vadd.f32 %v8949_v38, %v7543_v43  ;;  %v9659_v24 = vpop.f32.mrb[70].mxu0 }
0x1071   : > { %v7546_v49 = vpop.f32.mrb[71].mxu0  ;;  %v7555_v11 = vadd.f32 %v9659_v24, %v8949_v38  ;;  %v7564_v44 = vadd.f32 %v7552_v23, %v11237_v7 }
0x1072   : > { %v7562_v53 = vadd.f32 %v7544_v56, %v11226_v33  ;;  %v7547_v57 = vadd.f32 %v8949_v38, %v7546_v49 }
0x1073   : > { %v7565_v54 = vadd.f32 %v7555_v11, %v11233_v48  ;;  %v7586_v33 = vsel %vm1091_vm2, %v7564_v44, 0.0 }
0x1074   : > { %v7563_v6 = vadd.f32 %v7547_v57, %v11222_v35  ;;  %v7576_v55 = vpop.xlane.xlu0 %7575  ;;  %v7580_v59 = vsel %vm1091_vm2, %v7562_v53, 0.0 }
0x1075   : > { %7581 = vadd.xlane.f32.xlu0 %v7580_v59  ;;  %v7594_v61 = vmul.f32 0.03125, %v7576_v55  ;;  %v7589_v35 = vsel %vm1091_vm2, %v7565_v54, 0.0 }
0x1076   : > { %v7579_v46 = vpop.xlane.xlu1 %7578  ;;  %v7583_v50 = vsel %vm1091_vm2, %v7563_v6, 0.0 }
0x1077   : > { %7584 = vadd.xlane.f32.xlu1 %v7583_v50  ;;  %v7595_v63 = vmul.f32 0.03125, %v7579_v46  ;;  %v11268_v0 = vsub.f32 %v7560_v18, %v7594_v61  ;;  %v11310_v61 = vld [vmem:[%s11543_s3] ss:$0 sm:$0xff] }
0x1078   : > { %v7570_v62 = vpop.xlane.xlu0 %7569 }
0x1079   : > { %v7592_v60 = vmul.f32 0.03125, %v7570_v62  ;;  %7587 = vadd.xlane.f32.xlu0 %v7586_v33  ;;  %v11270_v48 = vsub.f32 %v7561_v27, %v7595_v63  ;;  %v7610_v9 = vmul.f32 %v11268_v0, %v11268_v0 }
0x107a   : > { %v7573_v7 = vpop.xlane.xlu1 %7572 }
0x107b   : > { %v7600_v5 = vsub.f32 %v7558_v30, %v7592_v60  ;;  %v7593_v2 = vmul.f32 0.03125, %v7573_v7  ;;  %7590 = vadd.xlane.f32.xlu1 %v7589_v35  ;;  %v7611_v12 = vmul.f32 %v11270_v48, %v11270_v48  ;;  %v7622_v16 = vsel %vm1091_vm2, %v7610_v9, 0.0 }
0x107d   : > { %v7601_v1 = vsub.f32 %v7559_v34, %v7593_v2  ;;  %v7608_v22 = vmul.f32 %v7600_v5, %v7600_v5  ;;  %v7625_v14 = vsel %vm1091_vm2, %v7611_v12, 0.0 }
0x107f   : > { %v7616_v4 = vsel %vm1091_vm2, %v7608_v22, 0.0  ;;  %v7609_v28 = vmul.f32 %v7601_v1, %v7601_v1 }
0x1080   : > { %7617 = vadd.xlane.f32.xlu0 %v7616_v4 }
0x1081   : > { %v7619_v42 = vsel %vm1091_vm2, %v7609_v28, 0.0 }
0x1082   : > { %7620 = vadd.xlane.f32.xlu1 %v7619_v42 }
0x1084   : > { %7623 = vadd.xlane.f32.xlu0 %v7622_v16 }
0x1086   : > { %7626 = vadd.xlane.f32.xlu1 %v7625_v14 }
0x1102   : > { %v7582_v19 = vpop.xlane.xlu0 %7581 }
0x1103   : > { %v7596_v3 = vmul.f32 0.03125, %v7582_v19 }
0x1104   : > { %v7585_v41 = vpop.xlane.xlu1 %7584 }
0x1105   : > { %v11280_v38 = vsub.f32 %v7562_v53, %v7596_v3  ;;  %v7597_v13 = vmul.f32 0.03125, %v7585_v41 }
0x1106   : > { %v7588_v25 = vpop.xlane.xlu0 %7587 }
0x1107   : > { %v11282_v31 = vsub.f32 %v7563_v6, %v7597_v13  ;;  %v7598_v40 = vmul.f32 0.03125, %v7588_v25  ;;  %v7612_v32 = vmul.f32 %v11280_v38, %v11280_v38 }
0x1108   : > { %v7591_v18 = vpop.xlane.xlu1 %7590 }
0x1109   : > { %v11286_v39 = vsub.f32 %v7564_v44, %v7598_v40  ;;  %v7599_v21 = vmul.f32 0.03125, %v7591_v18  ;;  %v7628_v15 = vsel %vm1091_vm2, %v7612_v32, 0.0  ;;  %v7613_v30 = vmul.f32 %v11282_v31, %v11282_v31 }
0x110a   : > { %7629 = vadd.xlane.f32.xlu0 %v7628_v15 }
0x110b   : > { %v11291_v27 = vsub.f32 %v7565_v54, %v7599_v21  ;;  %v7631_v17 = vsel %vm1091_vm2, %v7613_v30, 0.0  ;;  %v7614_v34 = vmul.f32 %v11286_v39, %v11286_v39  ;;  %v8958_v54 = vld [vmem:[%s930_s29] ss:$0 sm:$0xff] }
0x110c   : > { %7632 = vadd.xlane.f32.xlu1 %v7631_v17 }
0x110d   : > { %v7618_v37 = vpop.xlane.xlu0 %7617  ;;  %v7634_v29 = vsel %vm1091_vm2, %v7614_v34, 0.0  ;;  %v7615_v58 = vmul.f32 %v11291_v27, %v11291_v27 }
0x110e   : > { %v7640_v8 = vmul.f32 0.03125, %v7618_v37  ;;  %7635 = vadd.xlane.f32.xlu0 %v7634_v29 }
0x110f   : > { %v7621_v43 = vpop.xlane.xlu1 %7620  ;;  %v7637_v23 = vsel %vm1091_vm2, %v7615_v58, 0.0 }
0x1110   : > { %v7648_v56 = vadd.f32 1e-05, %v7640_v8  ;;  %v7641_v24 = vmul.f32 0.03125, %v7621_v43  ;;  %7638 = vadd.xlane.f32.xlu1 %v7637_v23 }
0x1111   : > { %v7624_v49 = vpop.xlane.xlu0 %7623 }
0x1112   : > { %9935 = vrsqrt.f32 %v7648_v56  ;;  %v7649_v53 = vadd.f32 1e-05, %v7641_v24  ;;  %v7642_v11 = vmul.f32 0.03125, %v7624_v49 }
0x1113   : > { %v7627_v57 = vpop.xlane.xlu1 %7626 }
0x1114   : > { %9937 = vrsqrt.f32 %v7649_v53  ;;  %v7650_v44 = vadd.f32 1e-05, %v7642_v11  ;;  %v7643_v6 = vmul.f32 0.03125, %v7627_v57 }
0x1116   : > { %9939 = vrsqrt.f32 %v7650_v44  ;;  %v7651_v55 = vadd.f32 1e-05, %v7643_v6 }
0x1118   : > { %9941 = vrsqrt.f32 %v7651_v55 }
0x111c   : > { %v9936_v59 = vpop.eup %9935 }
0x111d   : > { %v7664_v46 = vmul.f32 %v9936_v59, %v7600_v5 }
0x111e   : > { %v9938_v50 = vpop.eup %9937 }
0x111f   : > { %v7678_v62 = vmul.f32 %v8958_v54, %v7664_v46  ;;  %v7665_v33 = vmul.f32 %v9938_v50, %v7601_v1 }
0x1120   : > { %v9940_v63 = vpop.eup %9939 }
0x1121   : > { %v7692_v60 = vadd.f32 %v11310_v61, %v7678_v62  ;;  %v7679_v7 = vmul.f32 %v8958_v54, %v7665_v33  ;;  %v7666_v35 = vmul.f32 %v9940_v63, %v11268_v0 }
0x1122   : > { %v9942_v2 = vpop.eup %9941 }
0x1123   : > { %v11315_v22 = vadd.f32 %v11097_v20, %v7692_v60  ;;  %v7693_v5 = vadd.f32 %v11310_v61, %v7679_v7  ;;  %v7680_v4 = vmul.f32 %v8958_v54, %v7666_v35  ;;  %v7667_v28 = vmul.f32 %v9942_v2, %v11270_v48 }
0x1125   : > { %v7710_v9 = vsel %vm1091_vm2, %v11315_v22, 0.0  ;;  %v11322_v1 = vadd.f32 %v11094_v36, %v7693_v5  ;;  %v7694_v42 = vadd.f32 %v11310_v61, %v7680_v4  ;;  %v7681_v12 = vmul.f32 %v8958_v54, %v7667_v28 }
0x1126   : > { %7711 = vadd.xlane.f32.xlu0 %v7710_v9 }
0x1127   : > { %v7713_v0 = vsel %vm1091_vm2, %v11322_v1, 0.0  ;;  %v7702_v20 = vadd.f32 %v11106_v47, %v7694_v42  ;;  %v7695_v16 = vadd.f32 %v11310_v61, %v7681_v12 }
0x1128   : > { %7714 = vadd.xlane.f32.xlu1 %v7713_v0 }
0x1129   : > { %v7716_v48 = vsel %vm1091_vm2, %v7702_v20, 0.0  ;;  %v11331_v14 = vadd.f32 %v11102_v45, %v7695_v16 }
0x112a   : > { %7717 = vadd.xlane.f32.xlu0 %v7716_v48 }
0x112b   : > { %v7719_v36 = vsel %vm1091_vm2, %v11331_v14, 0.0 }
0x112c   : > { %7720 = vadd.xlane.f32.xlu1 %v7719_v36 }
0x1197   : > { %v7630_v19 = vpop.xlane.xlu0 %7629 }
0x1198   : > { %v7644_v3 = vmul.f32 0.03125, %v7630_v19 }
0x1199   : > { %v7633_v41 = vpop.xlane.xlu1 %7632 }
0x119a   : > { %v7652_v13 = vadd.f32 1e-05, %v7644_v3  ;;  %v7645_v25 = vmul.f32 0.03125, %v7633_v41 }
0x119b   : > { %v7636_v40 = vpop.xlane.xlu0 %7635 }
0x119c   : > { %9943 = vrsqrt.f32 %v7652_v13  ;;  %v7653_v47 = vadd.f32 1e-05, %v7645_v25  ;;  %v7646_v32 = vmul.f32 0.03125, %v7636_v40 }
0x119d   : > { %v7639_v18 = vpop.xlane.xlu1 %7638 }
0x119e   : > { %9945 = vrsqrt.f32 %v7653_v47  ;;  %v7654_v21 = vadd.f32 1e-05, %v7646_v32  ;;  %v7647_v15 = vmul.f32 0.03125, %v7639_v18 }
0x11a0   : > { %9947 = vrsqrt.f32 %v7654_v21  ;;  %v7655_v45 = vadd.f32 1e-05, %v7647_v15 }
0x11a2   : > { %9949 = vrsqrt.f32 %v7655_v45 }
0x11a6   : > { %v9944_v30 = vpop.eup %9943 }
0x11a7   : > { %v7668_v17 = vmul.f32 %v9944_v30, %v11280_v38 }
0x11a8   : > { %v9946_v34 = vpop.eup %9945 }
0x11a9   : > { %v7682_v37 = vmul.f32 %v8958_v54, %v7668_v17  ;;  %v7669_v29 = vmul.f32 %v9946_v34, %v11282_v31 }
0x11aa   : > { %v9948_v58 = vpop.eup %9947 }
0x11ab   : > { %v7696_v8 = vadd.f32 %v11310_v61, %v7682_v37  ;;  %v7683_v43 = vmul.f32 %v8958_v54, %v7669_v29  ;;  %v7670_v23 = vmul.f32 %v9948_v58, %v11286_v39 }
0x11ac   : > { %v9950_v56 = vpop.eup %9949 }
0x11ad   : > { %v7704_v24 = vadd.f32 %v11113_v10, %v7696_v8  ;;  %v7697_v49 = vadd.f32 %v11310_v61, %v7683_v43  ;;  %v7684_v53 = vmul.f32 %v8958_v54, %v7670_v23  ;;  %v7671_v11 = vmul.f32 %v9950_v56, %v11291_v27 }
0x11af   : > { %v7722_v38 = vsel %vm1091_vm2, %v7704_v24, 0.0  ;;  %v7705_v57 = vadd.f32 %v11110_v26, %v7697_v49  ;;  %v7698_v31 = vadd.f32 %v11310_v61, %v7684_v53  ;;  %v7685_v44 = vmul.f32 %v8958_v54, %v7671_v11  ;;  %v8960_v11 = vld [vmem:[%s936_s28] ss:$0 sm:$0xff] }
0x11b0   : > { %7723 = vadd.xlane.f32.xlu0 %v7722_v38 }
0x11b1   : > { %v7725_v6 = vsel %vm1091_vm2, %v7705_v57, 0.0  ;;  %v7706_v39 = vadd.f32 %v11125_v52, %v7698_v31  ;;  %v7699_v55 = vadd.f32 %v11310_v61, %v7685_v44  ;;  %v8961_v31 = vld [vmem:[%s939_s0] ss:$0 sm:$0xff] }
0x11b2   : > { %7726 = vadd.xlane.f32.xlu1 %v7725_v6 }
0x11b3   : > { %v7712_v10 = vpop.xlane.xlu0 %7711  ;;  %v7728_v59 = vsel %vm1091_vm2, %v7706_v39, 0.0  ;;  %v7707_v27 = vadd.f32 %v11122_v51, %v7699_v55 }
0x11b4   : > { %v7734_v46 = vmul.f32 0.03125, %v7712_v10  ;;  %7729 = vadd.xlane.f32.xlu0 %v7728_v59 }
0x11b5   : > { %v7715_v50 = vpop.xlane.xlu1 %7714  ;;  %v7731_v26 = vsel %vm1091_vm2, %v7707_v27, 0.0 }
0x11b6   : > { %v11352_v54 = vsub.f32 %v11315_v22, %v7734_v46  ;;  %v7735_v62 = vmul.f32 0.03125, %v7715_v50  ;;  %7732 = vadd.xlane.f32.xlu1 %v7731_v26 }
0x11b7   : > { %v7718_v33 = vpop.xlane.xlu0 %7717 }
0x11b8   : > { %v11355_v52 = vsub.f32 %v11322_v1, %v7735_v62  ;;  %v7736_v61 = vmul.f32 0.03125, %v7718_v33  ;;  %v7750_v63 = vmul.f32 %v11352_v54, %v11352_v54 }
0x11b9   : > { %v7721_v60 = vpop.xlane.xlu1 %7720 }
0x11ba   : > { %v11359_v51 = vsub.f32 %v7702_v20, %v7736_v61  ;;  %v7737_v7 = vmul.f32 0.03125, %v7721_v60  ;;  %v7758_v35 = vsel %vm1091_vm2, %v7750_v63, 0.0  ;;  %v7751_v2 = vmul.f32 %v11355_v52, %v11355_v52 }
0x11bb   : > { %7759 = vadd.xlane.f32.xlu0 %v7758_v35 }
0x11bc   : > { %v11365_v22 = vsub.f32 %v11331_v14, %v7737_v7  ;;  %v7761_v5 = vsel %vm1091_vm2, %v7751_v2, 0.0  ;;  %v7752_v4 = vmul.f32 %v11359_v51, %v11359_v51 }
0x11bd   : > { %7762 = vadd.xlane.f32.xlu1 %v7761_v5 }
0x11be   : > { %v7764_v28 = vsel %vm1091_vm2, %v7752_v4, 0.0  ;;  %v7753_v9 = vmul.f32 %v11365_v22, %v11365_v22 }
0x11bf   : > { %7765 = vadd.xlane.f32.xlu0 %v7764_v28 }
0x11c0   : > { %v7767_v1 = vsel %vm1091_vm2, %v7753_v9, 0.0 }
0x11c1   : > { %7768 = vadd.xlane.f32.xlu1 %v7767_v1 }
0x123d   : > { %v7724_v42 = vpop.xlane.xlu0 %7723 }
0x123e   : > { %v7738_v12 = vmul.f32 0.03125, %v7724_v42 }
0x123f   : > { %v7727_v0 = vpop.xlane.xlu1 %7726 }
0x1240   : > { %v11374_v20 = vsub.f32 %v7704_v24, %v7738_v12  ;;  %v7739_v16 = vmul.f32 0.03125, %v7727_v0 }
0x1241   : > { %v7730_v48 = vpop.xlane.xlu0 %7729 }
0x1242   : > { %v11376_v14 = vsub.f32 %v7705_v57, %v7739_v16  ;;  %v7740_v36 = vmul.f32 0.03125, %v7730_v48  ;;  %v7754_v19 = vmul.f32 %v11374_v20, %v11374_v20 }
0x1243   : > { %v7733_v3 = vpop.xlane.xlu1 %7732 }
0x1244   : > { %v11380_v41 = vsub.f32 %v7706_v39, %v7740_v36  ;;  %v7741_v13 = vmul.f32 0.03125, %v7733_v3  ;;  %v7770_v25 = vsel %vm1091_vm2, %v7754_v19, 0.0  ;;  %v7755_v40 = vmul.f32 %v11376_v14, %v11376_v14 }
0x1245   : > { %7771 = vadd.xlane.f32.xlu0 %v7770_v25 }
0x1246   : > { %v11385_v47 = vsub.f32 %v7707_v27, %v7741_v13  ;;  %v7773_v32 = vsel %vm1091_vm2, %v7755_v40, 0.0  ;;  %v7756_v18 = vmul.f32 %v11380_v41, %v11380_v41 }
0x1247   : > { %7774 = vadd.xlane.f32.xlu1 %v7773_v32 }
0x1248   : > { %v7760_v21 = vpop.xlane.xlu0 %7759  ;;  %v7776_v15 = vsel %vm1091_vm2, %v7756_v18, 0.0  ;;  %v7757_v45 = vmul.f32 %v11385_v47, %v11385_v47 }
0x1249   : > { %v7782_v30 = vmul.f32 0.03125, %v7760_v21  ;;  %7777 = vadd.xlane.f32.xlu0 %v7776_v15  ;;  %v10024_v21 = vmov (!%p8962_p9), 0  }
0x124a   : > { %v7763_v17 = vpop.xlane.xlu1 %7762  ;;  %v7779_v34 = vsel %vm1091_vm2, %v7757_v45, 0.0  ;;  %9975 = vset.pattern.permute.xlu0 (!%p8962_p9), %v10024_v21  ;;  %9976 = vset.pattern.permute.xlu1 (!%p8962_p9), %v10024_v21 }
0x124b   : > { %v7790_v37 = vadd.f32 1e-05, %v7782_v30  ;;  %v7783_v29 = vmul.f32 0.03125, %v7763_v17  ;;  %7780 = vadd.xlane.f32.xlu1 %v7779_v34 }
0x124c   : > { %v7766_v58 = vpop.xlane.xlu0 %7765 }
0x124d   : > { %9951 = vrsqrt.f32 %v7790_v37  ;;  %v7791_v8 = vadd.f32 1e-05, %v7783_v29  ;;  %v7784_v43 = vmul.f32 0.03125, %v7766_v58  ;;  %v8971_v58 = vld [vmem:[%s11548_s30] ss:$0 sm:$0xff] (!%p8962_p9) }
0x124e   : > { %v7769_v23 = vpop.xlane.xlu1 %7768 }
0x124f   : > { %9953 = vrsqrt.f32 %v7791_v8  ;;  %v7792_v56 = vadd.f32 1e-05, %v7784_v43  ;;  %v7785_v24 = vmul.f32 0.03125, %v7769_v23 }
0x1251   : > { %9955 = vrsqrt.f32 %v7792_v56  ;;  %v7793_v49 = vadd.f32 1e-05, %v7785_v24 }
0x1253   : > { %9957 = vrsqrt.f32 %v7793_v49 }
0x1257   : > { %v9952_v53 = vpop.eup %9951 }
0x1258   : > { %v7806_v38 = vmul.f32 %v9952_v53, %v11352_v54 }
0x1259   : > { %v9954_v57 = vpop.eup %9953 }
0x125a   : > { %v7820_v44 = vmul.f32 %v8960_v11, %v7806_v38  ;;  %v7807_v6 = vmul.f32 %v9954_v57, %v11355_v52 }
0x125b   : > { %v9956_v39 = vpop.eup %9955 }
0x125c   : > { %v7834_v55 = vadd.f32 %v8961_v31, %v7820_v44  ;;  %v7821_v10 = vmul.f32 %v8960_v11, %v7807_v6  ;;  %v7808_v59 = vmul.f32 %v9956_v39, %v11359_v51 }
0x125d   : > { %v9958_v27 = vpop.eup %9957 }
0x125e   : > { %7842 = vst.msk [vmem:[#allocation2] sm:$0xff] %vm1091_vm2, %v7834_v55  ;;  %v7835_v46 = vadd.f32 %v8961_v31, %v7821_v10  ;;  %v7822_v50 = vmul.f32 %v8960_v11, %v7808_v59  ;;  %v7809_v26 = vmul.f32 %v9958_v27, %v11365_v22 }
0x1260   : > { %7843 = vst.msk [vmem:[#allocation2 + $0x8] sm:$0xff] %vm1091_vm2, %v7835_v46  ;;  %v7836_v54 = vadd.f32 %v8961_v31, %v7822_v50  ;;  %v7823_v62 = vmul.f32 %v8960_v11, %v7809_v26 }
0x1262   : > { %7844 = vst.msk [vmem:[#allocation2 + $0x10] sm:$0xff] %vm1091_vm2, %v7836_v54  ;;  %v7837_v33 = vadd.f32 %v8961_v31, %v7823_v62 }
0x1264   : > { %7845 = vst.msk [vmem:[#allocation2 + $0x18] sm:$0xff] %vm1091_vm2, %v7837_v33 }
0x12d2   : > { %v7772_v52 = vpop.xlane.xlu0 %7771 }
0x12d3   : > { %v7786_v61 = vmul.f32 0.03125, %v7772_v52 }
0x12d4   : > { %v7775_v63 = vpop.xlane.xlu1 %7774 }
0x12d5   : > { %v7794_v60 = vadd.f32 1e-05, %v7786_v61  ;;  %v7787_v51 = vmul.f32 0.03125, %v7775_v63 }
0x12d6   : > { %v7778_v7 = vpop.xlane.xlu0 %7777 }
0x12d7   : > { %9959 = vrsqrt.f32 %v7794_v60  ;;  %v7795_v35 = vadd.f32 1e-05, %v7787_v51  ;;  %v7788_v2 = vmul.f32 0.03125, %v7778_v7 }
0x12d8   : > { %v7781_v5 = vpop.xlane.xlu1 %7780 }
0x12d9   : > { %9961 = vrsqrt.f32 %v7795_v35  ;;  %v7796_v22 = vadd.f32 1e-05, %v7788_v2  ;;  %v7789_v4 = vmul.f32 0.03125, %v7781_v5 }
0x12db   : > { %9963 = vrsqrt.f32 %v7796_v22  ;;  %v7797_v28 = vadd.f32 1e-05, %v7789_v4 }
0x12dd   : > { %9965 = vrsqrt.f32 %v7797_v28 }
0x12e1   : > { %v9960_v9 = vpop.eup %9959 }
0x12e2   : > { %v7810_v1 = vmul.f32 %v9960_v9, %v11374_v20 }
0x12e3   : > { %v9962_v42 = vpop.eup %9961 }
0x12e4   : > { %v7824_v12 = vmul.f32 %v8960_v11, %v7810_v1  ;;  %v7811_v0 = vmul.f32 %v9962_v42, %v11376_v14  ;;  %v10022_v14 = vmov (!%p8962_p9), 0.0  }
0x12e5   : > { %v9964_v16 = vpop.eup %9963  ;;  %9660 = vmatprep.subr.mxu0 (!%p8962_p9), %v10022_v14  ;;  %9665 = vmatprep.subr.mxu1 (!%p8962_p9), %v10022_v14 }
0x12e6   : > { %v7838_v48 = vadd.f32 %v8961_v31, %v7824_v12  ;;  %v7825_v36 = vmul.f32 %v8960_v11, %v7811_v0  ;;  %v7812_v19 = vmul.f32 %v9964_v16, %v11380_v41  ;;  %v7854_v41 = vld [vmem:[%s11546_s6] sm:$0x3f] (!%p8962_p9)  ;;  %9661 = vmatpush3.msra.mxu0 (!%p8962_p9), %v7834_v55  ;;  %9662 = vmatprep.mubr.msk.f32.mxu0 (!%p8962_p9), %vm10023_vm5, %v10022_v14 }
0x12e7   : > { %v9966_v3 = vpop.eup %9965  ;;  %9666 = vmatpush3.msra.mxu1 (!%p8962_p9), %v7835_v46  ;;  %9667 = vmatprep.mubr.msk.f32.mxu1 (!%p8962_p9), %vm10023_vm5, %v10022_v14 }
0x12e8   : > { %7846 = vst.msk [vmem:[#allocation2 + $0x20] sm:$0xff] %vm1091_vm2, %v7838_v48  ;;  %v7839_v13 = vadd.f32 %v8961_v31, %v7825_v36  ;;  %v7826_v25 = vmul.f32 %v8960_v11, %v7812_v19  ;;  %v7813_v40 = vmul.f32 %v9966_v3, %v11385_v47  ;;  %7853 = sbr.rel (%p8962_p9) target bundleno = 5242 (0x147a), region = 116  ;;  %9663 = vmatmul.mubr.msk.f32.vlgmr.msra.gmra.mrb[0].mxu0 (!%p8962_p9), %vm1335_vm4, %v7854_v41  ;;  %v7855_v47 = vld [vmem:[%s11547_s1] sm:$0x3f] (!%p8962_p9) }
0x12e9   : > { %9668 = vmatmul.mubr.msk.f32.vlgmr.msra.gmra.mrb[0].mxu1 (!%p8962_p9), %vm1335_vm4, %v7854_v41  ;;  %9670 = vmatprep.subr.mxu0 (!%p8962_p9), %v10022_v14 }
0x12ea   : > { %7847 = vst.msk [vmem:[#allocation2 + $0x28] sm:$0xff] %vm1091_vm2, %v7839_v13  ;;  %v7840_v32 = vadd.f32 %v8961_v31, %v7826_v25  ;;  %v7827_v20 = vmul.f32 %v8960_v11, %v7813_v40  ;;  %9675 = vmatprep.subr.mxu1 (!%p8962_p9), %v10022_v14  ;;  %9671 = vmatpush3.msra.mxu0 (!%p8962_p9), %v7836_v54  ;;  %v8498_v40 = vlaneseq (!%p8962_p9) }
0x12eb   : > { %9672 = vmatprep.mubr.msk.f32.mxu0 (!%p8962_p9), %vm10023_vm5, %v10022_v14  ;;  %9676 = vmatpush3.msra.mxu1 (!%p8962_p9), %v7837_v33 }
0x12ec   : > { %7848 = vst.msk [vmem:[#allocation2 + $0x30] sm:$0xff] %vm1091_vm2, %v7840_v32  ;;  %v7841_v18 = vadd.f32 %v8961_v31, %v7827_v20  ;;  %9677 = vmatprep.mubr.msk.f32.mxu1 (!%p8962_p9), %vm10023_vm5, %v10022_v14  ;;  %9673 = vmatmul.mubr.msk.f32.vlgmr.msra.gmra.mrb[2].mxu0 (!%p8962_p9), %vm1335_vm4, %v7854_v41  ;;  %v8499_v20 = vand.u32 (!%p8962_p9), 127, %v8498_v40 }
0x12ed   : > { %9678 = vmatmul.mubr.msk.f32.vlgmr.msra.gmra.mrb[2].mxu1 (!%p8962_p9), %vm1335_vm4, %v7854_v41  ;;  %9680 = vmatprep.subr.mxu0 (!%p8962_p9), %v10022_v14 }
0x12ee   : > { %7849 = vst.msk [vmem:[#allocation2 + $0x38] sm:$0xff] %vm1091_vm2, %v7841_v18  ;;  %9685 = vmatprep.subr.mxu1 (!%p8962_p9), %v10022_v14  ;;  %9681 = vmatpush3.msra.mxu0 (!%p8962_p9), %v7838_v48  ;;  %v8972_v48 = vld [vmem:[#allocation3] ss:$0 sm:$0xff] (!%p8962_p9) }
0x12ef   : > { %9682 = vmatprep.mubr.msk.f32.mxu0 %vm10023_vm5, %v10022_v14  ;;  %9686 = vmatpush3.msra.mxu1 %v7839_v13 }
0x12f0   : > { %9687 = vmatprep.mubr.msk.f32.mxu1 %vm10023_vm5, %v10022_v14  ;;  %9683 = vmatmul.mubr.msk.f32.vlgmr.msra.gmra.mrb[4].mxu0 %vm1335_vm4, %v7854_v41 }
0x12f1   : > { %9688 = vmatmul.mubr.msk.f32.vlgmr.msra.gmra.mrb[4].mxu1 %vm1335_vm4, %v7854_v41  ;;  %9690 = vmatprep.subr.mxu0 %v10022_v14 }
0x12f2   : > { %9695 = vmatprep.subr.mxu1 %v10022_v14  ;;  %9691 = vmatpush3.msra.mxu0 %v7840_v32 }
0x12f3   : > { %9692 = vmatprep.mubr.msk.f32.mxu0 %vm10023_vm5, %v10022_v14  ;;  %9696 = vmatpush3.msra.mxu1 %v7841_v18  ;;  %v8501_v18 = vshrl.u32 %v8498_v40, 7 }
0x12f4   : > { %9697 = vmatprep.mubr.msk.f32.mxu1 %vm10023_vm5, %v10022_v14  ;;  %9693 = vmatmul.mubr.msk.f32.vlgmr.msra.gmra.mrb[6].mxu0 %vm1335_vm4, %v7854_v41 }
0x12f5   : > { %9698 = vmatmul.mubr.msk.f32.vlgmr.msra.gmra.mrb[6].mxu1 %vm1335_vm4, %v7854_v41  ;;  %7858 = vperm.xlu0 %9975, %v7855_v47   ;;  %v8502_v41 = vsub.s32 %v8499_v20, %v8501_v18 }
0x1374   : > { %v7859_v15 = vpop.permute.xlu0 %7858 }
0x13bb   : > { %v7930_v45 = vpop.f32.mrb[0].mxu0 }
0x13bc   : > { %v8000_v30 = vpop.f32.mrb[0].mxu1  ;;  %v7931_v17 = vadd.f32 %v7930_v45, %v7859_v15  ;;  %v9664_v37 = vpop.f32.mrb[1].mxu0 }
0x13bd   : > { %v8001_v34 = vadd.f32 %v8000_v30, %v7859_v15  ;;  %v9669_v29 = vpop.f32.mrb[1].mxu1 }
0x13be   : > { %v8424_v8 = vmax.f32 %v7931_v17, 0.0 }
0x13bf   : > { %v8425_v43 = vmax.f32 %v8001_v34, 0.0  ;;  %v8070_v23 = vpop.f32.mrb[2].mxu0 }
0x13c0   : > { %v8140_v56 = vpop.f32.mrb[2].mxu1  ;;  %v8071_v24 = vadd.f32 %v8070_v23, %v7859_v15  ;;  %v9674_v53 = vpop.f32.mrb[3].mxu0  ;;  %v8439_v57 = vmul.f32 %v8971_v58, %v8424_v8 }
0x13c1   : > { %v8141_v49 = vadd.f32 %v8140_v56, %v7859_v15  ;;  %v9679_v11 = vpop.f32.mrb[3].mxu1  ;;  %v8440_v38 = vmul.f32 %v8971_v58, %v8425_v43 }
0x13c2   : > { %v8426_v31 = vmax.f32 %v8071_v24, 0.0  ;;  %v8448_v39 = vsel %vm8447_vm6, %v8439_v57, 0.0 }
0x13c3   : > { %v8427_v44 = vmax.f32 %v8141_v49, 0.0  ;;  %v8451_v6 = vsel %vm8447_vm6, %v8440_v38, 0.0  ;;  %v8210_v55 = vpop.f32.mrb[4].mxu0  ;;  %8449 = vadd.xlane.f32.xlu0 %v8448_v39 }
0x13c4   : > { %8452 = vadd.xlane.f32.xlu1 %v8451_v6  ;;  %v8280_v10 = vpop.f32.mrb[4].mxu1  ;;  %v8211_v59 = vadd.f32 %v8210_v55, %v7859_v15  ;;  %v9684_v27 = vpop.f32.mrb[5].mxu0  ;;  %v8441_v50 = vmul.f32 %v8971_v58, %v8426_v31 }
0x13c5   : > { %v9689_v46 = vpop.f32.mrb[5].mxu1  ;;  %v8281_v54 = vadd.f32 %v8280_v10, %v7859_v15  ;;  %v8442_v33 = vmul.f32 %v8971_v58, %v8427_v44 }
0x13c6   : > { %v8428_v26 = vmax.f32 %v8211_v59, 0.0  ;;  %v8454_v62 = vsel %vm8447_vm6, %v8441_v50, 0.0 }
0x13c7   : > { %v8350_v61 = vpop.f32.mrb[6].mxu0  ;;  %v8429_v51 = vmax.f32 %v8281_v54, 0.0  ;;  %v8457_v35 = vsel %vm8447_vm6, %v8442_v33, 0.0 }
0x13c8   : > { %v8420_v52 = vpop.f32.mrb[6].mxu1  ;;  %8455 = vadd.xlane.f32.xlu1 %v8454_v62  ;;  %v9694_v63 = vpop.f32.mrb[7].mxu0  ;;  %v8351_v7 = vadd.f32 %v8350_v61, %v7859_v15  ;;  %v8443_v2 = vmul.f32 %v8971_v58, %v8428_v26 }
0x13c9   : > { %v9699_v60 = vpop.f32.mrb[7].mxu1  ;;  %v8421_v5 = vadd.f32 %v8420_v52, %v7859_v15  ;;  %v8444_v28 = vmul.f32 %v8971_v58, %v8429_v51 }
0x13ca   : > { %v8430_v22 = vmax.f32 %v8351_v7, 0.0  ;;  %v8460_v4 = vsel %vm8447_vm6, %v8443_v2, 0.0 }
0x13cb   : > { %v8431_v9 = vmax.f32 %v8421_v5, 0.0  ;;  %v8463_v1 = vsel %vm8447_vm6, %v8444_v28, 0.0 }
0x13cc   : > { %8458 = vadd.xlane.f32.xlu1 %v8457_v35  ;;  %v8445_v42 = vmul.f32 %v8971_v58, %v8430_v22 }
0x13cd   : > { %v8446_v0 = vmul.f32 %v8971_v58, %v8431_v9 }
0x13ce   : > { %v8466_v12 = vsel %vm8447_vm6, %v8445_v42, 0.0 }
0x13cf   : > { %v8469_v16 = vsel %vm8447_vm6, %v8446_v0, 0.0 }
0x13d0   : > { %8461 = vadd.xlane.f32.xlu1 %v8460_v4 }
0x13d4   : > { %8464 = vadd.xlane.f32.xlu1 %v8463_v1 }
0x13d8   : > { %8467 = vadd.xlane.f32.xlu1 %v8466_v12 }
0x13dc   : > { %8470 = vadd.xlane.f32.xlu1 %v8469_v16 }
0x13ed   : > { %8479 = vperm.xlu1 %9976, %v8972_v48  }
0x1450   : > { %v8450_v47 = vpop.xlane.xlu0 %8449 }
0x1451   : > { %v8453_v36 = vpop.xlane.xlu1 %8452 }
0x1455   : > { %v8456_v19 = vpop.xlane.xlu1 %8455 }
0x1459   : > { %v8459_v3 = vpop.xlane.xlu1 %8458 }
0x145d   : > { %v8462_v13 = vpop.xlane.xlu1 %8461 }
0x1461   : > { %v8465_v25 = vpop.xlane.xlu1 %8464 }
0x1465   : > { %v8468_v32 = vpop.xlane.xlu1 %8467 }
0x1469   : > { %v8471_v14 = vpop.xlane.xlu1 %8470 }
0x146d   : > { %v8480_v21 = vpop.permute.xlu1 %8479 }
0x146e   : > { %v8482_v15 = vadd.f32 %v8480_v21, %v8450_v47  ;;  %v8483_v45 = vadd.f32 %v8480_v21, %v8453_v36  ;;  %v8484_v30 = vadd.f32 %v8480_v21, %v8456_v19  ;;  %v8485_v17 = vadd.f32 %v8480_v21, %v8459_v3 }
0x146f   : > { %v8486_v34 = vadd.f32 %v8480_v21, %v8462_v13  ;;  %v8487_v37 = vadd.f32 %v8480_v21, %v8465_v25  ;;  %v8488_v43 = vadd.f32 %v8480_v21, %v8468_v32  ;;  %v8489_v23 = vadd.f32 %v8480_v21, %v8471_v14 }
0x1470   : > { %v8503_v29 = vrot.slane %v8482_v15, %v8502_v41  ;;  %v8507_v58 = vrot.slane %v8483_v45, %v8502_v41  ;;  %v8511_v8 = vrot.slane %v8484_v30, %v8502_v41  ;;  %v8515_v56 = vrot.slane %v8485_v17, %v8502_v41 }
0x1471   : > { %v8519_v49 = vrot.slane %v8486_v34, %v8502_v41  ;;  %v8523_v11 = vrot.slane %v8487_v37, %v8502_v41  ;;  %v8527_v57 = vrot.slane %v8488_v43, %v8502_v41  ;;  %v8531_v44 = vrot.slane %v8489_v23, %v8502_v41 }
0x1472   : > { %v8533_v24 = vsel %vm8532_vm7, %v8507_v58, %v8503_v29 }
0x1473   : > { %v8535_v53 = vsel %vm8534_vm8, %v8511_v8, %v8533_v24 }
0x1474   : > { %v8537_v38 = vsel %vm8536_vm9, %v8515_v56, %v8535_v53 }
0x1475   : > { %v8539_v31 = vsel %vm8538_vm10, %v8519_v49, %v8537_v38 }
0x1476   : > { %v8541_v6 = vsel %vm8540_vm11, %v8523_v11, %v8539_v31 }
0x1477   : > { %v8543_v39 = vsel %vm8542_vm12, %v8527_v57, %v8541_v6 }
0x1478   : > { %v8545_v55 = vsel %vm8544_vm13, %v8531_v44, %v8543_v39 }
0x1479   : > { %8548 = vst.msk [vmem:[%s10263_s4] sm:$0xff] %vm8547_vm14, %v8545_v55 }
0x147a PF: > { %s11549_s23 = sld [smem:[#allocation7_spill]]  ;;  %s11550_s29 = sld [smem:[#allocation5_spill]] }
0x147b   : > { %s11551_s30 = sld [smem:[#allocation6_spill]]  ;;  %s11552_s4 = sld [smem:[#allocation8_spill]] }
0x147c   : > { %s11553_s0 = sld [smem:[#allocation9_spill]] }
0x1480   : > { %s34_s23 = sadd.s32 1, %s11549_s23  }
0x1481   : > { %p31_p10 = scmp.ge.s32.totalorder %s34_s23, 8  }
0x1483   :  { %33 = sbr.rel (!%p31_p10) target bundleno = 15 (0xf), region = 191 }

</bundles_post_ra>
